<compile_context>
chip_gen: v5e
topology: v5e:2x2
jax: 0.10.0
libtpu: 0.0.40
codegen_flags: <defaults>
</compile_context>

<pallas_src>
import functools

import numpy as np
import jax
import jax.numpy as jnp
from jax.experimental import pallas as pl
from jax.experimental.pallas import tpu as pltpu  # noqa: F401  (TPU backend)

# ----------------------------- configuration -------------------------------
PAD = 0                      # Constants.PAD
V = 16                       # n_src_vocab == n_tgt_vocab (shared embedding)
D = 32                       # d_word_vec == d_model
D_INNER = 64                 # d_inner
N_LAYERS = 2                 # n_layers
N_HEAD = 4                   # n_head
DK = 8                       # d_k
DV = 8                       # d_v
LEN_SRC = 8                  # len_max_seq
LEN_TGT = 8                  # len_max_tgt (decoder sees LEN_TGT-1 after [:, :-1])
B = 2                        # batch

MHA_KEYS = ("wqkv", "bqkv", "wo", "bo", "g", "b")
FFN_KEYS = ("w1", "b1", "w2", "b2", "g", "b")


# ------------------------------ fused kernel --------------------------------
def fused_transformer_kernel(
    # activations / masks
    enc_emb_ref, dec_emb_ref,
    enc_slf_mask_ref, dec_slf_mask_ref, dec_enc_mask_ref,
    np_src_ref, np_tgt_ref,
    # encoder self-attention params (stacked over layers)
    ea_wqkv, ea_bqkv, ea_wo, ea_bo, ea_g, ea_b,
    # encoder FFN params
    ef_w1, ef_b1, ef_w2, ef_b2, ef_g, ef_b,
    # decoder self-attention params
    ds_wqkv, ds_bqkv, ds_wo, ds_bo, ds_g, ds_b,
    # decoder cross-attention params
    de_wqkv, de_bqkv, de_wo, de_bo, de_g, de_b,
    # decoder FFN params
    df_w1, df_b1, df_w2, df_b2, df_g, df_b,
    # shared projection weight (emb.T)
    proj_w_ref,
    # output
    out_ref,
    *, temperature, scale,
):
    inv_temp = 1.0 / temperature

    def layer_norm(x, g, bb):
        mu = jnp.mean(x, axis=-1, keepdims=True)
        xc = x - mu
        var = jnp.mean(xc * xc, axis=-1, keepdims=True)
        return xc * jax.lax.rsqrt(var + 1e-5) * g + bb

    def mha(x_q, x_kv, mask, wqkv, bqkv, wo, bo, g, bb):
        # x_q: (Rq, D), x_kv: (Rk, D), mask: (Rq, Rk) additive (0 / -1e9,
        # block-diagonal over batch).  Heads are static lane slices; the
        # output projection is folded into the head loop as a sum of
        # per-head (Rq, DV) @ (DV, D) products (no lane concatenation).
        nq = N_HEAD * DK
        residual = x_q
        if x_kv is x_q:
            # self-attention: one fused (rows, D) @ (D, 3*nq) matmul
            qkv = jnp.dot(x_q, wqkv, preferred_element_type=jnp.float32) + bqkv
            q, k, v = qkv[:, :nq], qkv[:, nq:2 * nq], qkv[:, 2 * nq:]
        else:
            q = jnp.dot(x_q, wqkv[:, :nq],
                        preferred_element_type=jnp.float32) + bqkv[:, :nq]
            kv = jnp.dot(x_kv, wqkv[:, nq:],
                         preferred_element_type=jnp.float32) + bqkv[:, nq:]
            k, v = kv[:, :nq], kv[:, nq:]

        acc = None
        for h in range(N_HEAD):
            qh = q[:, h * DK:(h + 1) * DK]
            kh = k[:, h * DK:(h + 1) * DK]
            vh = v[:, h * DV:(h + 1) * DV]
            s = jax.lax.dot_general(qh, kh, (((1,), (1,)), ((), ())),
                                    preferred_element_type=jnp.float32)
            s = s * inv_temp + mask
            s = s - jnp.max(s, axis=-1, keepdims=True)
            p = jnp.exp(s)
            p = p * pl.reciprocal(jnp.sum(p, axis=-1, keepdims=True), approx=True)
            oh = jnp.dot(p, vh, preferred_element_type=jnp.float32)
            contrib = jnp.dot(oh, wo[h * DV:(h + 1) * DV, :],
                              preferred_element_type=jnp.float32)
            acc = contrib if acc is None else acc + contrib

        o = acc + bo + residual
        return layer_norm(o, g, bb)

    def ffn(x, w1, b1, w2, b2, g, bb):
        # PositionwiseFeedForward (Conv1d k=1 pair == per-position Linear)
        residual = x
        h = jnp.maximum(jnp.dot(x, w1, preferred_element_type=jnp.float32) + b1, 0.0)
        o = jnp.dot(h, w2, preferred_element_type=jnp.float32) + b2 + residual
        return layer_norm(o, g, bb)

    enc_mask = enc_slf_mask_ref[...]
    dec_mask = dec_slf_mask_ref[...]
    xat_mask = dec_enc_mask_ref[...]
    np_src = np_src_ref[...]
    np_tgt = np_tgt_ref[...]

    # ---------------- encoder (Encoder_answerfeature) ----------------
    enc_x = enc_emb_ref[...]
    for li in range(N_LAYERS):
        enc_x = mha(enc_x, enc_x, enc_mask,
                    ea_wqkv[li], ea_bqkv[li], ea_wo[li], ea_bo[li],
                    ea_g[li], ea_b[li]) * np_src
        enc_x = ffn(enc_x, ef_w1[li], ef_b1[li], ef_w2[li], ef_b2[li],
                    ef_g[li], ef_b[li]) * np_src

    # ---------------- decoder ----------------
    dec_x = dec_emb_ref[...]
    for li in range(N_LAYERS):
        dec_x = mha(dec_x, dec_x, dec_mask,
                    ds_wqkv[li], ds_bqkv[li], ds_wo[li], ds_bo[li],
                    ds_g[li], ds_b[li]) * np_tgt
        dec_x = mha(dec_x, enc_x, xat_mask,
                    de_wqkv[li], de_bqkv[li], de_wo[li], de_bo[li],
                    de_g[li], de_b[li]) * np_tgt
        dec_x = ffn(dec_x, df_w1[li], df_b1[li], df_w2[li], df_b2[li],
                    df_g[li], df_b[li]) * np_tgt

    # ---------------- shared-weight projection ----------------
    out_ref[...] = jnp.dot(dec_x, proj_w_ref[...],
                           preferred_element_type=jnp.float32) * scale


# ------------------------------ model pieces --------------------------------
def get_sinusoid_encoding_table(n_position, d_hid, padding_idx=None):
    def cal_angle(position, hid_idx):
        return position / np.power(10000, 2 * (hid_idx // 2) / d_hid)

    table = np.array(
        [[cal_angle(pos, j) for j in range(d_hid)] for pos in range(n_position)],
        dtype=np.float64,
    )
    table[:, 0::2] = np.sin(table[:, 0::2])
    table[:, 1::2] = np.cos(table[:, 1::2])
    if padding_idx is not None:
        table[padding_idx] = 0.0
    return jnp.asarray(table, dtype=jnp.float32)


def make_params(key):
    keys = iter(jax.random.split(key, 64))

    def nrm(shape, std=0.02):
        return jax.random.normal(next(keys), shape, dtype=jnp.float32) * std

    emb = nrm((V, D)).at[PAD].set(0.0)          # shared src/tgt/projection embedding
    tok_type = nrm((2, D)).at[0].set(0.0)       # token_type_embeddings, padding_idx=0

    # per-layer weights stacked along a leading layer axis; biases/scales are
    # stored as (L, 1, X) so a static index inside the kernel yields (1, X).
    def mha_stack():
        return dict(
            wqkv=nrm((N_LAYERS, D, N_HEAD * (DK + DK + DV))),           # [Wq|Wk|Wv]
            bqkv=jnp.zeros((N_LAYERS, 1, N_HEAD * (DK + DK + DV)), jnp.float32),
            wo=nrm((N_LAYERS, N_HEAD * DV, D)),
            bo=jnp.zeros((N_LAYERS, 1, D), jnp.float32),
            g=jnp.ones((N_LAYERS, 1, D), jnp.float32),
            b=jnp.zeros((N_LAYERS, 1, D), jnp.float32),
        )

    def ffn_stack():
        return dict(
            w1=nrm((N_LAYERS, D, D_INNER)),
            b1=jnp.zeros((N_LAYERS, 1, D_INNER), jnp.float32),
            w2=nrm((N_LAYERS, D_INNER, D)),
            b2=jnp.zeros((N_LAYERS, 1, D), jnp.float32),
            g=jnp.ones((N_LAYERS, 1, D), jnp.float32),
            b=jnp.zeros((N_LAYERS, 1, D), jnp.float32),
        )

    return dict(
        emb=emb,
        tok_type=tok_type,
        pos_src=get_sinusoid_encoding_table(LEN_SRC + 1, D, padding_idx=0),
        pos_tgt=get_sinusoid_encoding_table(LEN_TGT + 1, D, padding_idx=0),
        enc_attn=mha_stack(), enc_ffn=ffn_stack(),
        dec_slf=mha_stack(), dec_enc=mha_stack(), dec_ffn=ffn_stack(),
    )


def make_block_mask(masked, b, lq, lk):
    """masked: (b, lq, lk) bool, True where attention is disallowed.
    Returns an additive (b*lq, b*lk) f32 mask (0 / -1e9) that is block-diagonal
    over the batch, so batched attention can run on the flattened token slab."""
    same = jnp.eye(b, dtype=jnp.bool_)[:, None, :, None]        # (b,1,b,1)
    within = masked[:, :, None, :]                              # (b,lq,1,lk)
    full = jnp.where(same, within, True)                        # (b,lq,b,lk)
    return jnp.where(full, jnp.float32(-1e9), jnp.float32(0.0)).reshape(b * lq, b * lk)


def transformer_forward(params, src_seq, src_pos, tgt_seq, tgt_pos, ans_seq, ans_pos):
    # tgt truncation, as in Transformer_answerfeature.forward
    tgt_seq = tgt_seq[:, :-1]
    tgt_pos = tgt_pos[:, :-1]
    del ans_pos  # unused by the reference encoder

    b, ls = src_seq.shape
    lt = tgt_seq.shape[1]

    src_pad = src_seq == PAD
    tgt_pad = tgt_seq == PAD

    # attention masks (additive, block-diagonal over batch)
    enc_slf = make_block_mask(
        jnp.broadcast_to(src_pad[:, None, :], (b, ls, ls)), b, ls, ls)
    subseq = jnp.triu(jnp.ones((lt, lt), dtype=jnp.bool_), k=1)[None]
    dec_slf = make_block_mask(
        jnp.broadcast_to(tgt_pad[:, None, :] | subseq, (b, lt, lt)), b, lt, lt)
    dec_enc = make_block_mask(
        jnp.broadcast_to(src_pad[:, None, :], (b, lt, ls)), b, lt, ls)

    np_src = (~src_pad).astype(jnp.float32).reshape(b * ls, 1)
    np_tgt = (~tgt_pad).astype(jnp.float32).reshape(b * lt, 1)

    # embedding sums (tiny integer gathers; done in plain JAX)
    enc_emb = (jnp.take(params["emb"], src_seq, axis=0)
               + jnp.take(params["pos_src"], src_pos, axis=0)
               + jnp.take(params["tok_type"], ans_seq, axis=0)).reshape(b * ls, D)
    dec_emb = (jnp.take(params["emb"], tgt_seq, axis=0)
               + jnp.take(params["pos_tgt"], tgt_pos, axis=0)).reshape(b * lt, D)

    proj_w = params["emb"].T                  # tgt_word_prj.weight (shared)

    operands = [enc_emb, dec_emb, enc_slf, dec_slf, dec_enc, np_src, np_tgt]
    operands += [params["enc_attn"][k] for k in MHA_KEYS]
    operands += [params["enc_ffn"][k] for k in FFN_KEYS]
    operands += [params["dec_slf"][k] for k in MHA_KEYS]
    operands += [params["dec_enc"][k] for k in MHA_KEYS]
    operands += [params["dec_ffn"][k] for k in FFN_KEYS]
    operands += [proj_w]

    kern = functools.partial(
        fused_transformer_kernel,
        temperature=float(np.power(DK, 0.5)),
        scale=float(D) ** -0.5,               # x_logit_scale
    )

    # Single fused pallas_call: no grid, every operand is a whole-array VMEM
    # block (total footprint is a few tens of KB).
    logits = pl.pallas_call(
        kern,
        out_shape=jax.ShapeDtypeStruct((b * lt, V), jnp.float32),
    )(*operands)
    return logits                              # == seq_logit.view(-1, n_tgt_vocab)


# ----------------------------------- main ------------------------------------
if __name__ == "__main__":
    key = jax.random.PRNGKey(0)
    kp, k1, k2, k3 = jax.random.split(key, 4)

    params = make_params(kp)

    src_seq = jax.random.randint(k1, (B, LEN_SRC), 1, V, dtype=jnp.int32)
    src_pos = jnp.broadcast_to(jnp.arange(1, LEN_SRC + 1, dtype=jnp.int32)[None], (B, LEN_SRC))
    tgt_seq = jax.random.randint(k2, (B, LEN_TGT), 1, V, dtype=jnp.int32)
    tgt_pos = jnp.broadcast_to(jnp.arange(1, LEN_TGT + 1, dtype=jnp.int32)[None], (B, LEN_TGT))
    ans_seq = jax.random.randint(k3, (B, LEN_SRC), 0, 2, dtype=jnp.int32)
    ans_pos = src_pos

    fwd = jax.jit(transformer_forward)
    out = fwd(params, src_seq, src_pos, tgt_seq, tgt_pos, ans_seq, ans_pos)
    out = jax.block_until_ready(out)

    assert out.shape == (B * (LEN_TGT - 1), V), out.shape
    assert bool(jnp.all(jnp.isfinite(out)))
    print("KERNEL_OK")
</pallas_src>

<mosaic_0001>
module attributes {stable_mosaic.version = 11 : i64} {
  func.func @fused_transformer_kernel(%arg0: memref<16x32xf32, #tpu.memory_space<vmem>>, %arg1: memref<14x32xf32, #tpu.memory_space<vmem>>, %arg2: memref<16x16xf32, #tpu.memory_space<vmem>>, %arg3: memref<14x14xf32, #tpu.memory_space<vmem>>, %arg4: memref<14x16xf32, #tpu.memory_space<vmem>>, %arg5: memref<16x1xf32, #tpu.memory_space<vmem>>, %arg6: memref<14x1xf32, #tpu.memory_space<vmem>>, %arg7: memref<2x32x96xf32, #tpu.memory_space<vmem>>, %arg8: memref<2x1x96xf32, #tpu.memory_space<vmem>>, %arg9: memref<2x32x32xf32, #tpu.memory_space<vmem>>, %arg10: memref<2x1x32xf32, #tpu.memory_space<vmem>>, %arg11: memref<2x1x32xf32, #tpu.memory_space<vmem>>, %arg12: memref<2x1x32xf32, #tpu.memory_space<vmem>>, %arg13: memref<2x32x64xf32, #tpu.memory_space<vmem>>, %arg14: memref<2x1x64xf32, #tpu.memory_space<vmem>>, %arg15: memref<2x64x32xf32, #tpu.memory_space<vmem>>, %arg16: memref<2x1x32xf32, #tpu.memory_space<vmem>>, %arg17: memref<2x1x32xf32, #tpu.memory_space<vmem>>, %arg18: memref<2x1x32xf32, #tpu.memory_space<vmem>>, %arg19: memref<2x32x96xf32, #tpu.memory_space<vmem>>, %arg20: memref<2x1x96xf32, #tpu.memory_space<vmem>>, %arg21: memref<2x32x32xf32, #tpu.memory_space<vmem>>, %arg22: memref<2x1x32xf32, #tpu.memory_space<vmem>>, %arg23: memref<2x1x32xf32, #tpu.memory_space<vmem>>, %arg24: memref<2x1x32xf32, #tpu.memory_space<vmem>>, %arg25: memref<2x32x96xf32, #tpu.memory_space<vmem>>, %arg26: memref<2x1x96xf32, #tpu.memory_space<vmem>>, %arg27: memref<2x32x32xf32, #tpu.memory_space<vmem>>, %arg28: memref<2x1x32xf32, #tpu.memory_space<vmem>>, %arg29: memref<2x1x32xf32, #tpu.memory_space<vmem>>, %arg30: memref<2x1x32xf32, #tpu.memory_space<vmem>>, %arg31: memref<2x32x64xf32, #tpu.memory_space<vmem>>, %arg32: memref<2x1x64xf32, #tpu.memory_space<vmem>>, %arg33: memref<2x64x32xf32, #tpu.memory_space<vmem>>, %arg34: memref<2x1x32xf32, #tpu.memory_space<vmem>>, %arg35: memref<2x1x32xf32, #tpu.memory_space<vmem>>, %arg36: memref<2x1x32xf32, #tpu.memory_space<vmem>>, %arg37: memref<32x16xf32, #tpu.memory_space<vmem>>, %arg38: memref<14x16xf32, #tpu.memory_space<vmem>>) attributes {dimension_semantics = [], scalar_prefetch = 0 : i64, scratch_operands = 0 : i64, tpu.core_type = #tpu.core_type<tc>} {
    %c0 = arith.constant 0 : index
    %c0_0 = arith.constant 0 : index
    %0 = vector.load %arg2[%c0, %c0_0] : memref<16x16xf32, #tpu.memory_space<vmem>>, vector<16x16xf32>
    %c0_1 = arith.constant 0 : index
    %c0_2 = arith.constant 0 : index
    %1 = vector.load %arg3[%c0_1, %c0_2] : memref<14x14xf32, #tpu.memory_space<vmem>>, vector<14x14xf32>
    %c0_3 = arith.constant 0 : index
    %c0_4 = arith.constant 0 : index
    %2 = vector.load %arg4[%c0_3, %c0_4] : memref<14x16xf32, #tpu.memory_space<vmem>>, vector<14x16xf32>
    %c0_5 = arith.constant 0 : index
    %c0_6 = arith.constant 0 : index
    %3 = vector.load %arg5[%c0_5, %c0_6] : memref<16x1xf32, #tpu.memory_space<vmem>>, vector<16x1xf32>
    %c0_7 = arith.constant 0 : index
    %c0_8 = arith.constant 0 : index
    %4 = vector.load %arg6[%c0_7, %c0_8] : memref<14x1xf32, #tpu.memory_space<vmem>>, vector<14x1xf32>
    %c0_9 = arith.constant 0 : index
    %c0_10 = arith.constant 0 : index
    %5 = vector.load %arg0[%c0_9, %c0_10] : memref<16x32xf32, #tpu.memory_space<vmem>>, vector<16x32xf32>
    %c0_11 = arith.constant 0 : index
    %c0_12 = arith.constant 0 : index
    %c0_13 = arith.constant 0 : index
    %6 = vector.load %arg7[%c0_11, %c0_12, %c0_13] : memref<2x32x96xf32, #tpu.memory_space<vmem>>, vector<1x32x96xf32>
    %7 = vector.shape_cast %6 : vector<1x32x96xf32> to vector<32x96xf32>
    %c0_14 = arith.constant 0 : index
    %c0_15 = arith.constant 0 : index
    %c0_16 = arith.constant 0 : index
    %8 = vector.load %arg8[%c0_14, %c0_15, %c0_16] : memref<2x1x96xf32, #tpu.memory_space<vmem>>, vector<1x1x96xf32>
    %9 = vector.shape_cast %8 : vector<1x1x96xf32> to vector<1x96xf32>
    %c0_17 = arith.constant 0 : index
    %c0_18 = arith.constant 0 : index
    %c0_19 = arith.constant 0 : index
    %10 = vector.load %arg9[%c0_17, %c0_18, %c0_19] : memref<2x32x32xf32, #tpu.memory_space<vmem>>, vector<1x32x32xf32>
    %11 = vector.shape_cast %10 : vector<1x32x32xf32> to vector<32x32xf32>
    %c0_20 = arith.constant 0 : index
    %c0_21 = arith.constant 0 : index
    %c0_22 = arith.constant 0 : index
    %12 = vector.load %arg10[%c0_20, %c0_21, %c0_22] : memref<2x1x32xf32, #tpu.memory_space<vmem>>, vector<1x1x32xf32>
    %13 = vector.shape_cast %12 : vector<1x1x32xf32> to vector<1x32xf32>
    %c0_23 = arith.constant 0 : index
    %c0_24 = arith.constant 0 : index
    %c0_25 = arith.constant 0 : index
    %14 = vector.load %arg11[%c0_23, %c0_24, %c0_25] : memref<2x1x32xf32, #tpu.memory_space<vmem>>, vector<1x1x32xf32>
    %15 = vector.shape_cast %14 : vector<1x1x32xf32> to vector<1x32xf32>
    %c0_26 = arith.constant 0 : index
    %c0_27 = arith.constant 0 : index
    %c0_28 = arith.constant 0 : index
    %16 = vector.load %arg12[%c0_26, %c0_27, %c0_28] : memref<2x1x32xf32, #tpu.memory_space<vmem>>, vector<1x1x32xf32>
    %17 = vector.shape_cast %16 : vector<1x1x32xf32> to vector<1x32xf32>
    %cst = arith.constant dense<0.000000e+00> : vector<16x96xf32>
    %18 = tpu.matmul %5, %7, %cst {dimension_numbers = #tpu.dot_dimension_numbers<[1], [0], [0], [1], [0, 0, 1, 1], [], []>} : vector<16x32xf32>, vector<32x96xf32>, vector<16x96xf32> -> vector<16x96xf32>
    %19 = vector.broadcast %9 : vector<1x96xf32> to vector<16x96xf32>
    %20 = arith.addf %18, %19 : vector<16x96xf32>
    %21 = vector.extract_strided_slice %20 {offsets = [0, 0], sizes = [16, 32], strides = [1, 1]} : vector<16x96xf32> to vector<16x32xf32>
    %22 = vector.extract_strided_slice %20 {offsets = [0, 32], sizes = [16, 32], strides = [1, 1]} : vector<16x96xf32> to vector<16x32xf32>
    %23 = vector.extract_strided_slice %20 {offsets = [0, 64], sizes = [16, 32], strides = [1, 1]} : vector<16x96xf32> to vector<16x32xf32>
    %24 = vector.extract_strided_slice %21 {offsets = [0, 0], sizes = [16, 8], strides = [1, 1]} : vector<16x32xf32> to vector<16x8xf32>
    %25 = vector.extract_strided_slice %22 {offsets = [0, 0], sizes = [16, 8], strides = [1, 1]} : vector<16x32xf32> to vector<16x8xf32>
    %26 = vector.extract_strided_slice %23 {offsets = [0, 0], sizes = [16, 8], strides = [1, 1]} : vector<16x32xf32> to vector<16x8xf32>
    %cst_29 = arith.constant dense<0.000000e+00> : vector<16x16xf32>
    %27 = tpu.matmul %24, %25, %cst_29 {dimension_numbers = #tpu.dot_dimension_numbers<[1], [1], [0], [0], [0, 0, 1, 0], [], []>} : vector<16x8xf32>, vector<16x8xf32>, vector<16x16xf32> -> vector<16x16xf32>
    %cst_30 = arith.constant 0.353553385 : f32
    %28 = vector.broadcast %cst_30 : f32 to vector<16x16xf32>
    %29 = arith.mulf %27, %28 : vector<16x16xf32>
    %30 = arith.addf %29, %0 : vector<16x16xf32>
    %cst_31 = arith.constant dense<0xFF800000> : vector<16xf32>
    %31 = vector.multi_reduction <maximumf>, %30, %cst_31 [1] : vector<16x16xf32> to vector<16xf32>
    %32 = vector.shape_cast %31 : vector<16xf32> to vector<16x1xf32>
    %33 = vector.broadcast %32 : vector<16x1xf32> to vector<16x16xf32>
    %34 = arith.subf %30, %33 : vector<16x16xf32>
    %35 = math.exp %34 : vector<16x16xf32>
    %cst_32 = arith.constant dense<0.000000e+00> : vector<16xf32>
    %36 = vector.multi_reduction <add>, %35, %cst_32 [1] : vector<16x16xf32> to vector<16xf32>
    %37 = vector.shape_cast %36 : vector<16xf32> to vector<16x1xf32>
    %38 = tpu.reciprocal %37 {approx = true} : vector<16x1xf32> -> vector<16x1xf32>
    %39 = vector.broadcast %38 : vector<16x1xf32> to vector<16x16xf32>
    %40 = arith.mulf %35, %39 : vector<16x16xf32>
    %cst_33 = arith.constant dense<0.000000e+00> : vector<16x8xf32>
    %41 = tpu.matmul %40, %26, %cst_33 {dimension_numbers = #tpu.dot_dimension_numbers<[1], [0], [0], [1], [0, 0, 1, 1], [], []>} : vector<16x16xf32>, vector<16x8xf32>, vector<16x8xf32> -> vector<16x8xf32>
    %42 = vector.extract_strided_slice %11 {offsets = [0, 0], sizes = [8, 32], strides = [1, 1]} : vector<32x32xf32> to vector<8x32xf32>
    %cst_34 = arith.constant dense<0.000000e+00> : vector<16x32xf32>
    %43 = tpu.matmul %41, %42, %cst_34 {dimension_numbers = #tpu.dot_dimension_numbers<[1], [0], [0], [1], [0, 0, 1, 1], [], []>} : vector<16x8xf32>, vector<8x32xf32>, vector<16x32xf32> -> vector<16x32xf32>
    %44 = vector.extract_strided_slice %21 {offsets = [0, 8], sizes = [16, 8], strides = [1, 1]} : vector<16x32xf32> to vector<16x8xf32>
    %45 = vector.extract_strided_slice %22 {offsets = [0, 8], sizes = [16, 8], strides = [1, 1]} : vector<16x32xf32> to vector<16x8xf32>
    %46 = vector.extract_strided_slice %23 {offsets = [0, 8], sizes = [16, 8], strides = [1, 1]} : vector<16x32xf32> to vector<16x8xf32>
    %cst_35 = arith.constant dense<0.000000e+00> : vector<16x16xf32>
    %47 = tpu.matmul %44, %45, %cst_35 {dimension_numbers = #tpu.dot_dimension_numbers<[1], [1], [0], [0], [0, 0, 1, 0], [], []>} : vector<16x8xf32>, vector<16x8xf32>, vector<16x16xf32> -> vector<16x16xf32>
    %cst_36 = arith.constant 0.353553385 : f32
    %48 = vector.broadcast %cst_36 : f32 to vector<16x16xf32>
    %49 = arith.mulf %47, %48 : vector<16x16xf32>
    %50 = arith.addf %49, %0 : vector<16x16xf32>
    %cst_37 = arith.constant dense<0xFF800000> : vector<16xf32>
    %51 = vector.multi_reduction <maximumf>, %50, %cst_37 [1] : vector<16x16xf32> to vector<16xf32>
    %52 = vector.shape_cast %51 : vector<16xf32> to vector<16x1xf32>
    %53 = vector.broadcast %52 : vector<16x1xf32> to vector<16x16xf32>
    %54 = arith.subf %50, %53 : vector<16x16xf32>
    %55 = math.exp %54 : vector<16x16xf32>
    %cst_38 = arith.constant dense<0.000000e+00> : vector<16xf32>
    %56 = vector.multi_reduction <add>, %55, %cst_38 [1] : vector<16x16xf32> to vector<16xf32>
    %57 = vector.shape_cast %56 : vector<16xf32> to vector<16x1xf32>
    %58 = tpu.reciprocal %57 {approx = true} : vector<16x1xf32> -> vector<16x1xf32>
    %59 = vector.broadcast %58 : vector<16x1xf32> to vector<16x16xf32>
    %60 = arith.mulf %55, %59 : vector<16x16xf32>
    %cst_39 = arith.constant dense<0.000000e+00> : vector<16x8xf32>
    %61 = tpu.matmul %60, %46, %cst_39 {dimension_numbers = #tpu.dot_dimension_numbers<[1], [0], [0], [1], [0, 0, 1, 1], [], []>} : vector<16x16xf32>, vector<16x8xf32>, vector<16x8xf32> -> vector<16x8xf32>
    %62 = vector.extract_strided_slice %11 {offsets = [8, 0], sizes = [8, 32], strides = [1, 1]} : vector<32x32xf32> to vector<8x32xf32>
    %cst_40 = arith.constant dense<0.000000e+00> : vector<16x32xf32>
    %63 = tpu.matmul %61, %62, %cst_40 {dimension_numbers = #tpu.dot_dimension_numbers<[1], [0], [0], [1], [0, 0, 1, 1], [], []>} : vector<16x8xf32>, vector<8x32xf32>, vector<16x32xf32> -> vector<16x32xf32>
    %64 = arith.addf %43, %63 : vector<16x32xf32>
    %65 = vector.extract_strided_slice %21 {offsets = [0, 16], sizes = [16, 8], strides = [1, 1]} : vector<16x32xf32> to vector<16x8xf32>
    %66 = vector.extract_strided_slice %22 {offsets = [0, 16], sizes = [16, 8], strides = [1, 1]} : vector<16x32xf32> to vector<16x8xf32>
    %67 = vector.extract_strided_slice %23 {offsets = [0, 16], sizes = [16, 8], strides = [1, 1]} : vector<16x32xf32> to vector<16x8xf32>
    %cst_41 = arith.constant dense<0.000000e+00> : vector<16x16xf32>
    %68 = tpu.matmul %65, %66, %cst_41 {dimension_numbers = #tpu.dot_dimension_numbers<[1], [1], [0], [0], [0, 0, 1, 0], [], []>} : vector<16x8xf32>, vector<16x8xf32>, vector<16x16xf32> -> vector<16x16xf32>
    %cst_42 = arith.constant 0.353553385 : f32
    %69 = vector.broadcast %cst_42 : f32 to vector<16x16xf32>
    %70 = arith.mulf %68, %69 : vector<16x16xf32>
    %71 = arith.addf %70, %0 : vector<16x16xf32>
    %cst_43 = arith.constant dense<0xFF800000> : vector<16xf32>
    %72 = vector.multi_reduction <maximumf>, %71, %cst_43 [1] : vector<16x16xf32> to vector<16xf32>
    %73 = vector.shape_cast %72 : vector<16xf32> to vector<16x1xf32>
    %74 = vector.broadcast %73 : vector<16x1xf32> to vector<16x16xf32>
    %75 = arith.subf %71, %74 : vector<16x16xf32>
    %76 = math.exp %75 : vector<16x16xf32>
    %cst_44 = arith.constant dense<0.000000e+00> : vector<16xf32>
    %77 = vector.multi_reduction <add>, %76, %cst_44 [1] : vector<16x16xf32> to vector<16xf32>
    %78 = vector.shape_cast %77 : vector<16xf32> to vector<16x1xf32>
    %79 = tpu.reciprocal %78 {approx = true} : vector<16x1xf32> -> vector<16x1xf32>
    %80 = vector.broadcast %79 : vector<16x1xf32> to vector<16x16xf32>
    %81 = arith.mulf %76, %80 : vector<16x16xf32>
    %cst_45 = arith.constant dense<0.000000e+00> : vector<16x8xf32>
    %82 = tpu.matmul %81, %67, %cst_45 {dimension_numbers = #tpu.dot_dimension_numbers<[1], [0], [0], [1], [0, 0, 1, 1], [], []>} : vector<16x16xf32>, vector<16x8xf32>, vector<16x8xf32> -> vector<16x8xf32>
    %83 = vector.extract_strided_slice %11 {offsets = [16, 0], sizes = [8, 32], strides = [1, 1]} : vector<32x32xf32> to vector<8x32xf32>
    %cst_46 = arith.constant dense<0.000000e+00> : vector<16x32xf32>
    %84 = tpu.matmul %82, %83, %cst_46 {dimension_numbers = #tpu.dot_dimension_numbers<[1], [0], [0], [1], [0, 0, 1, 1], [], []>} : vector<16x8xf32>, vector<8x32xf32>, vector<16x32xf32> -> vector<16x32xf32>
    %85 = arith.addf %64, %84 : vector<16x32xf32>
    %86 = vector.extract_strided_slice %21 {offsets = [0, 24], sizes = [16, 8], strides = [1, 1]} : vector<16x32xf32> to vector<16x8xf32>
    %87 = vector.extract_strided_slice %22 {offsets = [0, 24], sizes = [16, 8], strides = [1, 1]} : vector<16x32xf32> to vector<16x8xf32>
    %88 = vector.extract_strided_slice %23 {offsets = [0, 24], sizes = [16, 8], strides = [1, 1]} : vector<16x32xf32> to vector<16x8xf32>
    %cst_47 = arith.constant dense<0.000000e+00> : vector<16x16xf32>
    %89 = tpu.matmul %86, %87, %cst_47 {dimension_numbers = #tpu.dot_dimension_numbers<[1], [1], [0], [0], [0, 0, 1, 0], [], []>} : vector<16x8xf32>, vector<16x8xf32>, vector<16x16xf32> -> vector<16x16xf32>
    %cst_48 = arith.constant 0.353553385 : f32
    %90 = vector.broadcast %cst_48 : f32 to vector<16x16xf32>
    %91 = arith.mulf %89, %90 : vector<16x16xf32>
    %92 = arith.addf %91, %0 : vector<16x16xf32>
    %cst_49 = arith.constant dense<0xFF800000> : vector<16xf32>
    %93 = vector.multi_reduction <maximumf>, %92, %cst_49 [1] : vector<16x16xf32> to vector<16xf32>
    %94 = vector.shape_cast %93 : vector<16xf32> to vector<16x1xf32>
    %95 = vector.broadcast %94 : vector<16x1xf32> to vector<16x16xf32>
    %96 = arith.subf %92, %95 : vector<16x16xf32>
    %97 = math.exp %96 : vector<16x16xf32>
    %cst_50 = arith.constant dense<0.000000e+00> : vector<16xf32>
    %98 = vector.multi_reduction <add>, %97, %cst_50 [1] : vector<16x16xf32> to vector<16xf32>
    %99 = vector.shape_cast %98 : vector<16xf32> to vector<16x1xf32>
    %100 = tpu.reciprocal %99 {approx = true} : vector<16x1xf32> -> vector<16x1xf32>
    %101 = vector.broadcast %100 : vector<16x1xf32> to vector<16x16xf32>
    %102 = arith.mulf %97, %101 : vector<16x16xf32>
    %cst_51 = arith.constant dense<0.000000e+00> : vector<16x8xf32>
    %103 = tpu.matmul %102, %88, %cst_51 {dimension_numbers = #tpu.dot_dimension_numbers<[1], [0], [0], [1], [0, 0, 1, 1], [], []>} : vector<16x16xf32>, vector<16x8xf32>, vector<16x8xf32> -> vector<16x8xf32>
    %104 = vector.extract_strided_slice %11 {offsets = [24, 0], sizes = [8, 32], strides = [1, 1]} : vector<32x32xf32> to vector<8x32xf32>
    %cst_52 = arith.constant dense<0.000000e+00> : vector<16x32xf32>
    %105 = tpu.matmul %103, %104, %cst_52 {dimension_numbers = #tpu.dot_dimension_numbers<[1], [0], [0], [1], [0, 0, 1, 1], [], []>} : vector<16x8xf32>, vector<8x32xf32>, vector<16x32xf32> -> vector<16x32xf32>
    %106 = arith.addf %85, %105 : vector<16x32xf32>
    %107 = vector.broadcast %13 : vector<1x32xf32> to vector<16x32xf32>
    %108 = arith.addf %106, %107 : vector<16x32xf32>
    %109 = arith.addf %108, %5 : vector<16x32xf32>
    %cst_53 = arith.constant dense<0.000000e+00> : vector<16xf32>
    %110 = vector.multi_reduction <add>, %109, %cst_53 [1] : vector<16x32xf32> to vector<16xf32>
    %111 = vector.shape_cast %110 : vector<16xf32> to vector<16x1xf32>
    %cst_54 = arith.constant 3.200000e+01 : f32
    %112 = vector.broadcast %cst_54 : f32 to vector<16x1xf32>
    %113 = arith.divf %111, %112 : vector<16x1xf32>
    %114 = vector.broadcast %113 : vector<16x1xf32> to vector<16x32xf32>
    %115 = arith.subf %109, %114 : vector<16x32xf32>
    %116 = arith.mulf %115, %115 : vector<16x32xf32>
    %cst_55 = arith.constant dense<0.000000e+00> : vector<16xf32>
    %117 = vector.multi_reduction <add>, %116, %cst_55 [1] : vector<16x32xf32> to vector<16xf32>
    %118 = vector.shape_cast %117 : vector<16xf32> to vector<16x1xf32>
    %cst_56 = arith.constant 3.200000e+01 : f32
    %119 = vector.broadcast %cst_56 : f32 to vector<16x1xf32>
    %120 = arith.divf %118, %119 : vector<16x1xf32>
    %cst_57 = arith.constant 9.99999974E-6 : f32
    %121 = vector.broadcast %cst_57 : f32 to vector<16x1xf32>
    %122 = arith.addf %120, %121 : vector<16x1xf32>
    %123 = math.rsqrt %122 : vector<16x1xf32>
    %124 = vector.broadcast %123 : vector<16x1xf32> to vector<16x32xf32>
    %125 = arith.mulf %115, %124 : vector<16x32xf32>
    %126 = vector.broadcast %15 : vector<1x32xf32> to vector<16x32xf32>
    %127 = arith.mulf %125, %126 : vector<16x32xf32>
    %128 = vector.broadcast %17 : vector<1x32xf32> to vector<16x32xf32>
    %129 = arith.addf %127, %128 : vector<16x32xf32>
    %130 = vector.broadcast %3 : vector<16x1xf32> to vector<16x32xf32>
    %131 = arith.mulf %129, %130 : vector<16x32xf32>
    %c0_58 = arith.constant 0 : index
    %c0_59 = arith.constant 0 : index
    %c0_60 = arith.constant 0 : index
    %132 = vector.load %arg13[%c0_58, %c0_59, %c0_60] : memref<2x32x64xf32, #tpu.memory_space<vmem>>, vector<1x32x64xf32>
    %133 = vector.shape_cast %132 : vector<1x32x64xf32> to vector<32x64xf32>
    %c0_61 = arith.constant 0 : index
    %c0_62 = arith.constant 0 : index
    %c0_63 = arith.constant 0 : index
    %134 = vector.load %arg14[%c0_61, %c0_62, %c0_63] : memref<2x1x64xf32, #tpu.memory_space<vmem>>, vector<1x1x64xf32>
    %135 = vector.shape_cast %134 : vector<1x1x64xf32> to vector<1x64xf32>
    %c0_64 = arith.constant 0 : index
    %c0_65 = arith.constant 0 : index
    %c0_66 = arith.constant 0 : index
    %136 = vector.load %arg15[%c0_64, %c0_65, %c0_66] : memref<2x64x32xf32, #tpu.memory_space<vmem>>, vector<1x64x32xf32>
    %137 = vector.shape_cast %136 : vector<1x64x32xf32> to vector<64x32xf32>
    %c0_67 = arith.constant 0 : index
    %c0_68 = arith.constant 0 : index
    %c0_69 = arith.constant 0 : index
    %138 = vector.load %arg16[%c0_67, %c0_68, %c0_69] : memref<2x1x32xf32, #tpu.memory_space<vmem>>, vector<1x1x32xf32>
    %139 = vector.shape_cast %138 : vector<1x1x32xf32> to vector<1x32xf32>
    %c0_70 = arith.constant 0 : index
    %c0_71 = arith.constant 0 : index
    %c0_72 = arith.constant 0 : index
    %140 = vector.load %arg17[%c0_70, %c0_71, %c0_72] : memref<2x1x32xf32, #tpu.memory_space<vmem>>, vector<1x1x32xf32>
    %141 = vector.shape_cast %140 : vector<1x1x32xf32> to vector<1x32xf32>
    %c0_73 = arith.constant 0 : index
    %c0_74 = arith.constant 0 : index
    %c0_75 = arith.constant 0 : index
    %142 = vector.load %arg18[%c0_73, %c0_74, %c0_75] : memref<2x1x32xf32, #tpu.memory_space<vmem>>, vector<1x1x32xf32>
    %143 = vector.shape_cast %142 : vector<1x1x32xf32> to vector<1x32xf32>
    %cst_76 = arith.constant dense<0.000000e+00> : vector<16x64xf32>
    %144 = tpu.matmul %131, %133, %cst_76 {dimension_numbers = #tpu.dot_dimension_numbers<[1], [0], [0], [1], [0, 0, 1, 1], [], []>} : vector<16x32xf32>, vector<32x64xf32>, vector<16x64xf32> -> vector<16x64xf32>
    %145 = vector.broadcast %135 : vector<1x64xf32> to vector<16x64xf32>
    %146 = arith.addf %144, %145 : vector<16x64xf32>
    %cst_77 = arith.constant 0.000000e+00 : f32
    %147 = vector.broadcast %cst_77 : f32 to vector<16x64xf32>
    %148 = arith.maximumf %146, %147 : vector<16x64xf32>
    %cst_78 = arith.constant dense<0.000000e+00> : vector<16x32xf32>
    %149 = tpu.matmul %148, %137, %cst_78 {dimension_numbers = #tpu.dot_dimension_numbers<[1], [0], [0], [1], [0, 0, 1, 1], [], []>} : vector<16x64xf32>, vector<64x32xf32>, vector<16x32xf32> -> vector<16x32xf32>
    %150 = vector.broadcast %139 : vector<1x32xf32> to vector<16x32xf32>
    %151 = arith.addf %149, %150 : vector<16x32xf32>
    %152 = arith.addf %151, %131 : vector<16x32xf32>
    %cst_79 = arith.constant dense<0.000000e+00> : vector<16xf32>
    %153 = vector.multi_reduction <add>, %152, %cst_79 [1] : vector<16x32xf32> to vector<16xf32>
    %154 = vector.shape_cast %153 : vector<16xf32> to vector<16x1xf32>
    %cst_80 = arith.constant 3.200000e+01 : f32
    %155 = vector.broadcast %cst_80 : f32 to vector<16x1xf32>
    %156 = arith.divf %154, %155 : vector<16x1xf32>
    %157 = vector.broadcast %156 : vector<16x1xf32> to vector<16x32xf32>
    %158 = arith.subf %152, %157 : vector<16x32xf32>
    %159 = arith.mulf %158, %158 : vector<16x32xf32>
    %cst_81 = arith.constant dense<0.000000e+00> : vector<16xf32>
    %160 = vector.multi_reduction <add>, %159, %cst_81 [1] : vector<16x32xf32> to vector<16xf32>
    %161 = vector.shape_cast %160 : vector<16xf32> to vector<16x1xf32>
    %cst_82 = arith.constant 3.200000e+01 : f32
    %162 = vector.broadcast %cst_82 : f32 to vector<16x1xf32>
    %163 = arith.divf %161, %162 : vector<16x1xf32>
    %cst_83 = arith.constant 9.99999974E-6 : f32
    %164 = vector.broadcast %cst_83 : f32 to vector<16x1xf32>
    %165 = arith.addf %163, %164 : vector<16x1xf32>
    %166 = math.rsqrt %165 : vector<16x1xf32>
    %167 = vector.broadcast %166 : vector<16x1xf32> to vector<16x32xf32>
    %168 = arith.mulf %158, %167 : vector<16x32xf32>
    %169 = vector.broadcast %141 : vector<1x32xf32> to vector<16x32xf32>
    %170 = arith.mulf %168, %169 : vector<16x32xf32>
    %171 = vector.broadcast %143 : vector<1x32xf32> to vector<16x32xf32>
    %172 = arith.addf %170, %171 : vector<16x32xf32>
    %173 = vector.broadcast %3 : vector<16x1xf32> to vector<16x32xf32>
    %174 = arith.mulf %172, %173 : vector<16x32xf32>
    %c1 = arith.constant 1 : index
    %c0_84 = arith.constant 0 : index
    %c0_85 = arith.constant 0 : index
    %175 = vector.load %arg7[%c1, %c0_84, %c0_85] : memref<2x32x96xf32, #tpu.memory_space<vmem>>, vector<1x32x96xf32>
    %176 = vector.shape_cast %175 : vector<1x32x96xf32> to vector<32x96xf32>
    %c1_86 = arith.constant 1 : index
    %c0_87 = arith.constant 0 : index
    %c0_88 = arith.constant 0 : index
    %177 = vector.load %arg8[%c1_86, %c0_87, %c0_88] : memref<2x1x96xf32, #tpu.memory_space<vmem>>, vector<1x1x96xf32>
    %178 = vector.shape_cast %177 : vector<1x1x96xf32> to vector<1x96xf32>
    %c1_89 = arith.constant 1 : index
    %c0_90 = arith.constant 0 : index
    %c0_91 = arith.constant 0 : index
    %179 = vector.load %arg9[%c1_89, %c0_90, %c0_91] : memref<2x32x32xf32, #tpu.memory_space<vmem>>, vector<1x32x32xf32>
    %180 = vector.shape_cast %179 : vector<1x32x32xf32> to vector<32x32xf32>
    %c1_92 = arith.constant 1 : index
    %c0_93 = arith.constant 0 : index
    %c0_94 = arith.constant 0 : index
    %181 = vector.load %arg10[%c1_92, %c0_93, %c0_94] : memref<2x1x32xf32, #tpu.memory_space<vmem>>, vector<1x1x32xf32>
    %182 = vector.shape_cast %181 : vector<1x1x32xf32> to vector<1x32xf32>
    %c1_95 = arith.constant 1 : index
    %c0_96 = arith.constant 0 : index
    %c0_97 = arith.constant 0 : index
    %183 = vector.load %arg11[%c1_95, %c0_96, %c0_97] : memref<2x1x32xf32, #tpu.memory_space<vmem>>, vector<1x1x32xf32>
    %184 = vector.shape_cast %183 : vector<1x1x32xf32> to vector<1x32xf32>
    %c1_98 = arith.constant 1 : index
    %c0_99 = arith.constant 0 : index
    %c0_100 = arith.constant 0 : index
    %185 = vector.load %arg12[%c1_98, %c0_99, %c0_100] : memref<2x1x32xf32, #tpu.memory_space<vmem>>, vector<1x1x32xf32>
    %186 = vector.shape_cast %185 : vector<1x1x32xf32> to vector<1x32xf32>
    %cst_101 = arith.constant dense<0.000000e+00> : vector<16x96xf32>
    %187 = tpu.matmul %174, %176, %cst_101 {dimension_numbers = #tpu.dot_dimension_numbers<[1], [0], [0], [1], [0, 0, 1, 1], [], []>} : vector<16x32xf32>, vector<32x96xf32>, vector<16x96xf32> -> vector<16x96xf32>
    %188 = vector.broadcast %178 : vector<1x96xf32> to vector<16x96xf32>
    %189 = arith.addf %187, %188 : vector<16x96xf32>
    %190 = vector.extract_strided_slice %189 {offsets = [0, 0], sizes = [16, 32], strides = [1, 1]} : vector<16x96xf32> to vector<16x32xf32>
    %191 = vector.extract_strided_slice %189 {offsets = [0, 32], sizes = [16, 32], strides = [1, 1]} : vector<16x96xf32> to vector<16x32xf32>
    %192 = vector.extract_strided_slice %189 {offsets = [0, 64], sizes = [16, 32], strides = [1, 1]} : vector<16x96xf32> to vector<16x32xf32>
    %193 = vector.extract_strided_slice %190 {offsets = [0, 0], sizes = [16, 8], strides = [1, 1]} : vector<16x32xf32> to vector<16x8xf32>
    %194 = vector.extract_strided_slice %191 {offsets = [0, 0], sizes = [16, 8], strides = [1, 1]} : vector<16x32xf32> to vector<16x8xf32>
    %195 = vector.extract_strided_slice %192 {offsets = [0, 0], sizes = [16, 8], strides = [1, 1]} : vector<16x32xf32> to vector<16x8xf32>
    %cst_102 = arith.constant dense<0.000000e+00> : vector<16x16xf32>
    %196 = tpu.matmul %193, %194, %cst_102 {dimension_numbers = #tpu.dot_dimension_numbers<[1], [1], [0], [0], [0, 0, 1, 0], [], []>} : vector<16x8xf32>, vector<16x8xf32>, vector<16x16xf32> -> vector<16x16xf32>
    %cst_103 = arith.constant 0.353553385 : f32
    %197 = vector.broadcast %cst_103 : f32 to vector<16x16xf32>
    %198 = arith.mulf %196, %197 : vector<16x16xf32>
    %199 = arith.addf %198, %0 : vector<16x16xf32>
    %cst_104 = arith.constant dense<0xFF800000> : vector<16xf32>
    %200 = vector.multi_reduction <maximumf>, %199, %cst_104 [1] : vector<16x16xf32> to vector<16xf32>
    %201 = vector.shape_cast %200 : vector<16xf32> to vector<16x1xf32>
    %202 = vector.broadcast %201 : vector<16x1xf32> to vector<16x16xf32>
    %203 = arith.subf %199, %202 : vector<16x16xf32>
    %204 = math.exp %203 : vector<16x16xf32>
    %cst_105 = arith.constant dense<0.000000e+00> : vector<16xf32>
    %205 = vector.multi_reduction <add>, %204, %cst_105 [1] : vector<16x16xf32> to vector<16xf32>
    %206 = vector.shape_cast %205 : vector<16xf32> to vector<16x1xf32>
    %207 = tpu.reciprocal %206 {approx = true} : vector<16x1xf32> -> vector<16x1xf32>
    %208 = vector.broadcast %207 : vector<16x1xf32> to vector<16x16xf32>
    %209 = arith.mulf %204, %208 : vector<16x16xf32>
    %cst_106 = arith.constant dense<0.000000e+00> : vector<16x8xf32>
    %210 = tpu.matmul %209, %195, %cst_106 {dimension_numbers = #tpu.dot_dimension_numbers<[1], [0], [0], [1], [0, 0, 1, 1], [], []>} : vector<16x16xf32>, vector<16x8xf32>, vector<16x8xf32> -> vector<16x8xf32>
    %211 = vector.extract_strided_slice %180 {offsets = [0, 0], sizes = [8, 32], strides = [1, 1]} : vector<32x32xf32> to vector<8x32xf32>
    %cst_107 = arith.constant dense<0.000000e+00> : vector<16x32xf32>
    %212 = tpu.matmul %210, %211, %cst_107 {dimension_numbers = #tpu.dot_dimension_numbers<[1], [0], [0], [1], [0, 0, 1, 1], [], []>} : vector<16x8xf32>, vector<8x32xf32>, vector<16x32xf32> -> vector<16x32xf32>
    %213 = vector.extract_strided_slice %190 {offsets = [0, 8], sizes = [16, 8], strides = [1, 1]} : vector<16x32xf32> to vector<16x8xf32>
    %214 = vector.extract_strided_slice %191 {offsets = [0, 8], sizes = [16, 8], strides = [1, 1]} : vector<16x32xf32> to vector<16x8xf32>
    %215 = vector.extract_strided_slice %192 {offsets = [0, 8], sizes = [16, 8], strides = [1, 1]} : vector<16x32xf32> to vector<16x8xf32>
    %cst_108 = arith.constant dense<0.000000e+00> : vector<16x16xf32>
    %216 = tpu.matmul %213, %214, %cst_108 {dimension_numbers = #tpu.dot_dimension_numbers<[1], [1], [0], [0], [0, 0, 1, 0], [], []>} : vector<16x8xf32>, vector<16x8xf32>, vector<16x16xf32> -> vector<16x16xf32>
    %cst_109 = arith.constant 0.353553385 : f32
    %217 = vector.broadcast %cst_109 : f32 to vector<16x16xf32>
    %218 = arith.mulf %216, %217 : vector<16x16xf32>
    %219 = arith.addf %218, %0 : vector<16x16xf32>
    %cst_110 = arith.constant dense<0xFF800000> : vector<16xf32>
    %220 = vector.multi_reduction <maximumf>, %219, %cst_110 [1] : vector<16x16xf32> to vector<16xf32>
    %221 = vector.shape_cast %220 : vector<16xf32> to vector<16x1xf32>
    %222 = vector.broadcast %221 : vector<16x1xf32> to vector<16x16xf32>
    %223 = arith.subf %219, %222 : vector<16x16xf32>
    %224 = math.exp %223 : vector<16x16xf32>
    %cst_111 = arith.constant dense<0.000000e+00> : vector<16xf32>
    %225 = vector.multi_reduction <add>, %224, %cst_111 [1] : vector<16x16xf32> to vector<16xf32>
    %226 = vector.shape_cast %225 : vector<16xf32> to vector<16x1xf32>
    %227 = tpu.reciprocal %226 {approx = true} : vector<16x1xf32> -> vector<16x1xf32>
    %228 = vector.broadcast %227 : vector<16x1xf32> to vector<16x16xf32>
    %229 = arith.mulf %224, %228 : vector<16x16xf32>
    %cst_112 = arith.constant dense<0.000000e+00> : vector<16x8xf32>
    %230 = tpu.matmul %229, %215, %cst_112 {dimension_numbers = #tpu.dot_dimension_numbers<[1], [0], [0], [1], [0, 0, 1, 1], [], []>} : vector<16x16xf32>, vector<16x8xf32>, vector<16x8xf32> -> vector<16x8xf32>
    %231 = vector.extract_strided_slice %180 {offsets = [8, 0], sizes = [8, 32], strides = [1, 1]} : vector<32x32xf32> to vector<8x32xf32>
    %cst_113 = arith.constant dense<0.000000e+00> : vector<16x32xf32>
    %232 = tpu.matmul %230, %231, %cst_113 {dimension_numbers = #tpu.dot_dimension_numbers<[1], [0], [0], [1], [0, 0, 1, 1], [], []>} : vector<16x8xf32>, vector<8x32xf32>, vector<16x32xf32> -> vector<16x32xf32>
    %233 = arith.addf %212, %232 : vector<16x32xf32>
    %234 = vector.extract_strided_slice %190 {offsets = [0, 16], sizes = [16, 8], strides = [1, 1]} : vector<16x32xf32> to vector<16x8xf32>
    %235 = vector.extract_strided_slice %191 {offsets = [0, 16], sizes = [16, 8], strides = [1, 1]} : vector<16x32xf32> to vector<16x8xf32>
    %236 = vector.extract_strided_slice %192 {offsets = [0, 16], sizes = [16, 8], strides = [1, 1]} : vector<16x32xf32> to vector<16x8xf32>
    %cst_114 = arith.constant dense<0.000000e+00> : vector<16x16xf32>
    %237 = tpu.matmul %234, %235, %cst_114 {dimension_numbers = #tpu.dot_dimension_numbers<[1], [1], [0], [0], [0, 0, 1, 0], [], []>} : vector<16x8xf32>, vector<16x8xf32>, vector<16x16xf32> -> vector<16x16xf32>
    %cst_115 = arith.constant 0.353553385 : f32
    %238 = vector.broadcast %cst_115 : f32 to vector<16x16xf32>
    %239 = arith.mulf %237, %238 : vector<16x16xf32>
    %240 = arith.addf %239, %0 : vector<16x16xf32>
    %cst_116 = arith.constant dense<0xFF800000> : vector<16xf32>
    %241 = vector.multi_reduction <maximumf>, %240, %cst_116 [1] : vector<16x16xf32> to vector<16xf32>
    %242 = vector.shape_cast %241 : vector<16xf32> to vector<16x1xf32>
    %243 = vector.broadcast %242 : vector<16x1xf32> to vector<16x16xf32>
    %244 = arith.subf %240, %243 : vector<16x16xf32>
    %245 = math.exp %244 : vector<16x16xf32>
    %cst_117 = arith.constant dense<0.000000e+00> : vector<16xf32>
    %246 = vector.multi_reduction <add>, %245, %cst_117 [1] : vector<16x16xf32> to vector<16xf32>
    %247 = vector.shape_cast %246 : vector<16xf32> to vector<16x1xf32>
    %248 = tpu.reciprocal %247 {approx = true} : vector<16x1xf32> -> vector<16x1xf32>
    %249 = vector.broadcast %248 : vector<16x1xf32> to vector<16x16xf32>
    %250 = arith.mulf %245, %249 : vector<16x16xf32>
    %cst_118 = arith.constant dense<0.000000e+00> : vector<16x8xf32>
    %251 = tpu.matmul %250, %236, %cst_118 {dimension_numbers = #tpu.dot_dimension_numbers<[1], [0], [0], [1], [0, 0, 1, 1], [], []>} : vector<16x16xf32>, vector<16x8xf32>, vector<16x8xf32> -> vector<16x8xf32>
    %252 = vector.extract_strided_slice %180 {offsets = [16, 0], sizes = [8, 32], strides = [1, 1]} : vector<32x32xf32> to vector<8x32xf32>
    %cst_119 = arith.constant dense<0.000000e+00> : vector<16x32xf32>
    %253 = tpu.matmul %251, %252, %cst_119 {dimension_numbers = #tpu.dot_dimension_numbers<[1], [0], [0], [1], [0, 0, 1, 1], [], []>} : vector<16x8xf32>, vector<8x32xf32>, vector<16x32xf32> -> vector<16x32xf32>
    %254 = arith.addf %233, %253 : vector<16x32xf32>
    %255 = vector.extract_strided_slice %190 {offsets = [0, 24], sizes = [16, 8], strides = [1, 1]} : vector<16x32xf32> to vector<16x8xf32>
    %256 = vector.extract_strided_slice %191 {offsets = [0, 24], sizes = [16, 8], strides = [1, 1]} : vector<16x32xf32> to vector<16x8xf32>
    %257 = vector.extract_strided_slice %192 {offsets = [0, 24], sizes = [16, 8], strides = [1, 1]} : vector<16x32xf32> to vector<16x8xf32>
    %cst_120 = arith.constant dense<0.000000e+00> : vector<16x16xf32>
    %258 = tpu.matmul %255, %256, %cst_120 {dimension_numbers = #tpu.dot_dimension_numbers<[1], [1], [0], [0], [0, 0, 1, 0], [], []>} : vector<16x8xf32>, vector<16x8xf32>, vector<16x16xf32> -> vector<16x16xf32>
    %cst_121 = arith.constant 0.353553385 : f32
    %259 = vector.broadcast %cst_121 : f32 to vector<16x16xf32>
    %260 = arith.mulf %258, %259 : vector<16x16xf32>
    %261 = arith.addf %260, %0 : vector<16x16xf32>
    %cst_122 = arith.constant dense<0xFF800000> : vector<16xf32>
    %262 = vector.multi_reduction <maximumf>, %261, %cst_122 [1] : vector<16x16xf32> to vector<16xf32>
    %263 = vector.shape_cast %262 : vector<16xf32> to vector<16x1xf32>
    %264 = vector.broadcast %263 : vector<16x1xf32> to vector<16x16xf32>
    %265 = arith.subf %261, %264 : vector<16x16xf32>
    %266 = math.exp %265 : vector<16x16xf32>
    %cst_123 = arith.constant dense<0.000000e+00> : vector<16xf32>
    %267 = vector.multi_reduction <add>, %266, %cst_123 [1] : vector<16x16xf32> to vector<16xf32>
    %268 = vector.shape_cast %267 : vector<16xf32> to vector<16x1xf32>
    %269 = tpu.reciprocal %268 {approx = true} : vector<16x1xf32> -> vector<16x1xf32>
    %270 = vector.broadcast %269 : vector<16x1xf32> to vector<16x16xf32>
    %271 = arith.mulf %266, %270 : vector<16x16xf32>
    %cst_124 = arith.constant dense<0.000000e+00> : vector<16x8xf32>
    %272 = tpu.matmul %271, %257, %cst_124 {dimension_numbers = #tpu.dot_dimension_numbers<[1], [0], [0], [1], [0, 0, 1, 1], [], []>} : vector<16x16xf32>, vector<16x8xf32>, vector<16x8xf32> -> vector<16x8xf32>
    %273 = vector.extract_strided_slice %180 {offsets = [24, 0], sizes = [8, 32], strides = [1, 1]} : vector<32x32xf32> to vector<8x32xf32>
    %cst_125 = arith.constant dense<0.000000e+00> : vector<16x32xf32>
    %274 = tpu.matmul %272, %273, %cst_125 {dimension_numbers = #tpu.dot_dimension_numbers<[1], [0], [0], [1], [0, 0, 1, 1], [], []>} : vector<16x8xf32>, vector<8x32xf32>, vector<16x32xf32> -> vector<16x32xf32>
    %275 = arith.addf %254, %274 : vector<16x32xf32>
    %276 = vector.broadcast %182 : vector<1x32xf32> to vector<16x32xf32>
    %277 = arith.addf %275, %276 : vector<16x32xf32>
    %278 = arith.addf %277, %174 : vector<16x32xf32>
    %cst_126 = arith.constant dense<0.000000e+00> : vector<16xf32>
    %279 = vector.multi_reduction <add>, %278, %cst_126 [1] : vector<16x32xf32> to vector<16xf32>
    %280 = vector.shape_cast %279 : vector<16xf32> to vector<16x1xf32>
    %cst_127 = arith.constant 3.200000e+01 : f32
    %281 = vector.broadcast %cst_127 : f32 to vector<16x1xf32>
    %282 = arith.divf %280, %281 : vector<16x1xf32>
    %283 = vector.broadcast %282 : vector<16x1xf32> to vector<16x32xf32>
    %284 = arith.subf %278, %283 : vector<16x32xf32>
    %285 = arith.mulf %284, %284 : vector<16x32xf32>
    %cst_128 = arith.constant dense<0.000000e+00> : vector<16xf32>
    %286 = vector.multi_reduction <add>, %285, %cst_128 [1] : vector<16x32xf32> to vector<16xf32>
    %287 = vector.shape_cast %286 : vector<16xf32> to vector<16x1xf32>
    %cst_129 = arith.constant 3.200000e+01 : f32
    %288 = vector.broadcast %cst_129 : f32 to vector<16x1xf32>
    %289 = arith.divf %287, %288 : vector<16x1xf32>
    %cst_130 = arith.constant 9.99999974E-6 : f32
    %290 = vector.broadcast %cst_130 : f32 to vector<16x1xf32>
    %291 = arith.addf %289, %290 : vector<16x1xf32>
    %292 = math.rsqrt %291 : vector<16x1xf32>
    %293 = vector.broadcast %292 : vector<16x1xf32> to vector<16x32xf32>
    %294 = arith.mulf %284, %293 : vector<16x32xf32>
    %295 = vector.broadcast %184 : vector<1x32xf32> to vector<16x32xf32>
    %296 = arith.mulf %294, %295 : vector<16x32xf32>
    %297 = vector.broadcast %186 : vector<1x32xf32> to vector<16x32xf32>
    %298 = arith.addf %296, %297 : vector<16x32xf32>
    %299 = vector.broadcast %3 : vector<16x1xf32> to vector<16x32xf32>
    %300 = arith.mulf %298, %299 : vector<16x32xf32>
    %c1_131 = arith.constant 1 : index
    %c0_132 = arith.constant 0 : index
    %c0_133 = arith.constant 0 : index
    %301 = vector.load %arg13[%c1_131, %c0_132, %c0_133] : memref<2x32x64xf32, #tpu.memory_space<vmem>>, vector<1x32x64xf32>
    %302 = vector.shape_cast %301 : vector<1x32x64xf32> to vector<32x64xf32>
    %c1_134 = arith.constant 1 : index
    %c0_135 = arith.constant 0 : index
    %c0_136 = arith.constant 0 : index
    %303 = vector.load %arg14[%c1_134, %c0_135, %c0_136] : memref<2x1x64xf32, #tpu.memory_space<vmem>>, vector<1x1x64xf32>
    %304 = vector.shape_cast %303 : vector<1x1x64xf32> to vector<1x64xf32>
    %c1_137 = arith.constant 1 : index
    %c0_138 = arith.constant 0 : index
    %c0_139 = arith.constant 0 : index
    %305 = vector.load %arg15[%c1_137, %c0_138, %c0_139] : memref<2x64x32xf32, #tpu.memory_space<vmem>>, vector<1x64x32xf32>
    %306 = vector.shape_cast %305 : vector<1x64x32xf32> to vector<64x32xf32>
    %c1_140 = arith.constant 1 : index
    %c0_141 = arith.constant 0 : index
    %c0_142 = arith.constant 0 : index
    %307 = vector.load %arg16[%c1_140, %c0_141, %c0_142] : memref<2x1x32xf32, #tpu.memory_space<vmem>>, vector<1x1x32xf32>
    %308 = vector.shape_cast %307 : vector<1x1x32xf32> to vector<1x32xf32>
    %c1_143 = arith.constant 1 : index
    %c0_144 = arith.constant 0 : index
    %c0_145 = arith.constant 0 : index
    %309 = vector.load %arg17[%c1_143, %c0_144, %c0_145] : memref<2x1x32xf32, #tpu.memory_space<vmem>>, vector<1x1x32xf32>
    %310 = vector.shape_cast %309 : vector<1x1x32xf32> to vector<1x32xf32>
    %c1_146 = arith.constant 1 : index
    %c0_147 = arith.constant 0 : index
    %c0_148 = arith.constant 0 : index
    %311 = vector.load %arg18[%c1_146, %c0_147, %c0_148] : memref<2x1x32xf32, #tpu.memory_space<vmem>>, vector<1x1x32xf32>
    %312 = vector.shape_cast %311 : vector<1x1x32xf32> to vector<1x32xf32>
    %cst_149 = arith.constant dense<0.000000e+00> : vector<16x64xf32>
    %313 = tpu.matmul %300, %302, %cst_149 {dimension_numbers = #tpu.dot_dimension_numbers<[1], [0], [0], [1], [0, 0, 1, 1], [], []>} : vector<16x32xf32>, vector<32x64xf32>, vector<16x64xf32> -> vector<16x64xf32>
    %314 = vector.broadcast %304 : vector<1x64xf32> to vector<16x64xf32>
    %315 = arith.addf %313, %314 : vector<16x64xf32>
    %cst_150 = arith.constant 0.000000e+00 : f32
    %316 = vector.broadcast %cst_150 : f32 to vector<16x64xf32>
    %317 = arith.maximumf %315, %316 : vector<16x64xf32>
    %cst_151 = arith.constant dense<0.000000e+00> : vector<16x32xf32>
    %318 = tpu.matmul %317, %306, %cst_151 {dimension_numbers = #tpu.dot_dimension_numbers<[1], [0], [0], [1], [0, 0, 1, 1], [], []>} : vector<16x64xf32>, vector<64x32xf32>, vector<16x32xf32> -> vector<16x32xf32>
    %319 = vector.broadcast %308 : vector<1x32xf32> to vector<16x32xf32>
    %320 = arith.addf %318, %319 : vector<16x32xf32>
    %321 = arith.addf %320, %300 : vector<16x32xf32>
    %cst_152 = arith.constant dense<0.000000e+00> : vector<16xf32>
    %322 = vector.multi_reduction <add>, %321, %cst_152 [1] : vector<16x32xf32> to vector<16xf32>
    %323 = vector.shape_cast %322 : vector<16xf32> to vector<16x1xf32>
    %cst_153 = arith.constant 3.200000e+01 : f32
    %324 = vector.broadcast %cst_153 : f32 to vector<16x1xf32>
    %325 = arith.divf %323, %324 : vector<16x1xf32>
    %326 = vector.broadcast %325 : vector<16x1xf32> to vector<16x32xf32>
    %327 = arith.subf %321, %326 : vector<16x32xf32>
    %328 = arith.mulf %327, %327 : vector<16x32xf32>
    %cst_154 = arith.constant dense<0.000000e+00> : vector<16xf32>
    %329 = vector.multi_reduction <add>, %328, %cst_154 [1] : vector<16x32xf32> to vector<16xf32>
    %330 = vector.shape_cast %329 : vector<16xf32> to vector<16x1xf32>
    %cst_155 = arith.constant 3.200000e+01 : f32
    %331 = vector.broadcast %cst_155 : f32 to vector<16x1xf32>
    %332 = arith.divf %330, %331 : vector<16x1xf32>
    %cst_156 = arith.constant 9.99999974E-6 : f32
    %333 = vector.broadcast %cst_156 : f32 to vector<16x1xf32>
    %334 = arith.addf %332, %333 : vector<16x1xf32>
    %335 = math.rsqrt %334 : vector<16x1xf32>
    %336 = vector.broadcast %335 : vector<16x1xf32> to vector<16x32xf32>
    %337 = arith.mulf %327, %336 : vector<16x32xf32>
    %338 = vector.broadcast %310 : vector<1x32xf32> to vector<16x32xf32>
    %339 = arith.mulf %337, %338 : vector<16x32xf32>
    %340 = vector.broadcast %312 : vector<1x32xf32> to vector<16x32xf32>
    %341 = arith.addf %339, %340 : vector<16x32xf32>
    %342 = vector.broadcast %3 : vector<16x1xf32> to vector<16x32xf32>
    %343 = arith.mulf %341, %342 : vector<16x32xf32>
    %c0_157 = arith.constant 0 : index
    %c0_158 = arith.constant 0 : index
    %344 = vector.load %arg1[%c0_157, %c0_158] : memref<14x32xf32, #tpu.memory_space<vmem>>, vector<14x32xf32>
    %c0_159 = arith.constant 0 : index
    %c0_160 = arith.constant 0 : index
    %c0_161 = arith.constant 0 : index
    %345 = vector.load %arg19[%c0_159, %c0_160, %c0_161] : memref<2x32x96xf32, #tpu.memory_space<vmem>>, vector<1x32x96xf32>
    %346 = vector.shape_cast %345 : vector<1x32x96xf32> to vector<32x96xf32>
    %c0_162 = arith.constant 0 : index
    %c0_163 = arith.constant 0 : index
    %c0_164 = arith.constant 0 : index
    %347 = vector.load %arg20[%c0_162, %c0_163, %c0_164] : memref<2x1x96xf32, #tpu.memory_space<vmem>>, vector<1x1x96xf32>
    %348 = vector.shape_cast %347 : vector<1x1x96xf32> to vector<1x96xf32>
    %c0_165 = arith.constant 0 : index
    %c0_166 = arith.constant 0 : index
    %c0_167 = arith.constant 0 : index
    %349 = vector.load %arg21[%c0_165, %c0_166, %c0_167] : memref<2x32x32xf32, #tpu.memory_space<vmem>>, vector<1x32x32xf32>
    %350 = vector.shape_cast %349 : vector<1x32x32xf32> to vector<32x32xf32>
    %c0_168 = arith.constant 0 : index
    %c0_169 = arith.constant 0 : index
    %c0_170 = arith.constant 0 : index
    %351 = vector.load %arg22[%c0_168, %c0_169, %c0_170] : memref<2x1x32xf32, #tpu.memory_space<vmem>>, vector<1x1x32xf32>
    %352 = vector.shape_cast %351 : vector<1x1x32xf32> to vector<1x32xf32>
    %c0_171 = arith.constant 0 : index
    %c0_172 = arith.constant 0 : index
    %c0_173 = arith.constant 0 : index
    %353 = vector.load %arg23[%c0_171, %c0_172, %c0_173] : memref<2x1x32xf32, #tpu.memory_space<vmem>>, vector<1x1x32xf32>
    %354 = vector.shape_cast %353 : vector<1x1x32xf32> to vector<1x32xf32>
    %c0_174 = arith.constant 0 : index
    %c0_175 = arith.constant 0 : index
    %c0_176 = arith.constant 0 : index
    %355 = vector.load %arg24[%c0_174, %c0_175, %c0_176] : memref<2x1x32xf32, #tpu.memory_space<vmem>>, vector<1x1x32xf32>
    %356 = vector.shape_cast %355 : vector<1x1x32xf32> to vector<1x32xf32>
    %cst_177 = arith.constant dense<0.000000e+00> : vector<14x96xf32>
    %357 = tpu.matmul %344, %346, %cst_177 {dimension_numbers = #tpu.dot_dimension_numbers<[1], [0], [0], [1], [0, 0, 1, 1], [], []>} : vector<14x32xf32>, vector<32x96xf32>, vector<14x96xf32> -> vector<14x96xf32>
    %358 = vector.broadcast %348 : vector<1x96xf32> to vector<14x96xf32>
    %359 = arith.addf %357, %358 : vector<14x96xf32>
    %360 = vector.extract_strided_slice %359 {offsets = [0, 0], sizes = [14, 32], strides = [1, 1]} : vector<14x96xf32> to vector<14x32xf32>
    %361 = vector.extract_strided_slice %359 {offsets = [0, 32], sizes = [14, 32], strides = [1, 1]} : vector<14x96xf32> to vector<14x32xf32>
    %362 = vector.extract_strided_slice %359 {offsets = [0, 64], sizes = [14, 32], strides = [1, 1]} : vector<14x96xf32> to vector<14x32xf32>
    %363 = vector.extract_strided_slice %360 {offsets = [0, 0], sizes = [14, 8], strides = [1, 1]} : vector<14x32xf32> to vector<14x8xf32>
    %364 = vector.extract_strided_slice %361 {offsets = [0, 0], sizes = [14, 8], strides = [1, 1]} : vector<14x32xf32> to vector<14x8xf32>
    %365 = vector.extract_strided_slice %362 {offsets = [0, 0], sizes = [14, 8], strides = [1, 1]} : vector<14x32xf32> to vector<14x8xf32>
    %cst_178 = arith.constant dense<0.000000e+00> : vector<14x14xf32>
    %366 = tpu.matmul %363, %364, %cst_178 {dimension_numbers = #tpu.dot_dimension_numbers<[1], [1], [0], [0], [0, 0, 1, 0], [], []>} : vector<14x8xf32>, vector<14x8xf32>, vector<14x14xf32> -> vector<14x14xf32>
    %cst_179 = arith.constant 0.353553385 : f32
    %367 = vector.broadcast %cst_179 : f32 to vector<14x14xf32>
    %368 = arith.mulf %366, %367 : vector<14x14xf32>
    %369 = arith.addf %368, %1 : vector<14x14xf32>
    %cst_180 = arith.constant dense<0xFF800000> : vector<14xf32>
    %370 = vector.multi_reduction <maximumf>, %369, %cst_180 [1] : vector<14x14xf32> to vector<14xf32>
    %371 = vector.shape_cast %370 : vector<14xf32> to vector<14x1xf32>
    %372 = vector.broadcast %371 : vector<14x1xf32> to vector<14x14xf32>
    %373 = arith.subf %369, %372 : vector<14x14xf32>
    %374 = math.exp %373 : vector<14x14xf32>
    %cst_181 = arith.constant dense<0.000000e+00> : vector<14xf32>
    %375 = vector.multi_reduction <add>, %374, %cst_181 [1] : vector<14x14xf32> to vector<14xf32>
    %376 = vector.shape_cast %375 : vector<14xf32> to vector<14x1xf32>
    %377 = tpu.reciprocal %376 {approx = true} : vector<14x1xf32> -> vector<14x1xf32>
    %378 = vector.broadcast %377 : vector<14x1xf32> to vector<14x14xf32>
    %379 = arith.mulf %374, %378 : vector<14x14xf32>
    %cst_182 = arith.constant dense<0.000000e+00> : vector<14x8xf32>
    %380 = tpu.matmul %379, %365, %cst_182 {dimension_numbers = #tpu.dot_dimension_numbers<[1], [0], [0], [1], [0, 0, 1, 1], [], []>} : vector<14x14xf32>, vector<14x8xf32>, vector<14x8xf32> -> vector<14x8xf32>
    %381 = vector.extract_strided_slice %350 {offsets = [0, 0], sizes = [8, 32], strides = [1, 1]} : vector<32x32xf32> to vector<8x32xf32>
    %cst_183 = arith.constant dense<0.000000e+00> : vector<14x32xf32>
    %382 = tpu.matmul %380, %381, %cst_183 {dimension_numbers = #tpu.dot_dimension_numbers<[1], [0], [0], [1], [0, 0, 1, 1], [], []>} : vector<14x8xf32>, vector<8x32xf32>, vector<14x32xf32> -> vector<14x32xf32>
    %383 = vector.extract_strided_slice %360 {offsets = [0, 8], sizes = [14, 8], strides = [1, 1]} : vector<14x32xf32> to vector<14x8xf32>
    %384 = vector.extract_strided_slice %361 {offsets = [0, 8], sizes = [14, 8], strides = [1, 1]} : vector<14x32xf32> to vector<14x8xf32>
    %385 = vector.extract_strided_slice %362 {offsets = [0, 8], sizes = [14, 8], strides = [1, 1]} : vector<14x32xf32> to vector<14x8xf32>
    %cst_184 = arith.constant dense<0.000000e+00> : vector<14x14xf32>
    %386 = tpu.matmul %383, %384, %cst_184 {dimension_numbers = #tpu.dot_dimension_numbers<[1], [1], [0], [0], [0, 0, 1, 0], [], []>} : vector<14x8xf32>, vector<14x8xf32>, vector<14x14xf32> -> vector<14x14xf32>
    %cst_185 = arith.constant 0.353553385 : f32
    %387 = vector.broadcast %cst_185 : f32 to vector<14x14xf32>
    %388 = arith.mulf %386, %387 : vector<14x14xf32>
    %389 = arith.addf %388, %1 : vector<14x14xf32>
    %cst_186 = arith.constant dense<0xFF800000> : vector<14xf32>
    %390 = vector.multi_reduction <maximumf>, %389, %cst_186 [1] : vector<14x14xf32> to vector<14xf32>
    %391 = vector.shape_cast %390 : vector<14xf32> to vector<14x1xf32>
    %392 = vector.broadcast %391 : vector<14x1xf32> to vector<14x14xf32>
    %393 = arith.subf %389, %392 : vector<14x14xf32>
    %394 = math.exp %393 : vector<14x14xf32>
    %cst_187 = arith.constant dense<0.000000e+00> : vector<14xf32>
    %395 = vector.multi_reduction <add>, %394, %cst_187 [1] : vector<14x14xf32> to vector<14xf32>
    %396 = vector.shape_cast %395 : vector<14xf32> to vector<14x1xf32>
    %397 = tpu.reciprocal %396 {approx = true} : vector<14x1xf32> -> vector<14x1xf32>
    %398 = vector.broadcast %397 : vector<14x1xf32> to vector<14x14xf32>
    %399 = arith.mulf %394, %398 : vector<14x14xf32>
    %cst_188 = arith.constant dense<0.000000e+00> : vector<14x8xf32>
    %400 = tpu.matmul %399, %385, %cst_188 {dimension_numbers = #tpu.dot_dimension_numbers<[1], [0], [0], [1], [0, 0, 1, 1], [], []>} : vector<14x14xf32>, vector<14x8xf32>, vector<14x8xf32> -> vector<14x8xf32>
    %401 = vector.extract_strided_slice %350 {offsets = [8, 0], sizes = [8, 32], strides = [1, 1]} : vector<32x32xf32> to vector<8x32xf32>
    %cst_189 = arith.constant dense<0.000000e+00> : vector<14x32xf32>
    %402 = tpu.matmul %400, %401, %cst_189 {dimension_numbers = #tpu.dot_dimension_numbers<[1], [0], [0], [1], [0, 0, 1, 1], [], []>} : vector<14x8xf32>, vector<8x32xf32>, vector<14x32xf32> -> vector<14x32xf32>
    %403 = arith.addf %382, %402 : vector<14x32xf32>
    %404 = vector.extract_strided_slice %360 {offsets = [0, 16], sizes = [14, 8], strides = [1, 1]} : vector<14x32xf32> to vector<14x8xf32>
    %405 = vector.extract_strided_slice %361 {offsets = [0, 16], sizes = [14, 8], strides = [1, 1]} : vector<14x32xf32> to vector<14x8xf32>
    %406 = vector.extract_strided_slice %362 {offsets = [0, 16], sizes = [14, 8], strides = [1, 1]} : vector<14x32xf32> to vector<14x8xf32>
    %cst_190 = arith.constant dense<0.000000e+00> : vector<14x14xf32>
    %407 = tpu.matmul %404, %405, %cst_190 {dimension_numbers = #tpu.dot_dimension_numbers<[1], [1], [0], [0], [0, 0, 1, 0], [], []>} : vector<14x8xf32>, vector<14x8xf32>, vector<14x14xf32> -> vector<14x14xf32>
    %cst_191 = arith.constant 0.353553385 : f32
    %408 = vector.broadcast %cst_191 : f32 to vector<14x14xf32>
    %409 = arith.mulf %407, %408 : vector<14x14xf32>
    %410 = arith.addf %409, %1 : vector<14x14xf32>
    %cst_192 = arith.constant dense<0xFF800000> : vector<14xf32>
    %411 = vector.multi_reduction <maximumf>, %410, %cst_192 [1] : vector<14x14xf32> to vector<14xf32>
    %412 = vector.shape_cast %411 : vector<14xf32> to vector<14x1xf32>
    %413 = vector.broadcast %412 : vector<14x1xf32> to vector<14x14xf32>
    %414 = arith.subf %410, %413 : vector<14x14xf32>
    %415 = math.exp %414 : vector<14x14xf32>
    %cst_193 = arith.constant dense<0.000000e+00> : vector<14xf32>
    %416 = vector.multi_reduction <add>, %415, %cst_193 [1] : vector<14x14xf32> to vector<14xf32>
    %417 = vector.shape_cast %416 : vector<14xf32> to vector<14x1xf32>
    %418 = tpu.reciprocal %417 {approx = true} : vector<14x1xf32> -> vector<14x1xf32>
    %419 = vector.broadcast %418 : vector<14x1xf32> to vector<14x14xf32>
    %420 = arith.mulf %415, %419 : vector<14x14xf32>
    %cst_194 = arith.constant dense<0.000000e+00> : vector<14x8xf32>
    %421 = tpu.matmul %420, %406, %cst_194 {dimension_numbers = #tpu.dot_dimension_numbers<[1], [0], [0], [1], [0, 0, 1, 1], [], []>} : vector<14x14xf32>, vector<14x8xf32>, vector<14x8xf32> -> vector<14x8xf32>
    %422 = vector.extract_strided_slice %350 {offsets = [16, 0], sizes = [8, 32], strides = [1, 1]} : vector<32x32xf32> to vector<8x32xf32>
    %cst_195 = arith.constant dense<0.000000e+00> : vector<14x32xf32>
    %423 = tpu.matmul %421, %422, %cst_195 {dimension_numbers = #tpu.dot_dimension_numbers<[1], [0], [0], [1], [0, 0, 1, 1], [], []>} : vector<14x8xf32>, vector<8x32xf32>, vector<14x32xf32> -> vector<14x32xf32>
    %424 = arith.addf %403, %423 : vector<14x32xf32>
    %425 = vector.extract_strided_slice %360 {offsets = [0, 24], sizes = [14, 8], strides = [1, 1]} : vector<14x32xf32> to vector<14x8xf32>
    %426 = vector.extract_strided_slice %361 {offsets = [0, 24], sizes = [14, 8], strides = [1, 1]} : vector<14x32xf32> to vector<14x8xf32>
    %427 = vector.extract_strided_slice %362 {offsets = [0, 24], sizes = [14, 8], strides = [1, 1]} : vector<14x32xf32> to vector<14x8xf32>
    %cst_196 = arith.constant dense<0.000000e+00> : vector<14x14xf32>
    %428 = tpu.matmul %425, %426, %cst_196 {dimension_numbers = #tpu.dot_dimension_numbers<[1], [1], [0], [0], [0, 0, 1, 0], [], []>} : vector<14x8xf32>, vector<14x8xf32>, vector<14x14xf32> -> vector<14x14xf32>
    %cst_197 = arith.constant 0.353553385 : f32
    %429 = vector.broadcast %cst_197 : f32 to vector<14x14xf32>
    %430 = arith.mulf %428, %429 : vector<14x14xf32>
    %431 = arith.addf %430, %1 : vector<14x14xf32>
    %cst_198 = arith.constant dense<0xFF800000> : vector<14xf32>
    %432 = vector.multi_reduction <maximumf>, %431, %cst_198 [1] : vector<14x14xf32> to vector<14xf32>
    %433 = vector.shape_cast %432 : vector<14xf32> to vector<14x1xf32>
    %434 = vector.broadcast %433 : vector<14x1xf32> to vector<14x14xf32>
    %435 = arith.subf %431, %434 : vector<14x14xf32>
    %436 = math.exp %435 : vector<14x14xf32>
    %cst_199 = arith.constant dense<0.000000e+00> : vector<14xf32>
    %437 = vector.multi_reduction <add>, %436, %cst_199 [1] : vector<14x14xf32> to vector<14xf32>
    %438 = vector.shape_cast %437 : vector<14xf32> to vector<14x1xf32>
    %439 = tpu.reciprocal %438 {approx = true} : vector<14x1xf32> -> vector<14x1xf32>
    %440 = vector.broadcast %439 : vector<14x1xf32> to vector<14x14xf32>
    %441 = arith.mulf %436, %440 : vector<14x14xf32>
    %cst_200 = arith.constant dense<0.000000e+00> : vector<14x8xf32>
    %442 = tpu.matmul %441, %427, %cst_200 {dimension_numbers = #tpu.dot_dimension_numbers<[1], [0], [0], [1], [0, 0, 1, 1], [], []>} : vector<14x14xf32>, vector<14x8xf32>, vector<14x8xf32> -> vector<14x8xf32>
    %443 = vector.extract_strided_slice %350 {offsets = [24, 0], sizes = [8, 32], strides = [1, 1]} : vector<32x32xf32> to vector<8x32xf32>
    %cst_201 = arith.constant dense<0.000000e+00> : vector<14x32xf32>
    %444 = tpu.matmul %442, %443, %cst_201 {dimension_numbers = #tpu.dot_dimension_numbers<[1], [0], [0], [1], [0, 0, 1, 1], [], []>} : vector<14x8xf32>, vector<8x32xf32>, vector<14x32xf32> -> vector<14x32xf32>
    %445 = arith.addf %424, %444 : vector<14x32xf32>
    %446 = vector.broadcast %352 : vector<1x32xf32> to vector<14x32xf32>
    %447 = arith.addf %445, %446 : vector<14x32xf32>
    %448 = arith.addf %447, %344 : vector<14x32xf32>
    %cst_202 = arith.constant dense<0.000000e+00> : vector<14xf32>
    %449 = vector.multi_reduction <add>, %448, %cst_202 [1] : vector<14x32xf32> to vector<14xf32>
    %450 = vector.shape_cast %449 : vector<14xf32> to vector<14x1xf32>
    %cst_203 = arith.constant 3.200000e+01 : f32
    %451 = vector.broadcast %cst_203 : f32 to vector<14x1xf32>
    %452 = arith.divf %450, %451 : vector<14x1xf32>
    %453 = vector.broadcast %452 : vector<14x1xf32> to vector<14x32xf32>
    %454 = arith.subf %448, %453 : vector<14x32xf32>
    %455 = arith.mulf %454, %454 : vector<14x32xf32>
    %cst_204 = arith.constant dense<0.000000e+00> : vector<14xf32>
    %456 = vector.multi_reduction <add>, %455, %cst_204 [1] : vector<14x32xf32> to vector<14xf32>
    %457 = vector.shape_cast %456 : vector<14xf32> to vector<14x1xf32>
    %cst_205 = arith.constant 3.200000e+01 : f32
    %458 = vector.broadcast %cst_205 : f32 to vector<14x1xf32>
    %459 = arith.divf %457, %458 : vector<14x1xf32>
    %cst_206 = arith.constant 9.99999974E-6 : f32
    %460 = vector.broadcast %cst_206 : f32 to vector<14x1xf32>
    %461 = arith.addf %459, %460 : vector<14x1xf32>
    %462 = math.rsqrt %461 : vector<14x1xf32>
    %463 = vector.broadcast %462 : vector<14x1xf32> to vector<14x32xf32>
    %464 = arith.mulf %454, %463 : vector<14x32xf32>
    %465 = vector.broadcast %354 : vector<1x32xf32> to vector<14x32xf32>
    %466 = arith.mulf %464, %465 : vector<14x32xf32>
    %467 = vector.broadcast %356 : vector<1x32xf32> to vector<14x32xf32>
    %468 = arith.addf %466, %467 : vector<14x32xf32>
    %469 = vector.broadcast %4 : vector<14x1xf32> to vector<14x32xf32>
    %470 = arith.mulf %468, %469 : vector<14x32xf32>
    %c0_207 = arith.constant 0 : index
    %c0_208 = arith.constant 0 : index
    %c0_209 = arith.constant 0 : index
    %471 = vector.load %arg25[%c0_207, %c0_208, %c0_209] : memref<2x32x96xf32, #tpu.memory_space<vmem>>, vector<1x32x96xf32>
    %472 = vector.shape_cast %471 : vector<1x32x96xf32> to vector<32x96xf32>
    %c0_210 = arith.constant 0 : index
    %c0_211 = arith.constant 0 : index
    %c0_212 = arith.constant 0 : index
    %473 = vector.load %arg26[%c0_210, %c0_211, %c0_212] : memref<2x1x96xf32, #tpu.memory_space<vmem>>, vector<1x1x96xf32>
    %474 = vector.shape_cast %473 : vector<1x1x96xf32> to vector<1x96xf32>
    %c0_213 = arith.constant 0 : index
    %c0_214 = arith.constant 0 : index
    %c0_215 = arith.constant 0 : index
    %475 = vector.load %arg27[%c0_213, %c0_214, %c0_215] : memref<2x32x32xf32, #tpu.memory_space<vmem>>, vector<1x32x32xf32>
    %476 = vector.shape_cast %475 : vector<1x32x32xf32> to vector<32x32xf32>
    %c0_216 = arith.constant 0 : index
    %c0_217 = arith.constant 0 : index
    %c0_218 = arith.constant 0 : index
    %477 = vector.load %arg28[%c0_216, %c0_217, %c0_218] : memref<2x1x32xf32, #tpu.memory_space<vmem>>, vector<1x1x32xf32>
    %478 = vector.shape_cast %477 : vector<1x1x32xf32> to vector<1x32xf32>
    %c0_219 = arith.constant 0 : index
    %c0_220 = arith.constant 0 : index
    %c0_221 = arith.constant 0 : index
    %479 = vector.load %arg29[%c0_219, %c0_220, %c0_221] : memref<2x1x32xf32, #tpu.memory_space<vmem>>, vector<1x1x32xf32>
    %480 = vector.shape_cast %479 : vector<1x1x32xf32> to vector<1x32xf32>
    %c0_222 = arith.constant 0 : index
    %c0_223 = arith.constant 0 : index
    %c0_224 = arith.constant 0 : index
    %481 = vector.load %arg30[%c0_222, %c0_223, %c0_224] : memref<2x1x32xf32, #tpu.memory_space<vmem>>, vector<1x1x32xf32>
    %482 = vector.shape_cast %481 : vector<1x1x32xf32> to vector<1x32xf32>
    %483 = vector.extract_strided_slice %472 {offsets = [0, 0], sizes = [32, 32], strides = [1, 1]} : vector<32x96xf32> to vector<32x32xf32>
    %cst_225 = arith.constant dense<0.000000e+00> : vector<14x32xf32>
    %484 = tpu.matmul %470, %483, %cst_225 {dimension_numbers = #tpu.dot_dimension_numbers<[1], [0], [0], [1], [0, 0, 1, 1], [], []>} : vector<14x32xf32>, vector<32x32xf32>, vector<14x32xf32> -> vector<14x32xf32>
    %485 = vector.extract_strided_slice %474 {offsets = [0, 0], sizes = [1, 32], strides = [1, 1]} : vector<1x96xf32> to vector<1x32xf32>
    %486 = vector.broadcast %485 : vector<1x32xf32> to vector<14x32xf32>
    %487 = arith.addf %484, %486 : vector<14x32xf32>
    %488 = vector.extract_strided_slice %472 {offsets = [0, 32], sizes = [32, 64], strides = [1, 1]} : vector<32x96xf32> to vector<32x64xf32>
    %cst_226 = arith.constant dense<0.000000e+00> : vector<16x64xf32>
    %489 = tpu.matmul %343, %488, %cst_226 {dimension_numbers = #tpu.dot_dimension_numbers<[1], [0], [0], [1], [0, 0, 1, 1], [], []>} : vector<16x32xf32>, vector<32x64xf32>, vector<16x64xf32> -> vector<16x64xf32>
    %490 = vector.extract_strided_slice %474 {offsets = [0, 32], sizes = [1, 64], strides = [1, 1]} : vector<1x96xf32> to vector<1x64xf32>
    %491 = vector.broadcast %490 : vector<1x64xf32> to vector<16x64xf32>
    %492 = arith.addf %489, %491 : vector<16x64xf32>
    %493 = vector.extract_strided_slice %492 {offsets = [0, 0], sizes = [16, 32], strides = [1, 1]} : vector<16x64xf32> to vector<16x32xf32>
    %494 = vector.extract_strided_slice %492 {offsets = [0, 32], sizes = [16, 32], strides = [1, 1]} : vector<16x64xf32> to vector<16x32xf32>
    %495 = vector.extract_strided_slice %487 {offsets = [0, 0], sizes = [14, 8], strides = [1, 1]} : vector<14x32xf32> to vector<14x8xf32>
    %496 = vector.extract_strided_slice %493 {offsets = [0, 0], sizes = [16, 8], strides = [1, 1]} : vector<16x32xf32> to vector<16x8xf32>
    %497 = vector.extract_strided_slice %494 {offsets = [0, 0], sizes = [16, 8], strides = [1, 1]} : vector<16x32xf32> to vector<16x8xf32>
    %cst_227 = arith.constant dense<0.000000e+00> : vector<14x16xf32>
    %498 = tpu.matmul %495, %496, %cst_227 {dimension_numbers = #tpu.dot_dimension_numbers<[1], [1], [0], [0], [0, 0, 1, 0], [], []>} : vector<14x8xf32>, vector<16x8xf32>, vector<14x16xf32> -> vector<14x16xf32>
    %cst_228 = arith.constant 0.353553385 : f32
    %499 = vector.broadcast %cst_228 : f32 to vector<14x16xf32>
    %500 = arith.mulf %498, %499 : vector<14x16xf32>
    %501 = arith.addf %500, %2 : vector<14x16xf32>
    %cst_229 = arith.constant dense<0xFF800000> : vector<14xf32>
    %502 = vector.multi_reduction <maximumf>, %501, %cst_229 [1] : vector<14x16xf32> to vector<14xf32>
    %503 = vector.shape_cast %502 : vector<14xf32> to vector<14x1xf32>
    %504 = vector.broadcast %503 : vector<14x1xf32> to vector<14x16xf32>
    %505 = arith.subf %501, %504 : vector<14x16xf32>
    %506 = math.exp %505 : vector<14x16xf32>
    %cst_230 = arith.constant dense<0.000000e+00> : vector<14xf32>
    %507 = vector.multi_reduction <add>, %506, %cst_230 [1] : vector<14x16xf32> to vector<14xf32>
    %508 = vector.shape_cast %507 : vector<14xf32> to vector<14x1xf32>
    %509 = tpu.reciprocal %508 {approx = true} : vector<14x1xf32> -> vector<14x1xf32>
    %510 = vector.broadcast %509 : vector<14x1xf32> to vector<14x16xf32>
    %511 = arith.mulf %506, %510 : vector<14x16xf32>
    %cst_231 = arith.constant dense<0.000000e+00> : vector<14x8xf32>
    %512 = tpu.matmul %511, %497, %cst_231 {dimension_numbers = #tpu.dot_dimension_numbers<[1], [0], [0], [1], [0, 0, 1, 1], [], []>} : vector<14x16xf32>, vector<16x8xf32>, vector<14x8xf32> -> vector<14x8xf32>
    %513 = vector.extract_strided_slice %476 {offsets = [0, 0], sizes = [8, 32], strides = [1, 1]} : vector<32x32xf32> to vector<8x32xf32>
    %cst_232 = arith.constant dense<0.000000e+00> : vector<14x32xf32>
    %514 = tpu.matmul %512, %513, %cst_232 {dimension_numbers = #tpu.dot_dimension_numbers<[1], [0], [0], [1], [0, 0, 1, 1], [], []>} : vector<14x8xf32>, vector<8x32xf32>, vector<14x32xf32> -> vector<14x32xf32>
    %515 = vector.extract_strided_slice %487 {offsets = [0, 8], sizes = [14, 8], strides = [1, 1]} : vector<14x32xf32> to vector<14x8xf32>
    %516 = vector.extract_strided_slice %493 {offsets = [0, 8], sizes = [16, 8], strides = [1, 1]} : vector<16x32xf32> to vector<16x8xf32>
    %517 = vector.extract_strided_slice %494 {offsets = [0, 8], sizes = [16, 8], strides = [1, 1]} : vector<16x32xf32> to vector<16x8xf32>
    %cst_233 = arith.constant dense<0.000000e+00> : vector<14x16xf32>
    %518 = tpu.matmul %515, %516, %cst_233 {dimension_numbers = #tpu.dot_dimension_numbers<[1], [1], [0], [0], [0, 0, 1, 0], [], []>} : vector<14x8xf32>, vector<16x8xf32>, vector<14x16xf32> -> vector<14x16xf32>
    %cst_234 = arith.constant 0.353553385 : f32
    %519 = vector.broadcast %cst_234 : f32 to vector<14x16xf32>
    %520 = arith.mulf %518, %519 : vector<14x16xf32>
    %521 = arith.addf %520, %2 : vector<14x16xf32>
    %cst_235 = arith.constant dense<0xFF800000> : vector<14xf32>
    %522 = vector.multi_reduction <maximumf>, %521, %cst_235 [1] : vector<14x16xf32> to vector<14xf32>
    %523 = vector.shape_cast %522 : vector<14xf32> to vector<14x1xf32>
    %524 = vector.broadcast %523 : vector<14x1xf32> to vector<14x16xf32>
    %525 = arith.subf %521, %524 : vector<14x16xf32>
    %526 = math.exp %525 : vector<14x16xf32>
    %cst_236 = arith.constant dense<0.000000e+00> : vector<14xf32>
    %527 = vector.multi_reduction <add>, %526, %cst_236 [1] : vector<14x16xf32> to vector<14xf32>
    %528 = vector.shape_cast %527 : vector<14xf32> to vector<14x1xf32>
    %529 = tpu.reciprocal %528 {approx = true} : vector<14x1xf32> -> vector<14x1xf32>
    %530 = vector.broadcast %529 : vector<14x1xf32> to vector<14x16xf32>
    %531 = arith.mulf %526, %530 : vector<14x16xf32>
    %cst_237 = arith.constant dense<0.000000e+00> : vector<14x8xf32>
    %532 = tpu.matmul %531, %517, %cst_237 {dimension_numbers = #tpu.dot_dimension_numbers<[1], [0], [0], [1], [0, 0, 1, 1], [], []>} : vector<14x16xf32>, vector<16x8xf32>, vector<14x8xf32> -> vector<14x8xf32>
    %533 = vector.extract_strided_slice %476 {offsets = [8, 0], sizes = [8, 32], strides = [1, 1]} : vector<32x32xf32> to vector<8x32xf32>
    %cst_238 = arith.constant dense<0.000000e+00> : vector<14x32xf32>
    %534 = tpu.matmul %532, %533, %cst_238 {dimension_numbers = #tpu.dot_dimension_numbers<[1], [0], [0], [1], [0, 0, 1, 1], [], []>} : vector<14x8xf32>, vector<8x32xf32>, vector<14x32xf32> -> vector<14x32xf32>
    %535 = arith.addf %514, %534 : vector<14x32xf32>
    %536 = vector.extract_strided_slice %487 {offsets = [0, 16], sizes = [14, 8], strides = [1, 1]} : vector<14x32xf32> to vector<14x8xf32>
    %537 = vector.extract_strided_slice %493 {offsets = [0, 16], sizes = [16, 8], strides = [1, 1]} : vector<16x32xf32> to vector<16x8xf32>
    %538 = vector.extract_strided_slice %494 {offsets = [0, 16], sizes = [16, 8], strides = [1, 1]} : vector<16x32xf32> to vector<16x8xf32>
    %cst_239 = arith.constant dense<0.000000e+00> : vector<14x16xf32>
    %539 = tpu.matmul %536, %537, %cst_239 {dimension_numbers = #tpu.dot_dimension_numbers<[1], [1], [0], [0], [0, 0, 1, 0], [], []>} : vector<14x8xf32>, vector<16x8xf32>, vector<14x16xf32> -> vector<14x16xf32>
    %cst_240 = arith.constant 0.353553385 : f32
    %540 = vector.broadcast %cst_240 : f32 to vector<14x16xf32>
    %541 = arith.mulf %539, %540 : vector<14x16xf32>
    %542 = arith.addf %541, %2 : vector<14x16xf32>
    %cst_241 = arith.constant dense<0xFF800000> : vector<14xf32>
    %543 = vector.multi_reduction <maximumf>, %542, %cst_241 [1] : vector<14x16xf32> to vector<14xf32>
    %544 = vector.shape_cast %543 : vector<14xf32> to vector<14x1xf32>
    %545 = vector.broadcast %544 : vector<14x1xf32> to vector<14x16xf32>
    %546 = arith.subf %542, %545 : vector<14x16xf32>
    %547 = math.exp %546 : vector<14x16xf32>
    %cst_242 = arith.constant dense<0.000000e+00> : vector<14xf32>
    %548 = vector.multi_reduction <add>, %547, %cst_242 [1] : vector<14x16xf32> to vector<14xf32>
    %549 = vector.shape_cast %548 : vector<14xf32> to vector<14x1xf32>
    %550 = tpu.reciprocal %549 {approx = true} : vector<14x1xf32> -> vector<14x1xf32>
    %551 = vector.broadcast %550 : vector<14x1xf32> to vector<14x16xf32>
    %552 = arith.mulf %547, %551 : vector<14x16xf32>
    %cst_243 = arith.constant dense<0.000000e+00> : vector<14x8xf32>
    %553 = tpu.matmul %552, %538, %cst_243 {dimension_numbers = #tpu.dot_dimension_numbers<[1], [0], [0], [1], [0, 0, 1, 1], [], []>} : vector<14x16xf32>, vector<16x8xf32>, vector<14x8xf32> -> vector<14x8xf32>
    %554 = vector.extract_strided_slice %476 {offsets = [16, 0], sizes = [8, 32], strides = [1, 1]} : vector<32x32xf32> to vector<8x32xf32>
    %cst_244 = arith.constant dense<0.000000e+00> : vector<14x32xf32>
    %555 = tpu.matmul %553, %554, %cst_244 {dimension_numbers = #tpu.dot_dimension_numbers<[1], [0], [0], [1], [0, 0, 1, 1], [], []>} : vector<14x8xf32>, vector<8x32xf32>, vector<14x32xf32> -> vector<14x32xf32>
    %556 = arith.addf %535, %555 : vector<14x32xf32>
    %557 = vector.extract_strided_slice %487 {offsets = [0, 24], sizes = [14, 8], strides = [1, 1]} : vector<14x32xf32> to vector<14x8xf32>
    %558 = vector.extract_strided_slice %493 {offsets = [0, 24], sizes = [16, 8], strides = [1, 1]} : vector<16x32xf32> to vector<16x8xf32>
    %559 = vector.extract_strided_slice %494 {offsets = [0, 24], sizes = [16, 8], strides = [1, 1]} : vector<16x32xf32> to vector<16x8xf32>
    %cst_245 = arith.constant dense<0.000000e+00> : vector<14x16xf32>
    %560 = tpu.matmul %557, %558, %cst_245 {dimension_numbers = #tpu.dot_dimension_numbers<[1], [1], [0], [0], [0, 0, 1, 0], [], []>} : vector<14x8xf32>, vector<16x8xf32>, vector<14x16xf32> -> vector<14x16xf32>
    %cst_246 = arith.constant 0.353553385 : f32
    %561 = vector.broadcast %cst_246 : f32 to vector<14x16xf32>
    %562 = arith.mulf %560, %561 : vector<14x16xf32>
    %563 = arith.addf %562, %2 : vector<14x16xf32>
    %cst_247 = arith.constant dense<0xFF800000> : vector<14xf32>
    %564 = vector.multi_reduction <maximumf>, %563, %cst_247 [1] : vector<14x16xf32> to vector<14xf32>
    %565 = vector.shape_cast %564 : vector<14xf32> to vector<14x1xf32>
    %566 = vector.broadcast %565 : vector<14x1xf32> to vector<14x16xf32>
    %567 = arith.subf %563, %566 : vector<14x16xf32>
    %568 = math.exp %567 : vector<14x16xf32>
    %cst_248 = arith.constant dense<0.000000e+00> : vector<14xf32>
    %569 = vector.multi_reduction <add>, %568, %cst_248 [1] : vector<14x16xf32> to vector<14xf32>
    %570 = vector.shape_cast %569 : vector<14xf32> to vector<14x1xf32>
    %571 = tpu.reciprocal %570 {approx = true} : vector<14x1xf32> -> vector<14x1xf32>
    %572 = vector.broadcast %571 : vector<14x1xf32> to vector<14x16xf32>
    %573 = arith.mulf %568, %572 : vector<14x16xf32>
    %cst_249 = arith.constant dense<0.000000e+00> : vector<14x8xf32>
    %574 = tpu.matmul %573, %559, %cst_249 {dimension_numbers = #tpu.dot_dimension_numbers<[1], [0], [0], [1], [0, 0, 1, 1], [], []>} : vector<14x16xf32>, vector<16x8xf32>, vector<14x8xf32> -> vector<14x8xf32>
    %575 = vector.extract_strided_slice %476 {offsets = [24, 0], sizes = [8, 32], strides = [1, 1]} : vector<32x32xf32> to vector<8x32xf32>
    %cst_250 = arith.constant dense<0.000000e+00> : vector<14x32xf32>
    %576 = tpu.matmul %574, %575, %cst_250 {dimension_numbers = #tpu.dot_dimension_numbers<[1], [0], [0], [1], [0, 0, 1, 1], [], []>} : vector<14x8xf32>, vector<8x32xf32>, vector<14x32xf32> -> vector<14x32xf32>
    %577 = arith.addf %556, %576 : vector<14x32xf32>
    %578 = vector.broadcast %478 : vector<1x32xf32> to vector<14x32xf32>
    %579 = arith.addf %577, %578 : vector<14x32xf32>
    %580 = arith.addf %579, %470 : vector<14x32xf32>
    %cst_251 = arith.constant dense<0.000000e+00> : vector<14xf32>
    %581 = vector.multi_reduction <add>, %580, %cst_251 [1] : vector<14x32xf32> to vector<14xf32>
    %582 = vector.shape_cast %581 : vector<14xf32> to vector<14x1xf32>
    %cst_252 = arith.constant 3.200000e+01 : f32
    %583 = vector.broadcast %cst_252 : f32 to vector<14x1xf32>
    %584 = arith.divf %582, %583 : vector<14x1xf32>
    %585 = vector.broadcast %584 : vector<14x1xf32> to vector<14x32xf32>
    %586 = arith.subf %580, %585 : vector<14x32xf32>
    %587 = arith.mulf %586, %586 : vector<14x32xf32>
    %cst_253 = arith.constant dense<0.000000e+00> : vector<14xf32>
    %588 = vector.multi_reduction <add>, %587, %cst_253 [1] : vector<14x32xf32> to vector<14xf32>
    %589 = vector.shape_cast %588 : vector<14xf32> to vector<14x1xf32>
    %cst_254 = arith.constant 3.200000e+01 : f32
    %590 = vector.broadcast %cst_254 : f32 to vector<14x1xf32>
    %591 = arith.divf %589, %590 : vector<14x1xf32>
    %cst_255 = arith.constant 9.99999974E-6 : f32
    %592 = vector.broadcast %cst_255 : f32 to vector<14x1xf32>
    %593 = arith.addf %591, %592 : vector<14x1xf32>
    %594 = math.rsqrt %593 : vector<14x1xf32>
    %595 = vector.broadcast %594 : vector<14x1xf32> to vector<14x32xf32>
    %596 = arith.mulf %586, %595 : vector<14x32xf32>
    %597 = vector.broadcast %480 : vector<1x32xf32> to vector<14x32xf32>
    %598 = arith.mulf %596, %597 : vector<14x32xf32>
    %599 = vector.broadcast %482 : vector<1x32xf32> to vector<14x32xf32>
    %600 = arith.addf %598, %599 : vector<14x32xf32>
    %601 = vector.broadcast %4 : vector<14x1xf32> to vector<14x32xf32>
    %602 = arith.mulf %600, %601 : vector<14x32xf32>
    %c0_256 = arith.constant 0 : index
    %c0_257 = arith.constant 0 : index
    %c0_258 = arith.constant 0 : index
    %603 = vector.load %arg31[%c0_256, %c0_257, %c0_258] : memref<2x32x64xf32, #tpu.memory_space<vmem>>, vector<1x32x64xf32>
    %604 = vector.shape_cast %603 : vector<1x32x64xf32> to vector<32x64xf32>
    %c0_259 = arith.constant 0 : index
    %c0_260 = arith.constant 0 : index
    %c0_261 = arith.constant 0 : index
    %605 = vector.load %arg32[%c0_259, %c0_260, %c0_261] : memref<2x1x64xf32, #tpu.memory_space<vmem>>, vector<1x1x64xf32>
    %606 = vector.shape_cast %605 : vector<1x1x64xf32> to vector<1x64xf32>
    %c0_262 = arith.constant 0 : index
    %c0_263 = arith.constant 0 : index
    %c0_264 = arith.constant 0 : index
    %607 = vector.load %arg33[%c0_262, %c0_263, %c0_264] : memref<2x64x32xf32, #tpu.memory_space<vmem>>, vector<1x64x32xf32>
    %608 = vector.shape_cast %607 : vector<1x64x32xf32> to vector<64x32xf32>
    %c0_265 = arith.constant 0 : index
    %c0_266 = arith.constant 0 : index
    %c0_267 = arith.constant 0 : index
    %609 = vector.load %arg34[%c0_265, %c0_266, %c0_267] : memref<2x1x32xf32, #tpu.memory_space<vmem>>, vector<1x1x32xf32>
    %610 = vector.shape_cast %609 : vector<1x1x32xf32> to vector<1x32xf32>
    %c0_268 = arith.constant 0 : index
    %c0_269 = arith.constant 0 : index
    %c0_270 = arith.constant 0 : index
    %611 = vector.load %arg35[%c0_268, %c0_269, %c0_270] : memref<2x1x32xf32, #tpu.memory_space<vmem>>, vector<1x1x32xf32>
    %612 = vector.shape_cast %611 : vector<1x1x32xf32> to vector<1x32xf32>
    %c0_271 = arith.constant 0 : index
    %c0_272 = arith.constant 0 : index
    %c0_273 = arith.constant 0 : index
    %613 = vector.load %arg36[%c0_271, %c0_272, %c0_273] : memref<2x1x32xf32, #tpu.memory_space<vmem>>, vector<1x1x32xf32>
    %614 = vector.shape_cast %613 : vector<1x1x32xf32> to vector<1x32xf32>
    %cst_274 = arith.constant dense<0.000000e+00> : vector<14x64xf32>
    %615 = tpu.matmul %602, %604, %cst_274 {dimension_numbers = #tpu.dot_dimension_numbers<[1], [0], [0], [1], [0, 0, 1, 1], [], []>} : vector<14x32xf32>, vector<32x64xf32>, vector<14x64xf32> -> vector<14x64xf32>
    %616 = vector.broadcast %606 : vector<1x64xf32> to vector<14x64xf32>
    %617 = arith.addf %615, %616 : vector<14x64xf32>
    %cst_275 = arith.constant 0.000000e+00 : f32
    %618 = vector.broadcast %cst_275 : f32 to vector<14x64xf32>
    %619 = arith.maximumf %617, %618 : vector<14x64xf32>
    %cst_276 = arith.constant dense<0.000000e+00> : vector<14x32xf32>
    %620 = tpu.matmul %619, %608, %cst_276 {dimension_numbers = #tpu.dot_dimension_numbers<[1], [0], [0], [1], [0, 0, 1, 1], [], []>} : vector<14x64xf32>, vector<64x32xf32>, vector<14x32xf32> -> vector<14x32xf32>
    %621 = vector.broadcast %610 : vector<1x32xf32> to vector<14x32xf32>
    %622 = arith.addf %620, %621 : vector<14x32xf32>
    %623 = arith.addf %622, %602 : vector<14x32xf32>
    %cst_277 = arith.constant dense<0.000000e+00> : vector<14xf32>
    %624 = vector.multi_reduction <add>, %623, %cst_277 [1] : vector<14x32xf32> to vector<14xf32>
    %625 = vector.shape_cast %624 : vector<14xf32> to vector<14x1xf32>
    %cst_278 = arith.constant 3.200000e+01 : f32
    %626 = vector.broadcast %cst_278 : f32 to vector<14x1xf32>
    %627 = arith.divf %625, %626 : vector<14x1xf32>
    %628 = vector.broadcast %627 : vector<14x1xf32> to vector<14x32xf32>
    %629 = arith.subf %623, %628 : vector<14x32xf32>
    %630 = arith.mulf %629, %629 : vector<14x32xf32>
    %cst_279 = arith.constant dense<0.000000e+00> : vector<14xf32>
    %631 = vector.multi_reduction <add>, %630, %cst_279 [1] : vector<14x32xf32> to vector<14xf32>
    %632 = vector.shape_cast %631 : vector<14xf32> to vector<14x1xf32>
    %cst_280 = arith.constant 3.200000e+01 : f32
    %633 = vector.broadcast %cst_280 : f32 to vector<14x1xf32>
    %634 = arith.divf %632, %633 : vector<14x1xf32>
    %cst_281 = arith.constant 9.99999974E-6 : f32
    %635 = vector.broadcast %cst_281 : f32 to vector<14x1xf32>
    %636 = arith.addf %634, %635 : vector<14x1xf32>
    %637 = math.rsqrt %636 : vector<14x1xf32>
    %638 = vector.broadcast %637 : vector<14x1xf32> to vector<14x32xf32>
    %639 = arith.mulf %629, %638 : vector<14x32xf32>
    %640 = vector.broadcast %612 : vector<1x32xf32> to vector<14x32xf32>
    %641 = arith.mulf %639, %640 : vector<14x32xf32>
    %642 = vector.broadcast %614 : vector<1x32xf32> to vector<14x32xf32>
    %643 = arith.addf %641, %642 : vector<14x32xf32>
    %644 = vector.broadcast %4 : vector<14x1xf32> to vector<14x32xf32>
    %645 = arith.mulf %643, %644 : vector<14x32xf32>
    %c1_282 = arith.constant 1 : index
    %c0_283 = arith.constant 0 : index
    %c0_284 = arith.constant 0 : index
    %646 = vector.load %arg19[%c1_282, %c0_283, %c0_284] : memref<2x32x96xf32, #tpu.memory_space<vmem>>, vector<1x32x96xf32>
    %647 = vector.shape_cast %646 : vector<1x32x96xf32> to vector<32x96xf32>
    %c1_285 = arith.constant 1 : index
    %c0_286 = arith.constant 0 : index
    %c0_287 = arith.constant 0 : index
    %648 = vector.load %arg20[%c1_285, %c0_286, %c0_287] : memref<2x1x96xf32, #tpu.memory_space<vmem>>, vector<1x1x96xf32>
    %649 = vector.shape_cast %648 : vector<1x1x96xf32> to vector<1x96xf32>
    %c1_288 = arith.constant 1 : index
    %c0_289 = arith.constant 0 : index
    %c0_290 = arith.constant 0 : index
    %650 = vector.load %arg21[%c1_288, %c0_289, %c0_290] : memref<2x32x32xf32, #tpu.memory_space<vmem>>, vector<1x32x32xf32>
    %651 = vector.shape_cast %650 : vector<1x32x32xf32> to vector<32x32xf32>
    %c1_291 = arith.constant 1 : index
    %c0_292 = arith.constant 0 : index
    %c0_293 = arith.constant 0 : index
    %652 = vector.load %arg22[%c1_291, %c0_292, %c0_293] : memref<2x1x32xf32, #tpu.memory_space<vmem>>, vector<1x1x32xf32>
    %653 = vector.shape_cast %652 : vector<1x1x32xf32> to vector<1x32xf32>
    %c1_294 = arith.constant 1 : index
    %c0_295 = arith.constant 0 : index
    %c0_296 = arith.constant 0 : index
    %654 = vector.load %arg23[%c1_294, %c0_295, %c0_296] : memref<2x1x32xf32, #tpu.memory_space<vmem>>, vector<1x1x32xf32>
    %655 = vector.shape_cast %654 : vector<1x1x32xf32> to vector<1x32xf32>
    %c1_297 = arith.constant 1 : index
    %c0_298 = arith.constant 0 : index
    %c0_299 = arith.constant 0 : index
    %656 = vector.load %arg24[%c1_297, %c0_298, %c0_299] : memref<2x1x32xf32, #tpu.memory_space<vmem>>, vector<1x1x32xf32>
    %657 = vector.shape_cast %656 : vector<1x1x32xf32> to vector<1x32xf32>
    %cst_300 = arith.constant dense<0.000000e+00> : vector<14x96xf32>
    %658 = tpu.matmul %645, %647, %cst_300 {dimension_numbers = #tpu.dot_dimension_numbers<[1], [0], [0], [1], [0, 0, 1, 1], [], []>} : vector<14x32xf32>, vector<32x96xf32>, vector<14x96xf32> -> vector<14x96xf32>
    %659 = vector.broadcast %649 : vector<1x96xf32> to vector<14x96xf32>
    %660 = arith.addf %658, %659 : vector<14x96xf32>
    %661 = vector.extract_strided_slice %660 {offsets = [0, 0], sizes = [14, 32], strides = [1, 1]} : vector<14x96xf32> to vector<14x32xf32>
    %662 = vector.extract_strided_slice %660 {offsets = [0, 32], sizes = [14, 32], strides = [1, 1]} : vector<14x96xf32> to vector<14x32xf32>
    %663 = vector.extract_strided_slice %660 {offsets = [0, 64], sizes = [14, 32], strides = [1, 1]} : vector<14x96xf32> to vector<14x32xf32>
    %664 = vector.extract_strided_slice %661 {offsets = [0, 0], sizes = [14, 8], strides = [1, 1]} : vector<14x32xf32> to vector<14x8xf32>
    %665 = vector.extract_strided_slice %662 {offsets = [0, 0], sizes = [14, 8], strides = [1, 1]} : vector<14x32xf32> to vector<14x8xf32>
    %666 = vector.extract_strided_slice %663 {offsets = [0, 0], sizes = [14, 8], strides = [1, 1]} : vector<14x32xf32> to vector<14x8xf32>
    %cst_301 = arith.constant dense<0.000000e+00> : vector<14x14xf32>
    %667 = tpu.matmul %664, %665, %cst_301 {dimension_numbers = #tpu.dot_dimension_numbers<[1], [1], [0], [0], [0, 0, 1, 0], [], []>} : vector<14x8xf32>, vector<14x8xf32>, vector<14x14xf32> -> vector<14x14xf32>
    %cst_302 = arith.constant 0.353553385 : f32
    %668 = vector.broadcast %cst_302 : f32 to vector<14x14xf32>
    %669 = arith.mulf %667, %668 : vector<14x14xf32>
    %670 = arith.addf %669, %1 : vector<14x14xf32>
    %cst_303 = arith.constant dense<0xFF800000> : vector<14xf32>
    %671 = vector.multi_reduction <maximumf>, %670, %cst_303 [1] : vector<14x14xf32> to vector<14xf32>
    %672 = vector.shape_cast %671 : vector<14xf32> to vector<14x1xf32>
    %673 = vector.broadcast %672 : vector<14x1xf32> to vector<14x14xf32>
    %674 = arith.subf %670, %673 : vector<14x14xf32>
    %675 = math.exp %674 : vector<14x14xf32>
    %cst_304 = arith.constant dense<0.000000e+00> : vector<14xf32>
    %676 = vector.multi_reduction <add>, %675, %cst_304 [1] : vector<14x14xf32> to vector<14xf32>
    %677 = vector.shape_cast %676 : vector<14xf32> to vector<14x1xf32>
    %678 = tpu.reciprocal %677 {approx = true} : vector<14x1xf32> -> vector<14x1xf32>
    %679 = vector.broadcast %678 : vector<14x1xf32> to vector<14x14xf32>
    %680 = arith.mulf %675, %679 : vector<14x14xf32>
    %cst_305 = arith.constant dense<0.000000e+00> : vector<14x8xf32>
    %681 = tpu.matmul %680, %666, %cst_305 {dimension_numbers = #tpu.dot_dimension_numbers<[1], [0], [0], [1], [0, 0, 1, 1], [], []>} : vector<14x14xf32>, vector<14x8xf32>, vector<14x8xf32> -> vector<14x8xf32>
    %682 = vector.extract_strided_slice %651 {offsets = [0, 0], sizes = [8, 32], strides = [1, 1]} : vector<32x32xf32> to vector<8x32xf32>
    %cst_306 = arith.constant dense<0.000000e+00> : vector<14x32xf32>
    %683 = tpu.matmul %681, %682, %cst_306 {dimension_numbers = #tpu.dot_dimension_numbers<[1], [0], [0], [1], [0, 0, 1, 1], [], []>} : vector<14x8xf32>, vector<8x32xf32>, vector<14x32xf32> -> vector<14x32xf32>
    %684 = vector.extract_strided_slice %661 {offsets = [0, 8], sizes = [14, 8], strides = [1, 1]} : vector<14x32xf32> to vector<14x8xf32>
    %685 = vector.extract_strided_slice %662 {offsets = [0, 8], sizes = [14, 8], strides = [1, 1]} : vector<14x32xf32> to vector<14x8xf32>
    %686 = vector.extract_strided_slice %663 {offsets = [0, 8], sizes = [14, 8], strides = [1, 1]} : vector<14x32xf32> to vector<14x8xf32>
    %cst_307 = arith.constant dense<0.000000e+00> : vector<14x14xf32>
    %687 = tpu.matmul %684, %685, %cst_307 {dimension_numbers = #tpu.dot_dimension_numbers<[1], [1], [0], [0], [0, 0, 1, 0], [], []>} : vector<14x8xf32>, vector<14x8xf32>, vector<14x14xf32> -> vector<14x14xf32>
    %cst_308 = arith.constant 0.353553385 : f32
    %688 = vector.broadcast %cst_308 : f32 to vector<14x14xf32>
    %689 = arith.mulf %687, %688 : vector<14x14xf32>
    %690 = arith.addf %689, %1 : vector<14x14xf32>
    %cst_309 = arith.constant dense<0xFF800000> : vector<14xf32>
    %691 = vector.multi_reduction <maximumf>, %690, %cst_309 [1] : vector<14x14xf32> to vector<14xf32>
    %692 = vector.shape_cast %691 : vector<14xf32> to vector<14x1xf32>
    %693 = vector.broadcast %692 : vector<14x1xf32> to vector<14x14xf32>
    %694 = arith.subf %690, %693 : vector<14x14xf32>
    %695 = math.exp %694 : vector<14x14xf32>
    %cst_310 = arith.constant dense<0.000000e+00> : vector<14xf32>
    %696 = vector.multi_reduction <add>, %695, %cst_310 [1] : vector<14x14xf32> to vector<14xf32>
    %697 = vector.shape_cast %696 : vector<14xf32> to vector<14x1xf32>
    %698 = tpu.reciprocal %697 {approx = true} : vector<14x1xf32> -> vector<14x1xf32>
    %699 = vector.broadcast %698 : vector<14x1xf32> to vector<14x14xf32>
    %700 = arith.mulf %695, %699 : vector<14x14xf32>
    %cst_311 = arith.constant dense<0.000000e+00> : vector<14x8xf32>
    %701 = tpu.matmul %700, %686, %cst_311 {dimension_numbers = #tpu.dot_dimension_numbers<[1], [0], [0], [1], [0, 0, 1, 1], [], []>} : vector<14x14xf32>, vector<14x8xf32>, vector<14x8xf32> -> vector<14x8xf32>
    %702 = vector.extract_strided_slice %651 {offsets = [8, 0], sizes = [8, 32], strides = [1, 1]} : vector<32x32xf32> to vector<8x32xf32>
    %cst_312 = arith.constant dense<0.000000e+00> : vector<14x32xf32>
    %703 = tpu.matmul %701, %702, %cst_312 {dimension_numbers = #tpu.dot_dimension_numbers<[1], [0], [0], [1], [0, 0, 1, 1], [], []>} : vector<14x8xf32>, vector<8x32xf32>, vector<14x32xf32> -> vector<14x32xf32>
    %704 = arith.addf %683, %703 : vector<14x32xf32>
    %705 = vector.extract_strided_slice %661 {offsets = [0, 16], sizes = [14, 8], strides = [1, 1]} : vector<14x32xf32> to vector<14x8xf32>
    %706 = vector.extract_strided_slice %662 {offsets = [0, 16], sizes = [14, 8], strides = [1, 1]} : vector<14x32xf32> to vector<14x8xf32>
    %707 = vector.extract_strided_slice %663 {offsets = [0, 16], sizes = [14, 8], strides = [1, 1]} : vector<14x32xf32> to vector<14x8xf32>
    %cst_313 = arith.constant dense<0.000000e+00> : vector<14x14xf32>
    %708 = tpu.matmul %705, %706, %cst_313 {dimension_numbers = #tpu.dot_dimension_numbers<[1], [1], [0], [0], [0, 0, 1, 0], [], []>} : vector<14x8xf32>, vector<14x8xf32>, vector<14x14xf32> -> vector<14x14xf32>
    %cst_314 = arith.constant 0.353553385 : f32
    %709 = vector.broadcast %cst_314 : f32 to vector<14x14xf32>
    %710 = arith.mulf %708, %709 : vector<14x14xf32>
    %711 = arith.addf %710, %1 : vector<14x14xf32>
    %cst_315 = arith.constant dense<0xFF800000> : vector<14xf32>
    %712 = vector.multi_reduction <maximumf>, %711, %cst_315 [1] : vector<14x14xf32> to vector<14xf32>
    %713 = vector.shape_cast %712 : vector<14xf32> to vector<14x1xf32>
    %714 = vector.broadcast %713 : vector<14x1xf32> to vector<14x14xf32>
    %715 = arith.subf %711, %714 : vector<14x14xf32>
    %716 = math.exp %715 : vector<14x14xf32>
    %cst_316 = arith.constant dense<0.000000e+00> : vector<14xf32>
    %717 = vector.multi_reduction <add>, %716, %cst_316 [1] : vector<14x14xf32> to vector<14xf32>
    %718 = vector.shape_cast %717 : vector<14xf32> to vector<14x1xf32>
    %719 = tpu.reciprocal %718 {approx = true} : vector<14x1xf32> -> vector<14x1xf32>
    %720 = vector.broadcast %719 : vector<14x1xf32> to vector<14x14xf32>
    %721 = arith.mulf %716, %720 : vector<14x14xf32>
    %cst_317 = arith.constant dense<0.000000e+00> : vector<14x8xf32>
    %722 = tpu.matmul %721, %707, %cst_317 {dimension_numbers = #tpu.dot_dimension_numbers<[1], [0], [0], [1], [0, 0, 1, 1], [], []>} : vector<14x14xf32>, vector<14x8xf32>, vector<14x8xf32> -> vector<14x8xf32>
    %723 = vector.extract_strided_slice %651 {offsets = [16, 0], sizes = [8, 32], strides = [1, 1]} : vector<32x32xf32> to vector<8x32xf32>
    %cst_318 = arith.constant dense<0.000000e+00> : vector<14x32xf32>
    %724 = tpu.matmul %722, %723, %cst_318 {dimension_numbers = #tpu.dot_dimension_numbers<[1], [0], [0], [1], [0, 0, 1, 1], [], []>} : vector<14x8xf32>, vector<8x32xf32>, vector<14x32xf32> -> vector<14x32xf32>
    %725 = arith.addf %704, %724 : vector<14x32xf32>
    %726 = vector.extract_strided_slice %661 {offsets = [0, 24], sizes = [14, 8], strides = [1, 1]} : vector<14x32xf32> to vector<14x8xf32>
    %727 = vector.extract_strided_slice %662 {offsets = [0, 24], sizes = [14, 8], strides = [1, 1]} : vector<14x32xf32> to vector<14x8xf32>
    %728 = vector.extract_strided_slice %663 {offsets = [0, 24], sizes = [14, 8], strides = [1, 1]} : vector<14x32xf32> to vector<14x8xf32>
    %cst_319 = arith.constant dense<0.000000e+00> : vector<14x14xf32>
    %729 = tpu.matmul %726, %727, %cst_319 {dimension_numbers = #tpu.dot_dimension_numbers<[1], [1], [0], [0], [0, 0, 1, 0], [], []>} : vector<14x8xf32>, vector<14x8xf32>, vector<14x14xf32> -> vector<14x14xf32>
    %cst_320 = arith.constant 0.353553385 : f32
    %730 = vector.broadcast %cst_320 : f32 to vector<14x14xf32>
    %731 = arith.mulf %729, %730 : vector<14x14xf32>
    %732 = arith.addf %731, %1 : vector<14x14xf32>
    %cst_321 = arith.constant dense<0xFF800000> : vector<14xf32>
    %733 = vector.multi_reduction <maximumf>, %732, %cst_321 [1] : vector<14x14xf32> to vector<14xf32>
    %734 = vector.shape_cast %733 : vector<14xf32> to vector<14x1xf32>
    %735 = vector.broadcast %734 : vector<14x1xf32> to vector<14x14xf32>
    %736 = arith.subf %732, %735 : vector<14x14xf32>
    %737 = math.exp %736 : vector<14x14xf32>
    %cst_322 = arith.constant dense<0.000000e+00> : vector<14xf32>
    %738 = vector.multi_reduction <add>, %737, %cst_322 [1] : vector<14x14xf32> to vector<14xf32>
    %739 = vector.shape_cast %738 : vector<14xf32> to vector<14x1xf32>
    %740 = tpu.reciprocal %739 {approx = true} : vector<14x1xf32> -> vector<14x1xf32>
    %741 = vector.broadcast %740 : vector<14x1xf32> to vector<14x14xf32>
    %742 = arith.mulf %737, %741 : vector<14x14xf32>
    %cst_323 = arith.constant dense<0.000000e+00> : vector<14x8xf32>
    %743 = tpu.matmul %742, %728, %cst_323 {dimension_numbers = #tpu.dot_dimension_numbers<[1], [0], [0], [1], [0, 0, 1, 1], [], []>} : vector<14x14xf32>, vector<14x8xf32>, vector<14x8xf32> -> vector<14x8xf32>
    %744 = vector.extract_strided_slice %651 {offsets = [24, 0], sizes = [8, 32], strides = [1, 1]} : vector<32x32xf32> to vector<8x32xf32>
    %cst_324 = arith.constant dense<0.000000e+00> : vector<14x32xf32>
    %745 = tpu.matmul %743, %744, %cst_324 {dimension_numbers = #tpu.dot_dimension_numbers<[1], [0], [0], [1], [0, 0, 1, 1], [], []>} : vector<14x8xf32>, vector<8x32xf32>, vector<14x32xf32> -> vector<14x32xf32>
    %746 = arith.addf %725, %745 : vector<14x32xf32>
    %747 = vector.broadcast %653 : vector<1x32xf32> to vector<14x32xf32>
    %748 = arith.addf %746, %747 : vector<14x32xf32>
    %749 = arith.addf %748, %645 : vector<14x32xf32>
    %cst_325 = arith.constant dense<0.000000e+00> : vector<14xf32>
    %750 = vector.multi_reduction <add>, %749, %cst_325 [1] : vector<14x32xf32> to vector<14xf32>
    %751 = vector.shape_cast %750 : vector<14xf32> to vector<14x1xf32>
    %cst_326 = arith.constant 3.200000e+01 : f32
    %752 = vector.broadcast %cst_326 : f32 to vector<14x1xf32>
    %753 = arith.divf %751, %752 : vector<14x1xf32>
    %754 = vector.broadcast %753 : vector<14x1xf32> to vector<14x32xf32>
    %755 = arith.subf %749, %754 : vector<14x32xf32>
    %756 = arith.mulf %755, %755 : vector<14x32xf32>
    %cst_327 = arith.constant dense<0.000000e+00> : vector<14xf32>
    %757 = vector.multi_reduction <add>, %756, %cst_327 [1] : vector<14x32xf32> to vector<14xf32>
    %758 = vector.shape_cast %757 : vector<14xf32> to vector<14x1xf32>
    %cst_328 = arith.constant 3.200000e+01 : f32
    %759 = vector.broadcast %cst_328 : f32 to vector<14x1xf32>
    %760 = arith.divf %758, %759 : vector<14x1xf32>
    %cst_329 = arith.constant 9.99999974E-6 : f32
    %761 = vector.broadcast %cst_329 : f32 to vector<14x1xf32>
    %762 = arith.addf %760, %761 : vector<14x1xf32>
    %763 = math.rsqrt %762 : vector<14x1xf32>
    %764 = vector.broadcast %763 : vector<14x1xf32> to vector<14x32xf32>
    %765 = arith.mulf %755, %764 : vector<14x32xf32>
    %766 = vector.broadcast %655 : vector<1x32xf32> to vector<14x32xf32>
    %767 = arith.mulf %765, %766 : vector<14x32xf32>
    %768 = vector.broadcast %657 : vector<1x32xf32> to vector<14x32xf32>
    %769 = arith.addf %767, %768 : vector<14x32xf32>
    %770 = vector.broadcast %4 : vector<14x1xf32> to vector<14x32xf32>
    %771 = arith.mulf %769, %770 : vector<14x32xf32>
    %c1_330 = arith.constant 1 : index
    %c0_331 = arith.constant 0 : index
    %c0_332 = arith.constant 0 : index
    %772 = vector.load %arg25[%c1_330, %c0_331, %c0_332] : memref<2x32x96xf32, #tpu.memory_space<vmem>>, vector<1x32x96xf32>
    %773 = vector.shape_cast %772 : vector<1x32x96xf32> to vector<32x96xf32>
    %c1_333 = arith.constant 1 : index
    %c0_334 = arith.constant 0 : index
    %c0_335 = arith.constant 0 : index
    %774 = vector.load %arg26[%c1_333, %c0_334, %c0_335] : memref<2x1x96xf32, #tpu.memory_space<vmem>>, vector<1x1x96xf32>
    %775 = vector.shape_cast %774 : vector<1x1x96xf32> to vector<1x96xf32>
    %c1_336 = arith.constant 1 : index
    %c0_337 = arith.constant 0 : index
    %c0_338 = arith.constant 0 : index
    %776 = vector.load %arg27[%c1_336, %c0_337, %c0_338] : memref<2x32x32xf32, #tpu.memory_space<vmem>>, vector<1x32x32xf32>
    %777 = vector.shape_cast %776 : vector<1x32x32xf32> to vector<32x32xf32>
    %c1_339 = arith.constant 1 : index
    %c0_340 = arith.constant 0 : index
    %c0_341 = arith.constant 0 : index
    %778 = vector.load %arg28[%c1_339, %c0_340, %c0_341] : memref<2x1x32xf32, #tpu.memory_space<vmem>>, vector<1x1x32xf32>
    %779 = vector.shape_cast %778 : vector<1x1x32xf32> to vector<1x32xf32>
    %c1_342 = arith.constant 1 : index
    %c0_343 = arith.constant 0 : index
    %c0_344 = arith.constant 0 : index
    %780 = vector.load %arg29[%c1_342, %c0_343, %c0_344] : memref<2x1x32xf32, #tpu.memory_space<vmem>>, vector<1x1x32xf32>
    %781 = vector.shape_cast %780 : vector<1x1x32xf32> to vector<1x32xf32>
    %c1_345 = arith.constant 1 : index
    %c0_346 = arith.constant 0 : index
    %c0_347 = arith.constant 0 : index
    %782 = vector.load %arg30[%c1_345, %c0_346, %c0_347] : memref<2x1x32xf32, #tpu.memory_space<vmem>>, vector<1x1x32xf32>
    %783 = vector.shape_cast %782 : vector<1x1x32xf32> to vector<1x32xf32>
    %784 = vector.extract_strided_slice %773 {offsets = [0, 0], sizes = [32, 32], strides = [1, 1]} : vector<32x96xf32> to vector<32x32xf32>
    %cst_348 = arith.constant dense<0.000000e+00> : vector<14x32xf32>
    %785 = tpu.matmul %771, %784, %cst_348 {dimension_numbers = #tpu.dot_dimension_numbers<[1], [0], [0], [1], [0, 0, 1, 1], [], []>} : vector<14x32xf32>, vector<32x32xf32>, vector<14x32xf32> -> vector<14x32xf32>
    %786 = vector.extract_strided_slice %775 {offsets = [0, 0], sizes = [1, 32], strides = [1, 1]} : vector<1x96xf32> to vector<1x32xf32>
    %787 = vector.broadcast %786 : vector<1x32xf32> to vector<14x32xf32>
    %788 = arith.addf %785, %787 : vector<14x32xf32>
    %789 = vector.extract_strided_slice %773 {offsets = [0, 32], sizes = [32, 64], strides = [1, 1]} : vector<32x96xf32> to vector<32x64xf32>
    %cst_349 = arith.constant dense<0.000000e+00> : vector<16x64xf32>
    %790 = tpu.matmul %343, %789, %cst_349 {dimension_numbers = #tpu.dot_dimension_numbers<[1], [0], [0], [1], [0, 0, 1, 1], [], []>} : vector<16x32xf32>, vector<32x64xf32>, vector<16x64xf32> -> vector<16x64xf32>
    %791 = vector.extract_strided_slice %775 {offsets = [0, 32], sizes = [1, 64], strides = [1, 1]} : vector<1x96xf32> to vector<1x64xf32>
    %792 = vector.broadcast %791 : vector<1x64xf32> to vector<16x64xf32>
    %793 = arith.addf %790, %792 : vector<16x64xf32>
    %794 = vector.extract_strided_slice %793 {offsets = [0, 0], sizes = [16, 32], strides = [1, 1]} : vector<16x64xf32> to vector<16x32xf32>
    %795 = vector.extract_strided_slice %793 {offsets = [0, 32], sizes = [16, 32], strides = [1, 1]} : vector<16x64xf32> to vector<16x32xf32>
    %796 = vector.extract_strided_slice %788 {offsets = [0, 0], sizes = [14, 8], strides = [1, 1]} : vector<14x32xf32> to vector<14x8xf32>
    %797 = vector.extract_strided_slice %794 {offsets = [0, 0], sizes = [16, 8], strides = [1, 1]} : vector<16x32xf32> to vector<16x8xf32>
    %798 = vector.extract_strided_slice %795 {offsets = [0, 0], sizes = [16, 8], strides = [1, 1]} : vector<16x32xf32> to vector<16x8xf32>
    %cst_350 = arith.constant dense<0.000000e+00> : vector<14x16xf32>
    %799 = tpu.matmul %796, %797, %cst_350 {dimension_numbers = #tpu.dot_dimension_numbers<[1], [1], [0], [0], [0, 0, 1, 0], [], []>} : vector<14x8xf32>, vector<16x8xf32>, vector<14x16xf32> -> vector<14x16xf32>
    %cst_351 = arith.constant 0.353553385 : f32
    %800 = vector.broadcast %cst_351 : f32 to vector<14x16xf32>
    %801 = arith.mulf %799, %800 : vector<14x16xf32>
    %802 = arith.addf %801, %2 : vector<14x16xf32>
    %cst_352 = arith.constant dense<0xFF800000> : vector<14xf32>
    %803 = vector.multi_reduction <maximumf>, %802, %cst_352 [1] : vector<14x16xf32> to vector<14xf32>
    %804 = vector.shape_cast %803 : vector<14xf32> to vector<14x1xf32>
    %805 = vector.broadcast %804 : vector<14x1xf32> to vector<14x16xf32>
    %806 = arith.subf %802, %805 : vector<14x16xf32>
    %807 = math.exp %806 : vector<14x16xf32>
    %cst_353 = arith.constant dense<0.000000e+00> : vector<14xf32>
    %808 = vector.multi_reduction <add>, %807, %cst_353 [1] : vector<14x16xf32> to vector<14xf32>
    %809 = vector.shape_cast %808 : vector<14xf32> to vector<14x1xf32>
    %810 = tpu.reciprocal %809 {approx = true} : vector<14x1xf32> -> vector<14x1xf32>
    %811 = vector.broadcast %810 : vector<14x1xf32> to vector<14x16xf32>
    %812 = arith.mulf %807, %811 : vector<14x16xf32>
    %cst_354 = arith.constant dense<0.000000e+00> : vector<14x8xf32>
    %813 = tpu.matmul %812, %798, %cst_354 {dimension_numbers = #tpu.dot_dimension_numbers<[1], [0], [0], [1], [0, 0, 1, 1], [], []>} : vector<14x16xf32>, vector<16x8xf32>, vector<14x8xf32> -> vector<14x8xf32>
    %814 = vector.extract_strided_slice %777 {offsets = [0, 0], sizes = [8, 32], strides = [1, 1]} : vector<32x32xf32> to vector<8x32xf32>
    %cst_355 = arith.constant dense<0.000000e+00> : vector<14x32xf32>
    %815 = tpu.matmul %813, %814, %cst_355 {dimension_numbers = #tpu.dot_dimension_numbers<[1], [0], [0], [1], [0, 0, 1, 1], [], []>} : vector<14x8xf32>, vector<8x32xf32>, vector<14x32xf32> -> vector<14x32xf32>
    %816 = vector.extract_strided_slice %788 {offsets = [0, 8], sizes = [14, 8], strides = [1, 1]} : vector<14x32xf32> to vector<14x8xf32>
    %817 = vector.extract_strided_slice %794 {offsets = [0, 8], sizes = [16, 8], strides = [1, 1]} : vector<16x32xf32> to vector<16x8xf32>
    %818 = vector.extract_strided_slice %795 {offsets = [0, 8], sizes = [16, 8], strides = [1, 1]} : vector<16x32xf32> to vector<16x8xf32>
    %cst_356 = arith.constant dense<0.000000e+00> : vector<14x16xf32>
    %819 = tpu.matmul %816, %817, %cst_356 {dimension_numbers = #tpu.dot_dimension_numbers<[1], [1], [0], [0], [0, 0, 1, 0], [], []>} : vector<14x8xf32>, vector<16x8xf32>, vector<14x16xf32> -> vector<14x16xf32>
    %cst_357 = arith.constant 0.353553385 : f32
    %820 = vector.broadcast %cst_357 : f32 to vector<14x16xf32>
    %821 = arith.mulf %819, %820 : vector<14x16xf32>
    %822 = arith.addf %821, %2 : vector<14x16xf32>
    %cst_358 = arith.constant dense<0xFF800000> : vector<14xf32>
    %823 = vector.multi_reduction <maximumf>, %822, %cst_358 [1] : vector<14x16xf32> to vector<14xf32>
    %824 = vector.shape_cast %823 : vector<14xf32> to vector<14x1xf32>
    %825 = vector.broadcast %824 : vector<14x1xf32> to vector<14x16xf32>
    %826 = arith.subf %822, %825 : vector<14x16xf32>
    %827 = math.exp %826 : vector<14x16xf32>
    %cst_359 = arith.constant dense<0.000000e+00> : vector<14xf32>
    %828 = vector.multi_reduction <add>, %827, %cst_359 [1] : vector<14x16xf32> to vector<14xf32>
    %829 = vector.shape_cast %828 : vector<14xf32> to vector<14x1xf32>
    %830 = tpu.reciprocal %829 {approx = true} : vector<14x1xf32> -> vector<14x1xf32>
    %831 = vector.broadcast %830 : vector<14x1xf32> to vector<14x16xf32>
    %832 = arith.mulf %827, %831 : vector<14x16xf32>
    %cst_360 = arith.constant dense<0.000000e+00> : vector<14x8xf32>
    %833 = tpu.matmul %832, %818, %cst_360 {dimension_numbers = #tpu.dot_dimension_numbers<[1], [0], [0], [1], [0, 0, 1, 1], [], []>} : vector<14x16xf32>, vector<16x8xf32>, vector<14x8xf32> -> vector<14x8xf32>
    %834 = vector.extract_strided_slice %777 {offsets = [8, 0], sizes = [8, 32], strides = [1, 1]} : vector<32x32xf32> to vector<8x32xf32>
    %cst_361 = arith.constant dense<0.000000e+00> : vector<14x32xf32>
    %835 = tpu.matmul %833, %834, %cst_361 {dimension_numbers = #tpu.dot_dimension_numbers<[1], [0], [0], [1], [0, 0, 1, 1], [], []>} : vector<14x8xf32>, vector<8x32xf32>, vector<14x32xf32> -> vector<14x32xf32>
    %836 = arith.addf %815, %835 : vector<14x32xf32>
    %837 = vector.extract_strided_slice %788 {offsets = [0, 16], sizes = [14, 8], strides = [1, 1]} : vector<14x32xf32> to vector<14x8xf32>
    %838 = vector.extract_strided_slice %794 {offsets = [0, 16], sizes = [16, 8], strides = [1, 1]} : vector<16x32xf32> to vector<16x8xf32>
    %839 = vector.extract_strided_slice %795 {offsets = [0, 16], sizes = [16, 8], strides = [1, 1]} : vector<16x32xf32> to vector<16x8xf32>
    %cst_362 = arith.constant dense<0.000000e+00> : vector<14x16xf32>
    %840 = tpu.matmul %837, %838, %cst_362 {dimension_numbers = #tpu.dot_dimension_numbers<[1], [1], [0], [0], [0, 0, 1, 0], [], []>} : vector<14x8xf32>, vector<16x8xf32>, vector<14x16xf32> -> vector<14x16xf32>
    %cst_363 = arith.constant 0.353553385 : f32
    %841 = vector.broadcast %cst_363 : f32 to vector<14x16xf32>
    %842 = arith.mulf %840, %841 : vector<14x16xf32>
    %843 = arith.addf %842, %2 : vector<14x16xf32>
    %cst_364 = arith.constant dense<0xFF800000> : vector<14xf32>
    %844 = vector.multi_reduction <maximumf>, %843, %cst_364 [1] : vector<14x16xf32> to vector<14xf32>
    %845 = vector.shape_cast %844 : vector<14xf32> to vector<14x1xf32>
    %846 = vector.broadcast %845 : vector<14x1xf32> to vector<14x16xf32>
    %847 = arith.subf %843, %846 : vector<14x16xf32>
    %848 = math.exp %847 : vector<14x16xf32>
    %cst_365 = arith.constant dense<0.000000e+00> : vector<14xf32>
    %849 = vector.multi_reduction <add>, %848, %cst_365 [1] : vector<14x16xf32> to vector<14xf32>
    %850 = vector.shape_cast %849 : vector<14xf32> to vector<14x1xf32>
    %851 = tpu.reciprocal %850 {approx = true} : vector<14x1xf32> -> vector<14x1xf32>
    %852 = vector.broadcast %851 : vector<14x1xf32> to vector<14x16xf32>
    %853 = arith.mulf %848, %852 : vector<14x16xf32>
    %cst_366 = arith.constant dense<0.000000e+00> : vector<14x8xf32>
    %854 = tpu.matmul %853, %839, %cst_366 {dimension_numbers = #tpu.dot_dimension_numbers<[1], [0], [0], [1], [0, 0, 1, 1], [], []>} : vector<14x16xf32>, vector<16x8xf32>, vector<14x8xf32> -> vector<14x8xf32>
    %855 = vector.extract_strided_slice %777 {offsets = [16, 0], sizes = [8, 32], strides = [1, 1]} : vector<32x32xf32> to vector<8x32xf32>
    %cst_367 = arith.constant dense<0.000000e+00> : vector<14x32xf32>
    %856 = tpu.matmul %854, %855, %cst_367 {dimension_numbers = #tpu.dot_dimension_numbers<[1], [0], [0], [1], [0, 0, 1, 1], [], []>} : vector<14x8xf32>, vector<8x32xf32>, vector<14x32xf32> -> vector<14x32xf32>
    %857 = arith.addf %836, %856 : vector<14x32xf32>
    %858 = vector.extract_strided_slice %788 {offsets = [0, 24], sizes = [14, 8], strides = [1, 1]} : vector<14x32xf32> to vector<14x8xf32>
    %859 = vector.extract_strided_slice %794 {offsets = [0, 24], sizes = [16, 8], strides = [1, 1]} : vector<16x32xf32> to vector<16x8xf32>
    %860 = vector.extract_strided_slice %795 {offsets = [0, 24], sizes = [16, 8], strides = [1, 1]} : vector<16x32xf32> to vector<16x8xf32>
    %cst_368 = arith.constant dense<0.000000e+00> : vector<14x16xf32>
    %861 = tpu.matmul %858, %859, %cst_368 {dimension_numbers = #tpu.dot_dimension_numbers<[1], [1], [0], [0], [0, 0, 1, 0], [], []>} : vector<14x8xf32>, vector<16x8xf32>, vector<14x16xf32> -> vector<14x16xf32>
    %cst_369 = arith.constant 0.353553385 : f32
    %862 = vector.broadcast %cst_369 : f32 to vector<14x16xf32>
    %863 = arith.mulf %861, %862 : vector<14x16xf32>
    %864 = arith.addf %863, %2 : vector<14x16xf32>
    %cst_370 = arith.constant dense<0xFF800000> : vector<14xf32>
    %865 = vector.multi_reduction <maximumf>, %864, %cst_370 [1] : vector<14x16xf32> to vector<14xf32>
    %866 = vector.shape_cast %865 : vector<14xf32> to vector<14x1xf32>
    %867 = vector.broadcast %866 : vector<14x1xf32> to vector<14x16xf32>
    %868 = arith.subf %864, %867 : vector<14x16xf32>
    %869 = math.exp %868 : vector<14x16xf32>
    %cst_371 = arith.constant dense<0.000000e+00> : vector<14xf32>
    %870 = vector.multi_reduction <add>, %869, %cst_371 [1] : vector<14x16xf32> to vector<14xf32>
    %871 = vector.shape_cast %870 : vector<14xf32> to vector<14x1xf32>
    %872 = tpu.reciprocal %871 {approx = true} : vector<14x1xf32> -> vector<14x1xf32>
    %873 = vector.broadcast %872 : vector<14x1xf32> to vector<14x16xf32>
    %874 = arith.mulf %869, %873 : vector<14x16xf32>
    %cst_372 = arith.constant dense<0.000000e+00> : vector<14x8xf32>
    %875 = tpu.matmul %874, %860, %cst_372 {dimension_numbers = #tpu.dot_dimension_numbers<[1], [0], [0], [1], [0, 0, 1, 1], [], []>} : vector<14x16xf32>, vector<16x8xf32>, vector<14x8xf32> -> vector<14x8xf32>
    %876 = vector.extract_strided_slice %777 {offsets = [24, 0], sizes = [8, 32], strides = [1, 1]} : vector<32x32xf32> to vector<8x32xf32>
    %cst_373 = arith.constant dense<0.000000e+00> : vector<14x32xf32>
    %877 = tpu.matmul %875, %876, %cst_373 {dimension_numbers = #tpu.dot_dimension_numbers<[1], [0], [0], [1], [0, 0, 1, 1], [], []>} : vector<14x8xf32>, vector<8x32xf32>, vector<14x32xf32> -> vector<14x32xf32>
    %878 = arith.addf %857, %877 : vector<14x32xf32>
    %879 = vector.broadcast %779 : vector<1x32xf32> to vector<14x32xf32>
    %880 = arith.addf %878, %879 : vector<14x32xf32>
    %881 = arith.addf %880, %771 : vector<14x32xf32>
    %cst_374 = arith.constant dense<0.000000e+00> : vector<14xf32>
    %882 = vector.multi_reduction <add>, %881, %cst_374 [1] : vector<14x32xf32> to vector<14xf32>
    %883 = vector.shape_cast %882 : vector<14xf32> to vector<14x1xf32>
    %cst_375 = arith.constant 3.200000e+01 : f32
    %884 = vector.broadcast %cst_375 : f32 to vector<14x1xf32>
    %885 = arith.divf %883, %884 : vector<14x1xf32>
    %886 = vector.broadcast %885 : vector<14x1xf32> to vector<14x32xf32>
    %887 = arith.subf %881, %886 : vector<14x32xf32>
    %888 = arith.mulf %887, %887 : vector<14x32xf32>
    %cst_376 = arith.constant dense<0.000000e+00> : vector<14xf32>
    %889 = vector.multi_reduction <add>, %888, %cst_376 [1] : vector<14x32xf32> to vector<14xf32>
    %890 = vector.shape_cast %889 : vector<14xf32> to vector<14x1xf32>
    %cst_377 = arith.constant 3.200000e+01 : f32
    %891 = vector.broadcast %cst_377 : f32 to vector<14x1xf32>
    %892 = arith.divf %890, %891 : vector<14x1xf32>
    %cst_378 = arith.constant 9.99999974E-6 : f32
    %893 = vector.broadcast %cst_378 : f32 to vector<14x1xf32>
    %894 = arith.addf %892, %893 : vector<14x1xf32>
    %895 = math.rsqrt %894 : vector<14x1xf32>
    %896 = vector.broadcast %895 : vector<14x1xf32> to vector<14x32xf32>
    %897 = arith.mulf %887, %896 : vector<14x32xf32>
    %898 = vector.broadcast %781 : vector<1x32xf32> to vector<14x32xf32>
    %899 = arith.mulf %897, %898 : vector<14x32xf32>
    %900 = vector.broadcast %783 : vector<1x32xf32> to vector<14x32xf32>
    %901 = arith.addf %899, %900 : vector<14x32xf32>
    %902 = vector.broadcast %4 : vector<14x1xf32> to vector<14x32xf32>
    %903 = arith.mulf %901, %902 : vector<14x32xf32>
    %c1_379 = arith.constant 1 : index
    %c0_380 = arith.constant 0 : index
    %c0_381 = arith.constant 0 : index
    %904 = vector.load %arg31[%c1_379, %c0_380, %c0_381] : memref<2x32x64xf32, #tpu.memory_space<vmem>>, vector<1x32x64xf32>
    %905 = vector.shape_cast %904 : vector<1x32x64xf32> to vector<32x64xf32>
    %c1_382 = arith.constant 1 : index
    %c0_383 = arith.constant 0 : index
    %c0_384 = arith.constant 0 : index
    %906 = vector.load %arg32[%c1_382, %c0_383, %c0_384] : memref<2x1x64xf32, #tpu.memory_space<vmem>>, vector<1x1x64xf32>
    %907 = vector.shape_cast %906 : vector<1x1x64xf32> to vector<1x64xf32>
    %c1_385 = arith.constant 1 : index
    %c0_386 = arith.constant 0 : index
    %c0_387 = arith.constant 0 : index
    %908 = vector.load %arg33[%c1_385, %c0_386, %c0_387] : memref<2x64x32xf32, #tpu.memory_space<vmem>>, vector<1x64x32xf32>
    %909 = vector.shape_cast %908 : vector<1x64x32xf32> to vector<64x32xf32>
    %c1_388 = arith.constant 1 : index
    %c0_389 = arith.constant 0 : index
    %c0_390 = arith.constant 0 : index
    %910 = vector.load %arg34[%c1_388, %c0_389, %c0_390] : memref<2x1x32xf32, #tpu.memory_space<vmem>>, vector<1x1x32xf32>
    %911 = vector.shape_cast %910 : vector<1x1x32xf32> to vector<1x32xf32>
    %c1_391 = arith.constant 1 : index
    %c0_392 = arith.constant 0 : index
    %c0_393 = arith.constant 0 : index
    %912 = vector.load %arg35[%c1_391, %c0_392, %c0_393] : memref<2x1x32xf32, #tpu.memory_space<vmem>>, vector<1x1x32xf32>
    %913 = vector.shape_cast %912 : vector<1x1x32xf32> to vector<1x32xf32>
    %c1_394 = arith.constant 1 : index
    %c0_395 = arith.constant 0 : index
    %c0_396 = arith.constant 0 : index
    %914 = vector.load %arg36[%c1_394, %c0_395, %c0_396] : memref<2x1x32xf32, #tpu.memory_space<vmem>>, vector<1x1x32xf32>
    %915 = vector.shape_cast %914 : vector<1x1x32xf32> to vector<1x32xf32>
    %cst_397 = arith.constant dense<0.000000e+00> : vector<14x64xf32>
    %916 = tpu.matmul %903, %905, %cst_397 {dimension_numbers = #tpu.dot_dimension_numbers<[1], [0], [0], [1], [0, 0, 1, 1], [], []>} : vector<14x32xf32>, vector<32x64xf32>, vector<14x64xf32> -> vector<14x64xf32>
    %917 = vector.broadcast %907 : vector<1x64xf32> to vector<14x64xf32>
    %918 = arith.addf %916, %917 : vector<14x64xf32>
    %cst_398 = arith.constant 0.000000e+00 : f32
    %919 = vector.broadcast %cst_398 : f32 to vector<14x64xf32>
    %920 = arith.maximumf %918, %919 : vector<14x64xf32>
    %cst_399 = arith.constant dense<0.000000e+00> : vector<14x32xf32>
    %921 = tpu.matmul %920, %909, %cst_399 {dimension_numbers = #tpu.dot_dimension_numbers<[1], [0], [0], [1], [0, 0, 1, 1], [], []>} : vector<14x64xf32>, vector<64x32xf32>, vector<14x32xf32> -> vector<14x32xf32>
    %922 = vector.broadcast %911 : vector<1x32xf32> to vector<14x32xf32>
    %923 = arith.addf %921, %922 : vector<14x32xf32>
    %924 = arith.addf %923, %903 : vector<14x32xf32>
    %cst_400 = arith.constant dense<0.000000e+00> : vector<14xf32>
    %925 = vector.multi_reduction <add>, %924, %cst_400 [1] : vector<14x32xf32> to vector<14xf32>
    %926 = vector.shape_cast %925 : vector<14xf32> to vector<14x1xf32>
    %cst_401 = arith.constant 3.200000e+01 : f32
    %927 = vector.broadcast %cst_401 : f32 to vector<14x1xf32>
    %928 = arith.divf %926, %927 : vector<14x1xf32>
    %929 = vector.broadcast %928 : vector<14x1xf32> to vector<14x32xf32>
    %930 = arith.subf %924, %929 : vector<14x32xf32>
    %931 = arith.mulf %930, %930 : vector<14x32xf32>
    %cst_402 = arith.constant dense<0.000000e+00> : vector<14xf32>
    %932 = vector.multi_reduction <add>, %931, %cst_402 [1] : vector<14x32xf32> to vector<14xf32>
    %933 = vector.shape_cast %932 : vector<14xf32> to vector<14x1xf32>
    %cst_403 = arith.constant 3.200000e+01 : f32
    %934 = vector.broadcast %cst_403 : f32 to vector<14x1xf32>
    %935 = arith.divf %933, %934 : vector<14x1xf32>
    %cst_404 = arith.constant 9.99999974E-6 : f32
    %936 = vector.broadcast %cst_404 : f32 to vector<14x1xf32>
    %937 = arith.addf %935, %936 : vector<14x1xf32>
    %938 = math.rsqrt %937 : vector<14x1xf32>
    %939 = vector.broadcast %938 : vector<14x1xf32> to vector<14x32xf32>
    %940 = arith.mulf %930, %939 : vector<14x32xf32>
    %941 = vector.broadcast %913 : vector<1x32xf32> to vector<14x32xf32>
    %942 = arith.mulf %940, %941 : vector<14x32xf32>
    %943 = vector.broadcast %915 : vector<1x32xf32> to vector<14x32xf32>
    %944 = arith.addf %942, %943 : vector<14x32xf32>
    %945 = vector.broadcast %4 : vector<14x1xf32> to vector<14x32xf32>
    %946 = arith.mulf %944, %945 : vector<14x32xf32>
    %c0_405 = arith.constant 0 : index
    %c0_406 = arith.constant 0 : index
    %947 = vector.load %arg37[%c0_405, %c0_406] : memref<32x16xf32, #tpu.memory_space<vmem>>, vector<32x16xf32>
    %cst_407 = arith.constant dense<0.000000e+00> : vector<14x16xf32>
    %948 = tpu.matmul %946, %947, %cst_407 {dimension_numbers = #tpu.dot_dimension_numbers<[1], [0], [0], [1], [0, 0, 1, 1], [], []>} : vector<14x32xf32>, vector<32x16xf32>, vector<14x16xf32> -> vector<14x16xf32>
    %cst_408 = arith.constant 0.176776692 : f32
    %949 = vector.broadcast %cst_408 : f32 to vector<14x16xf32>
    %950 = arith.mulf %948, %949 : vector<14x16xf32>
    %c0_409 = arith.constant 0 : index
    %c0_410 = arith.constant 0 : index
    %951 = vector.load %arg38[%c0_409, %c0_410] : memref<14x16xf32, #tpu.memory_space<vmem>>, vector<14x16xf32>
    tpu.vector_store %arg38[%c0_409, %c0_410], %950 {strides = array<i32>} : memref<14x16xf32, #tpu.memory_space<vmem>>, vector<14x16xf32>,
    return
  }
}

</mosaic_0001>

<bundles_post_ra>
// kernel: transformer_forward.1
= control target key start
LH: loop header
LB: loop body
LE: loop exit
PB: predicated region body
PF: predicated region fallthrough
CT: control target
= control target key end

     0   :  { %s5502_s6 = smov 1   ;;  %s5503_s10 = smov 2   ;;  %s6798_s0 = inlined_call_operand.smem [shape: u32[39], index: -1, kind: input, shape index: {}] }
   0x1   :  { %s5564_s5 = sld [smem:[%s6798_s0]]   ;;  %s5504_s14 = smov 3  }
   0x2   :  { %s5569_s9 = sld [smem:[%s6798_s0 + %s5502_s6]]   ;;  %s5505_s18 = smov 4  }
   0x3   :  { %s5574_s13 = sld [smem:[%s6798_s0 + %s5503_s10]]   ;;  %s5506_s22 = smov 5  }
   0x4   :  { %s5579_s17 = sld [smem:[%s6798_s0 + %s5504_s14]]   ;;  %s5507_s26 = smov 6  }
   0x5   :  { %s5584_s21 = sld [smem:[%s6798_s0 + %s5505_s18]]   ;;  %s5508_s30 = smov 7  }
   0x6   :  { %s5589_s25 = sld [smem:[%s6798_s0 + %s5506_s22]]   ;;  %s5509_s4 = smov 8  }
   0x7   :  { %s5594_s29 = sld [smem:[%s6798_s0 + %s5507_s26]]   ;;  %s5510_s10 = smov 9  }
   0x8   :  { %6824 = sst [smem:[#allocation5_spill]] %s5569_s9  ;;  %s5511_s15 = smov 10  }
   0x9   :  { %s5599_s3 = sld [smem:[%s6798_s0 + %s5508_s30]]   ;;  %s5512_s20 = smov 11  }
   0xa   :  { %6825 = sst [smem:[#allocation6_spill]] %s5579_s17  ;;  %s5513_s26 = smov 12  }
   0xb   :  { %6826 = sst [smem:[#allocation7_spill]] %s5584_s21  ;;  %s5514_s1 = smov 13  }
   0xc   :  { %s5604_s8 = sld [smem:[%s6798_s0 + %s5509_s4]]   ;;  %s5515_s7 = smov 14  }
   0xd   :  { %6827 = sst [smem:[#allocation8_spill]] %s5594_s29  ;;  %s5517_s22 = smov 16  }
   0xe   :  { %s5609_s14 = sld [smem:[%s6798_s0 + %s5510_s10]]   ;;  %s5518_s28 = smov 17  }
   0xf   :  { %s5614_s19 = sld [smem:[%s6798_s0 + %s5511_s15]]   ;;  %s5516_s15 = smov 15  }
  0x10   :  { %s5619_s24 = sld [smem:[%s6798_s0 + %s5512_s20]]  }
  0x11   :  { %s5624_s30 = sld [smem:[%s6798_s0 + %s5513_s26]]  }
  0x12   :  { %s5629_s6 = sld [smem:[%s6798_s0 + %s5514_s1]]  }
  0x13   :  { %s5634_s12 = sld [smem:[%s6798_s0 + %s5515_s7]]   ;;  %s5519_s7 = smov 18  }
  0x14   :  { %s5639_s20 = sld [smem:[%s6798_s0 + %s5516_s15]]   ;;  %s5520_s15 = smov 19  }
  0x15   :  { %s5644_s27 = sld [smem:[%s6798_s0 + %s5517_s22]]   ;;  %s5521_s22 = smov 20  }
  0x16   :  { %s5649_s4 = sld [smem:[%s6798_s0 + %s5518_s28]]   ;;  %s5522_s28 = smov 21  }
  0x17   :  { %s5654_s21 = sld [smem:[%s6798_s0 + %s5519_s7]]   ;;  %s5523_s7 = smov 22  }
  0x18   :  { %s5659_s29 = sld [smem:[%s6798_s0 + %s5520_s15]]   ;;  %s5524_s15 = smov 23  }
  0x19   :  { %s5664_s17 = sld [smem:[%s6798_s0 + %s5521_s22]]   ;;  %s5525_s22 = smov 24  }
  0x1a   :  { %s5669_s9 = sld [smem:[%s6798_s0 + %s5522_s28]]   ;;  %s5526_s28 = smov 25  }
  0x1d   :  { %6828 = sst [smem:[#allocation9_spill]] %s5654_s21 }
  0x1e   :  { %6829 = sst [smem:[#allocation10_spill]] %s5659_s29 }
  0x1f   :  { %6830 = sst [smem:[#allocation11_spill]] %s5664_s17 }
  0x20   :  { %6831 = sst [smem:[#allocation12_spill]] %s5669_s9 }
  0x21   :  { %s5674_s21 = sld [smem:[%s6798_s0 + %s5523_s7]]   ;;  %s5527_s7 = smov 26  }
  0x22   :  { %s5679_s29 = sld [smem:[%s6798_s0 + %s5524_s15]]   ;;  %s5528_s15 = smov 27  }
  0x23   :  { %s5684_s17 = sld [smem:[%s6798_s0 + %s5525_s22]]   ;;  %s5529_s22 = smov 28  }
  0x24   :  { %s5689_s9 = sld [smem:[%s6798_s0 + %s5526_s28]]   ;;  %s5530_s28 = smov 29  }
  0x27   :  { %6832 = sst [smem:[#allocation13_spill]] %s5674_s21 }
  0x28   :  { %6833 = sst [smem:[#allocation14_spill]] %s5679_s29 }
  0x29   :  { %6834 = sst [smem:[#allocation15_spill]] %s5684_s17 }
  0x2a   :  { %6835 = sst [smem:[#allocation16_spill]] %s5689_s9 }
  0x2b   :  { %s5694_s21 = sld [smem:[%s6798_s0 + %s5527_s7]]   ;;  %s5531_s7 = smov 30  }
  0x2c   :  { %s5699_s29 = sld [smem:[%s6798_s0 + %s5528_s15]]   ;;  %s5532_s15 = smov 31  }
  0x2d   :  { %s5704_s17 = sld [smem:[%s6798_s0 + %s5529_s22]]   ;;  %s5533_s22 = smov 32  }
  0x2e   :  { %s5709_s9 = sld [smem:[%s6798_s0 + %s5530_s28]]   ;;  %s5534_s28 = smov 33  }
  0x31   :  { %6836 = sst [smem:[#allocation17_spill]] %s5694_s21 }
  0x32   :  { %6837 = sst [smem:[#allocation18_spill]] %s5699_s29 }
  0x33   :  { %6838 = sst [smem:[#allocation19_spill]] %s5704_s17 }
  0x34   :  { %6839 = sst [smem:[#allocation20_spill]] %s5709_s9 }
  0x35   :  { %s5714_s21 = sld [smem:[%s6798_s0 + %s5531_s7]]   ;;  %s5535_s7 = smov 34  }
  0x36   :  { %s5719_s29 = sld [smem:[%s6798_s0 + %s5532_s15]]   ;;  %s5536_s15 = smov 35  }
  0x37   :  { %s5724_s17 = sld [smem:[%s6798_s0 + %s5533_s22]]   ;;  %s5537_s22 = smov 36  }
  0x38   :  { %s5729_s9 = sld [smem:[%s6798_s0 + %s5534_s28]]   ;;  %s5538_s28 = smov 37  }
  0x3b   :  { %6840 = sst [smem:[#allocation21_spill]] %s5714_s21 }
  0x3c   :  { %6841 = sst [smem:[#allocation22_spill]] %s5719_s29 }
  0x3d   :  { %6842 = sst [smem:[#allocation23_spill]] %s5724_s17 }
  0x3e   :  { %6843 = sst [smem:[#allocation24_spill]] %s5729_s9 }
  0x3f   :  { %s5734_s21 = sld [smem:[%s6798_s0 + %s5535_s7]]   ;;  %s5539_s7 = smov 38  }
  0x40   :  { %s5739_s29 = sld [smem:[%s6798_s0 + %s5536_s15]]  }
  0x41   :  { %s5744_s17 = sld [smem:[%s6798_s0 + %s5537_s22]]  }
  0x42   :  { %s5749_s9 = sld [smem:[%s6798_s0 + %s5538_s28]]  }
  0x45   :  { %6844 = sst [smem:[#allocation25_spill]] %s5734_s21 }
  0x46   :  { %s5754_s21 = sld [smem:[%s6798_s0 + %s5539_s7]]  }
  0x47   :  { %v174_v0 = vld [vmem:[%s5599_s3 + $0x18] sm:$0xff]  ;;  %v173_v1 = vld [vmem:[%s5599_s3 + $0x10] sm:$0xff]  ;;  %v172_v2 = vld [vmem:[%s5599_s3 + $0x8] sm:$0xff]  ;;  %vm186_vm0 = vcmask 261120  }
  0x48   :  { %205 = vmatpush.msra.mxu0 %v174_v0  ;;  %v171_v3 = vld [vmem:[%s5599_s3] sm:$0xff]  ;;  %v5766_v5 = vld [vmem:[%s5564_s5 + $0x8] sm:$0xff] }
  0x49   :  { %v5761_v4 = vld [vmem:[%s5564_s5] sm:$0xff] }
  0x4a   :  { %206 = vmatpush.msra.mxu0 %v173_v1 }
  0x4c   :  { %207 = vmatpush.msra.mxu0 %v172_v2 }
  0x4e   :  { %208 = vmatpush.msra.mxu0 %v171_v3 }
  0x4f   :  { %4736 = vmatmul.msk.f32.vlgmr.msra.gmra.mxu0 %vm186_vm0, %v5761_v4 }
  0x57   :  { %4737 = vmatmul.msk.f32.gmra.mxu0 %vm186_vm0, %v5766_v5 }
  0x58   :  { %82 = vsyncpa [#allocation3], 0  ;;  %v5196_v7 = vld [vmem:[%s5604_s8] ss:$0 sm:$0xff]  ;;  %s5540_s0 = smov 96   ;;  %s5541_s5 = smov 64  }
  0x59   :  { %s5542_s15 = smov 120   ;;  %s5543_s16 = smov 80   ;;  %vm222_vm1 = vcmask 64512   ;;  %v5802_v18 = vld [vmem:[%s5574_s13] sm:$0xff]  ;;  %vm258_vm2 = vcmask 130048   ;;  %v5807_v23 = vld [vmem:[%s5574_s13 + $0x8] sm:$0xff] }
  0x5a   :  { %s5544_s18 = smov 72   ;;  %s5545_s22 = smov 112   ;;  %v176_v38 = vld [vmem:[%s5609_s14] sm:$0xff]  ;;  %vm869_vm10 = vcmask 523264  }
  0x5b   :  { %s5546_s23 = smov 88   ;;  %s5547_s26 = smov 104  }
  0x5c   :  { %s5548_s28 = smov 56   ;;  %s6822_s1 = smov 48  }
  0x5d   :  { %s6820_s2 = smov 40   ;;  %s6858_s7 = sld [smem:[#allocation18_spill]] }
  0x5e   :  { %s6859_s10 = sld [smem:[#allocation19_spill]] }
  0x5f   :  { %s6860_s11 = sld [smem:[#allocation22_spill]] }
  0xcc   :  { %v210_v6 = vpop.f32.mrf.mxu0 }
  0xcd   :  { %v5775_v10 = vadd.f32 %v5196_v7, %v210_v6 }
  0xd4   :  { %v213_v8 = vpop.f32.mrf.mxu0 }
  0xd5   :  { %v5771_v9 = vadd.f32 %v5196_v7, %v213_v8 }
  0xd7   :  { %220 = vrot.lane.b32.xlu0 %v5771_v9, %s5540_s0  ;;  %v5781_v11 = vpack.i.bf16 %v5775_v10, %v5771_v9 }
  0xdf   :  { %218 = vrot.lane.b32.xlu0 %v5775_v10, %s5540_s0 }
  0xe7   :  { %5095 = vrot.lane.b32.xlu0 %v5781_v11, %s5541_s5 }
  0xef   :  { %316 = vrot.lane.b32.xlu0 %v5775_v10, %s5542_s15 }
  0xf7   :  { %318 = vrot.lane.b32.xlu0 %v5771_v9, %s5542_s15 }
  0xff   :  { %480 = vrot.lane.b32.xlu0 %v5771_v9, %s5543_s16 }
 0x107   :  { %609 = vrot.lane.b32.xlu0 %v5775_v10, %s5544_s18 }
 0x10f   :  { %476 = vrot.lane.b32.xlu0 %v5771_v9, %s5545_s22 }
 0x149   :  { %v221_v12 = vpop.permute.xlu0 %220 }
 0x14a   :  { %4738 = vmatpush.xpose.msk.msra.mxu1 %vm222_vm1, %v221_v12 }
 0x151   :  { %v219_v13 = vpop.permute.xlu0 %218 }
 0x152   :  { %4739 = vmatpush.xpose.msk.msra.mxu1 %vm222_vm1, %v219_v13 }
 0x155   :  { %4740 = vmatmul.msk.f32.vlgmr.msra.gmra.mxu1 %vm222_vm1, %v5775_v10 }
 0x156   :  { %466 = vmatpush.msrb.mxu1 %v176_v38 }
 0x159   :  { %v5096_v14 = vpop.permute.xlu0 %5095 }
 0x15a   :  { %v5097_v15 = vunpack.i.l.bf16 %v5096_v14  ;;  %v5098_v16 = vunpack.i.h.bf16 %v5096_v14 }
 0x15c   :  { %307 = vmatpush.msrb.mxu0 %v5097_v15  ;;  %5038 = vmatpush.msra.mxu2 %v5097_v15 }
 0x15d   :  { %4741 = vmatmul.msk.f32.gmra.mxu1 %vm222_vm1, %v5771_v9 }
 0x15e   :  { %308 = vmatpush.msrb.mxu0 %v5098_v16  ;;  %5039 = vmatpush.msra.mxu2 %v5098_v16 }
 0x161   :  { %v317_v39 = vpop.permute.xlu0 %316 }
 0x169   :  { %v319_v42 = vpop.permute.xlu0 %318 }
 0x171   :  { %v481_v48 = vpop.permute.xlu0 %480 }
 0x179   :  { %v610_v51 = vpop.permute.xlu0 %609 }
 0x181   :  { %v477_v53 = vpop.permute.xlu0 %476 }
 0x1d2   :  { %v248_v17 = vpop.f32.mrf.mxu1 }
 0x1d3   :  { %v254_v19 = vmul.f32 0.35355338, %v248_v17 }
 0x1d5   :  { %v256_v20 = vadd.f32 %v254_v19, %v5802_v18 }
 0x1d7   :  { %v259_v21 = vsel %vm258_vm2, %v256_v20, -inf }
 0x1d8   :  { %260 = vmax.xlane.f32.xlu1 %v259_v21 }
 0x1da   :  { %v251_v22 = vpop.f32.mrf.mxu1 }
 0x1db   :  { %v255_v24 = vmul.f32 0.35355338, %v251_v22 }
 0x1dd   :  { %v257_v25 = vadd.f32 %v255_v24, %v5807_v23 }
 0x1df   :  { %v262_v26 = vsel %vm258_vm2, %v257_v25, -inf }
 0x1e0   :  { %263 = vmax.xlane.f32.xlu1 %v262_v26 }
 0x1f9   :  { %322 = vrot.lane.b32.xlu1 %v5771_v9, %s5546_s23 }
 0x201   :  { %478 = vrot.lane.b32.xlu1 %v5775_v10, %s5543_s16 }
 0x209   :  { %605 = vrot.lane.b32.xlu1 %v5775_v10, %s5547_s26 }
 0x24b   :  { %v261_v27 = vpop.xlane.xlu1 %260 }
 0x24c   :  { %v265_v28 = vsub.f32 %v256_v20, %v261_v27 }
 0x24e   :  { %v267_v29 = vmul.f32 1.442695, %v265_v28 }
 0x250   :  { %5236 = vpow2.f32 %v267_v29 }
 0x253   :  { %v264_v30 = vpop.xlane.xlu1 %263 }
 0x254   :  { %v266_v31 = vsub.f32 %v257_v25, %v264_v30 }
 0x256   :  { %v5237_v32 = vpop.eup %5236  ;;  %v269_v33 = vmul.f32 1.442695, %v266_v31 }
 0x257   :  { %v271_v34 = vsel %vm258_vm2, %v5237_v32, 0.0 }
 0x258   :  { %5238 = vpow2.f32 %v269_v33  ;;  %272 = vadd.xlane.f32.xlu2 %v271_v34 }
 0x25e   :  { %v5239_v35 = vpop.eup %5238 }
 0x25f   :  { %v274_v36 = vsel %vm258_vm2, %v5239_v35, 0.0 }
 0x260   :  { %275 = vadd.xlane.f32.xlu2 %v274_v36 }
 0x26b   :  { %v323_v37 = vpop.permute.xlu1 %322 }
 0x26c   :  { %4744 = vmatpush.xpose.msk.msra.mxu3 %vm222_vm1, %v323_v37 }
 0x273   :  { %v479_v49 = vpop.permute.xlu1 %478 }
 0x278   :  { %320 = vrot.lane.b32.xlu2 %v5775_v10, %s5546_s23 }
 0x27b   :  { %v606_v60 = vpop.permute.xlu1 %605 }
 0x280   :  { %611 = vrot.lane.b32.xlu2 %v5771_v9, %s5544_s18 }
 0x288   :  { %474 = vrot.lane.b32.xlu2 %v5775_v10, %s5545_s22 }
 0x290   :  { %607 = vrot.lane.b32.xlu2 %v5771_v9, %s5547_s26 }
 0x2cb   :  { %v273_v40 = vpop.xlane.xlu2 %272 }
 0x2cc   :  { %5240 = vrcp.f32 %v273_v40 }
 0x2d2   :  { %v5241_v41 = vpop.eup %5240 }
 0x2d3   :  { %v276_v43 = vpop.xlane.xlu2 %275  ;;  %v279_v44 = vmul.f32 %v5241_v41, %v5237_v32 }
 0x2d4   :  { %5242 = vrcp.f32 %v276_v43 }
 0x2d5   :  { %4742 = vmatmul.msk.f32.vlgmr.msrb.gmra.mxu0 %vm258_vm2, %v279_v44 }
 0x2da   :  { %v5243_v45 = vpop.eup %5242 }
 0x2db   :  { %v321_v46 = vpop.permute.xlu2 %320  ;;  %v280_v47 = vmul.f32 %v5243_v45, %v5239_v35 }
 0x2dc   :  { %4745 = vmatpush.xpose.msk.msra.mxu3 %vm222_vm1, %v321_v46 }
 0x2dd   :  { %4743 = vmatmul.msk.f32.vlgmr.msra.gmra.mxu2 %vm258_vm2, %v280_v47 }
 0x2df   :  { %4746 = vmatmul.msk.f32.vlgmr.msra.gmra.mxu3 %vm222_vm1, %v317_v39 }
 0x2e0   :  { %4754 = vmatpush.xpose.msk.msrb.mxu3 %vm222_vm1, %v481_v48 }
 0x2e3   :  { %v612_v50 = vpop.permute.xlu2 %611 }
 0x2e4   :  { %4755 = vmatpush.xpose.msk.msrb.mxu3 %vm222_vm1, %v479_v49  ;;  %4762 = vmatpush.xpose.msk.msra.mxu1 %vm222_vm1, %v612_v50 }
 0x2e7   :  { %4747 = vmatmul.msk.f32.gmra.mxu3 %vm222_vm1, %v319_v42 }
 0x2e8   :  { %4763 = vmatpush.xpose.msk.msra.mxu1 %vm222_vm1, %v610_v51 }
 0x2eb   :  { %v475_v52 = vpop.permute.xlu2 %474 }
 0x2ef   :  { %4756 = vmatmul.msk.f32.vlgmr.msrb.gmra.mxu3 %vm222_vm1, %v475_v52 }
 0x2f3   :  { %v608_v1 = vpop.permute.xlu2 %607 }
 0x2f7   :  { %4757 = vmatmul.msk.f32.gmra.mxu3 %vm222_vm1, %v477_v53 }
 0x352   :  { %v310_v54 = vpop.f32.mrf.mxu0 }
 0x353   :  { %4752 = vmatmul.msk.f32.vlgmr.msrb.gmra.mxu1 %vm222_vm1, %v310_v54 }
 0x360   :  { %v313_v55 = vpop.f32.mrf.mxu2 }
 0x361   :  { %4753 = vmatmul.msk.f32.gmra.mxu1 %vm222_vm1, %v313_v55 }
 0x362   :  { %v349_v56 = vpop.f32.mrf.mxu3 }
 0x363   :  { %v355_v57 = vmul.f32 0.35355338, %v349_v56 }
 0x365   :  { %v357_v58 = vadd.f32 %v355_v57, %v5802_v18 }
 0x367   :  { %v359_v59 = vsel %vm258_vm2, %v357_v58, -inf }
 0x368   :  { %360 = vmax.xlane.f32.xlu1 %v359_v59 }
 0x369   :  { %4764 = vmatmul.msk.f32.vlgmr.msra.gmra.mxu1 %vm222_vm1, %v606_v60 }
 0x36a   :  { %v352_v61 = vpop.f32.mrf.mxu3 }
 0x36b   :  { %v356_v62 = vmul.f32 0.35355338, %v352_v61 }
 0x36d   :  { %v358_v63 = vadd.f32 %v356_v62, %v5807_v23 }
 0x36f   :  { %v362_v0 = vsel %vm258_vm2, %v358_v63, -inf }
 0x370   :  { %363 = vmax.xlane.f32.xlu0 %v362_v0 }
 0x371   :  { %4765 = vmatmul.msk.f32.gmra.mxu1 %vm222_vm1, %v608_v1 }
 0x372   :  { %v507_v2 = vpop.f32.mrf.mxu3 }
 0x373   :  { %v513_v3 = vmul.f32 0.35355338, %v507_v2 }
 0x375   :  { %v515_v6 = vadd.f32 %v513_v3, %v5802_v18 }
 0x377   :  { %v517_v7 = vsel %vm258_vm2, %v515_v6, -inf }
 0x378   :  { %518 = vmax.xlane.f32.xlu1 %v517_v7 }
 0x37a   :  { %v510_v8 = vpop.f32.mrf.mxu3 }
 0x37b   :  { %v514_v9 = vmul.f32 0.35355338, %v510_v8  ;;  %v177_v8 = vld [vmem:[%s5609_s14 + $0x8] sm:$0xff] }
 0x37c   :  { %437 = vmatpush.msra.mxu0 %v177_v8  ;;  %v817_v8 = vld [vmem:[%s5629_s6 + $0x8] sm:$0xff] }
 0x37d   :  { %v516_v10 = vadd.f32 %v514_v9, %v5807_v23 }
 0x37f   :  { %v520_v12 = vsel %vm258_vm2, %v516_v10, -inf }
 0x380   :  { %521 = vmax.xlane.f32.xlu0 %v520_v12 }
 0x3d0   :  { %v5852_v13 = vpop.f32.mrf.mxu1 }
 0x3db   :  { %v361_v14 = vpop.xlane.xlu1 %360 }
 0x3dc   :  { %v365_v15 = vsub.f32 %v357_v58, %v361_v14 }
 0x3de   :  { %v367_v16 = vmul.f32 1.442695, %v365_v15  ;;  %v5854_v17 = vpop.f32.mrf.mxu1 }
 0x3e0   :  { %5244 = vpow2.f32 %v367_v16 }
 0x3e3   :  { %v364_v19 = vpop.xlane.xlu0 %363 }
 0x3e4   :  { %v366_v20 = vsub.f32 %v358_v63, %v364_v19 }
 0x3e6   :  { %v5245_v21 = vpop.eup %5244  ;;  %v369_v22 = vmul.f32 1.442695, %v366_v20  ;;  %v638_v24 = vpop.f32.mrf.mxu1 }
 0x3e7   :  { %v644_v25 = vmul.f32 0.35355338, %v638_v24  ;;  %v371_v26 = vsel %vm258_vm2, %v5245_v21, 0.0 }
 0x3e8   :  { %5246 = vpow2.f32 %v369_v22  ;;  %372 = vadd.xlane.f32.xlu1 %v371_v26 }
 0x3e9   :  { %v646_v27 = vadd.f32 %v644_v25, %v5802_v18 }
 0x3eb   :  { %v519_v28 = vpop.xlane.xlu1 %518  ;;  %v648_v29 = vsel %vm258_vm2, %v646_v27, -inf }
 0x3ec   :  { %v523_v30 = vsub.f32 %v515_v6, %v519_v28  ;;  %649 = vmax.xlane.f32.xlu2 %v648_v29  ;;  %v179_v29 = vld [vmem:[%s5609_s14 + $0x18] sm:$0xff] }
 0x3ee   :  { %v5247_v31 = vpop.eup %5246  ;;  %v525_v32 = vmul.f32 1.442695, %v523_v30  ;;  %v641_v33 = vpop.f32.mrf.mxu1 }
 0x3ef   :  { %v645_v34 = vmul.f32 0.35355338, %v641_v33  ;;  %v374_v35 = vsel %vm258_vm2, %v5247_v31, 0.0 }
 0x3f0   :  { %5248 = vpow2.f32 %v525_v32  ;;  %375 = vadd.xlane.f32.xlu0 %v374_v35 }
 0x3f1   :  { %v647_v36 = vadd.f32 %v645_v34, %v5807_v23 }
 0x3f3   :  { %v651_v37 = vsel %vm258_vm2, %v647_v36, -inf  ;;  %v522_v43 = vpop.xlane.xlu0 %521 }
 0x3f4   :  { %652 = vmax.xlane.f32.xlu2 %v651_v37  ;;  %v524_v47 = vsub.f32 %v516_v10, %v522_v43  ;;  %v178_v10 = vld [vmem:[%s5609_s14 + $0x10] sm:$0xff] }
 0x3f5   :  { %595 = vmatpush.msrb.mxu0 %v178_v10 }
 0x3f6   :  { %v5249_v38 = vpop.eup %5248  ;;  %v527_v51 = vmul.f32 1.442695, %v524_v47 }
 0x3f7   :  { %v529_v39 = vsel %vm258_vm2, %v5249_v38, 0.0 }
 0x3f8   :  { %530 = vadd.xlane.f32.xlu0 %v529_v39 }
 0x40c   :  { %5100 = vrot.lane.b32.xlu2 %v5781_v11, %s5548_s28 }
 0x414   :  { %5110 = vrot.lane.b32.xlu2 %v5781_v11, %s6822_s1 }
 0x45b   :  { %v373_v44 = vpop.xlane.xlu1 %372 }
 0x45f   :  { %v650_v40 = vpop.xlane.xlu2 %649 }
 0x460   :  { %v654_v41 = vsub.f32 %v646_v27, %v650_v40 }
 0x462   :  { %v656_v42 = vmul.f32 1.442695, %v654_v41 }
 0x463   :  { %v376_v52 = vpop.xlane.xlu0 %375 }
 0x464   :  { %5250 = vpow2.f32 %v656_v42 }
 0x465   :  { %5252 = vrcp.f32 %v373_v44 }
 0x467   :  { %v653_v45 = vpop.xlane.xlu2 %652 }
 0x468   :  { %v655_v46 = vsub.f32 %v647_v36, %v653_v45 }
 0x46a   :  { %v5251_v48 = vpop.eup %5250  ;;  %v658_v49 = vmul.f32 1.442695, %v655_v46 }
 0x46b   :  { %v660_v50 = vsel %vm258_vm2, %v5251_v48, 0.0  ;;  %v5253_v54 = vpop.eup %5252  ;;  %v531_v61 = vpop.xlane.xlu0 %530 }
 0x46c   :  { %5254 = vpow2.f32 %v658_v49  ;;  %661 = vadd.xlane.f32.xlu1 %v660_v50  ;;  %v379_v59 = vmul.f32 %v5253_v54, %v5245_v21 }
 0x46d   :  { %5256 = vpow2.f32 %v527_v51  ;;  %v5551_v51 = vmov 32.0  }
 0x46e   :  { %5258 = vrcp.f32 %v376_v52 }
 0x46f   :  { %v5101_v53 = vpop.permute.xlu2 %5100  ;;  %5260 = vrcp.f32 %v531_v61 }
 0x470   :  { %v5102_v55 = vunpack.i.l.bf16 %v5101_v53  ;;  %v5103_v57 = vunpack.i.h.bf16 %v5101_v53 }
 0x472   :  { %v5255_v56 = vpop.eup %5254  ;;  %407 = vmatpush.msrb.mxu2 %v5102_v55 }
 0x473   :  { %v663_v58 = vsel %vm258_vm2, %v5255_v56, 0.0  ;;  %v5257_v60 = vpop.eup %5256 }
 0x474   :  { %408 = vmatpush.msrb.mxu2 %v5103_v57  ;;  %664 = vadd.xlane.f32.xlu0 %v663_v58  ;;  %v5259_v63 = vpop.eup %5258  ;;  %v532_v2 = vsel %vm258_vm2, %v5257_v60, 0.0 }
 0x475   :  { %4748 = vmatmul.msk.f32.vlgmr.msrb.gmra.mxu2 %vm258_vm2, %v379_v59  ;;  %v380_v3 = vmul.f32 %v5259_v63, %v5247_v31  ;;  %v5261_v6 = vpop.eup %5260  ;;  %v166_v59 = vld [vmem:[%s5589_s25 + $0x8] sm:$0xff] }
 0x476   :  { %v537_v7 = vmul.f32 %v5261_v6, %v5249_v38  ;;  %v5197_v38 = vld [vmem:[%s5614_s19] ss:$0 sm:$0xff]  ;;  %v819_v6 = vld [vmem:[%s5629_s6 + $0x18] sm:$0xff] }
 0x477   :  { %v5111_v62 = vpop.permute.xlu2 %5110 }
 0x478   :  { %v5112_v0 = vunpack.i.l.bf16 %v5111_v62  ;;  %v5113_v1 = vunpack.i.h.bf16 %v5111_v62 }
 0x47a   :  { %565 = vmatpush.msra.mxu2 %v5112_v0 }
 0x47c   :  { %566 = vmatpush.msra.mxu2 %v5113_v1  ;;  %533 = vadd.xlane.f32.xlu0 %v532_v2 }
 0x47d   :  { %4749 = vmatmul.msk.f32.gmra.mxu2 %vm258_vm2, %v380_v3  ;;  %v165_v3 = vld [vmem:[%s5589_s25] sm:$0xff]  ;;  %s6845_s25 = sld [smem:[#allocation9_spill]] }
 0x47e   :  { %726 = vmatpush.msrb.mxu2 %v179_v29 }
 0x485   :  { %5105 = vrot.lane.b32.xlu1 %v5781_v11, %s6820_s2  ;;  %4758 = vmatmul.msk.f32.vlgmr.msra.gmra.mxu2 %vm258_vm2, %v537_v7  ;;  %v818_v7 = vld [vmem:[%s5629_s6 + $0x10] sm:$0xff] }
 0x4df   :  { %v662_v12 = vpop.xlane.xlu1 %661 }
 0x4e7   :  { %v665_v9 = vpop.xlane.xlu0 %664 }
 0x4ef   :  { %v534_v14 = vpop.xlane.xlu0 %533 }
 0x4f0   :  { %5262 = vrcp.f32 %v534_v14 }
 0x4f1   :  { %5264 = vrcp.f32 %v662_v12 }
 0x4f2   :  { %5266 = vrcp.f32 %v665_v9  ;;  %v816_v9 = vld [vmem:[%s5629_s6] sm:$0xff] }
 0x4f3   :  { %5268 = vrcp.f32 %v5551_v51  ;;  %v822_v51 = vld [vmem:[%s5639_s20 + $0x8] sm:$0xff] }
 0x4f6   :  { %v5263_v15 = vpop.eup %5262 }
 0x4f7   :  { %v5106_v16 = vpop.permute.xlu1 %5105  ;;  %v538_v19 = vmul.f32 %v5263_v15, %v5257_v60  ;;  %v5265_v20 = vpop.eup %5264  ;;  %v828_v15 = vld [vmem:[%s5639_s20 + $0x38] sm:$0xff] }
 0x4f8   :  { %v5107_v21 = vunpack.i.l.bf16 %v5106_v16  ;;  %v410_v22 = vpop.f32.mrf.mxu2  ;;  %v5108_v11 = vunpack.i.h.bf16 %v5106_v16  ;;  %v668_v24 = vmul.f32 %v5265_v20, %v5251_v48  ;;  %v5267_v25 = vpop.eup %5266  ;;  %v827_v16 = vld [vmem:[%s5639_s20 + $0x30] sm:$0xff]  ;;  %884 = vmatpush.msrb.mxu1 %v828_v15 }
 0x4f9   :  { %4750 = vmatmul.msk.f32.vlgmr.msra.gmra.mxu0 %vm222_vm1, %v410_v22  ;;  %4759 = vmatmul.msk.f32.gmra.mxu2 %vm258_vm2, %v538_v19  ;;  %v669_v27 = vmul.f32 %v5267_v25, %v5255_v56  ;;  %v5269_v52 = vpop.eup %5268 }
 0x4fa   :  { %696 = vmatpush.msra.mxu3 %v5107_v21  ;;  %v750_v53 = vmul.f32 32.0, %v5269_v52  ;;  %vm754_vm3 = vweird.f32 %v5269_v52  ;;  %853 = vmatpush.msra.mxu0 %v819_v6  ;;  %v826_v21 = vld [vmem:[%s5639_s20 + $0x28] sm:$0xff] }
 0x4fb   :  { %885 = vmatpush.msrb.mxu1 %v827_v16 }
 0x4fc   :  { %697 = vmatpush.msra.mxu3 %v5108_v11  ;;  %854 = vmatpush.msra.mxu0 %v818_v7 }
 0x4fd   :  { %4766 = vmatmul.msk.f32.vlgmr.msra.gmra.mxu3 %vm258_vm2, %v668_v24  ;;  %v825_v24 = vld [vmem:[%s5639_s20 + $0x20] sm:$0xff]  ;;  %886 = vmatpush.msrb.mxu1 %v826_v21  ;;  %v4775_v21 = vld [vmem:[%s5599_s3 + $0x28] sm:$0xff] }
 0x4fe   :  { %855 = vmatpush.msra.mxu0 %v817_v8 }
 0x4ff   :  { %887 = vmatpush.msrb.mxu1 %v825_v24 }
 0x500   :  { %v413_v26 = vpop.f32.mrf.mxu2  ;;  %856 = vmatpush.msra.mxu0 %v816_v9 }
 0x501   :  { %4751 = vmatmul.msk.f32.gmra.mxu0 %vm222_vm1, %v413_v26  ;;  %v824_v26 = vld [vmem:[%s5639_s20 + $0x18] sm:$0xff] }
 0x502   :  { %888 = vmatpush.msrb.mxu1 %v824_v26 }
 0x505   :  { %4767 = vmatmul.msk.f32.gmra.mxu3 %vm258_vm2, %v669_v27 }
 0x508   :  { %v568_v28 = vpop.f32.mrf.mxu2 }
 0x509   :  { %4760 = vmatmul.msk.f32.vlgmr.msrb.gmra.mxu0 %vm222_vm1, %v568_v28 }
 0x576   :  { %v439_v33 = vpop.f32.mrf.mxu0 }
 0x577   :  { %v469_v36 = vadd.f32 %v5852_v13, %v439_v33  ;;  %v5198_v33 = vld [vmem:[%s5619_s24] ss:$0 sm:$0xff] }
 0x57c   :  { %v571_v30 = vpop.f32.mrf.mxu2 }
 0x57d   :  { %4761 = vmatmul.msk.f32.gmra.mxu0 %vm222_vm1, %v571_v30 }
 0x57e   :  { %v442_v34 = vpop.f32.mrf.mxu0 }
 0x57f   :  { %v472_v43 = vadd.f32 %v5854_v17, %v442_v34  ;;  %v5552_v17 = vmov 0  }
 0x580   :  { %v699_v31 = vpop.f32.mrf.mxu3  ;;  %5114 = vset.pattern.permute.xlu0 %v5552_v17  ;;  %5115 = vset.pattern.permute.xlu2 %v5552_v17 }
 0x581   :  { %4768 = vmatmul.msk.f32.vlgmr.msrb.gmra.mxu2 %vm222_vm1, %v699_v31 }
 0x586   :  { %v597_v35 = vpop.f32.mrf.mxu0 }
 0x587   :  { %v603_v37 = vadd.f32 %v597_v35, %v469_v36 }
 0x588   :  { %v702_v32 = vpop.f32.mrf.mxu3 }
 0x589   :  { %4769 = vmatmul.msk.f32.gmra.mxu2 %vm222_vm1, %v702_v32 }
 0x5fa   :  { %v600_v42 = vpop.f32.mrf.mxu0 }
 0x5fb   :  { %v604_v45 = vadd.f32 %v600_v42, %v472_v43 }
 0x604   :  { %v728_v39 = vpop.f32.mrf.mxu2 }
 0x605   :  { %v734_v40 = vadd.f32 %v728_v39, %v603_v37  ;;  %v5199_v37 = vld [vmem:[%s5624_s30] ss:$0 sm:$0xff] }
 0x607   :  { %v739_v41 = vadd.f32 %v5197_v38, %v734_v40 }
 0x609   :  { %v741_v44 = vadd.f32 %v739_v41, %v5761_v4  ;;  %v751_v4 = vsub.f32 1.0, %v750_v53  ;;  %v5200_v53 = vld [vmem:[%s5634_s12] ss:$0 sm:$0xff] }
 0x60b   :  { %v743_v46 = vsel %vm186_vm0, %v741_v44, 0.0  ;;  %v752_v54 = vmul.f32 %v5269_v52, %v751_v4 }
 0x60c   :  { %744 = vadd.xlane.f32.xlu2 %v743_v46  ;;  %v731_v47 = vpop.f32.mrf.mxu2 }
 0x60d   :  { %v735_v48 = vadd.f32 %v731_v47, %v604_v45  ;;  %v753_v55 = vadd.f32 %v5269_v52, %v752_v54 }
 0x60f   :  { %v740_v49 = vadd.f32 %v5197_v38, %v735_v48  ;;  %v5894_v56 = vsel %vm754_vm3, %v5269_v52, %v753_v55  ;;  %v821_v52 = vld [vmem:[%s5639_s20] sm:$0xff] }
 0x611   :  { %v742_v50 = vadd.f32 %v740_v49, %v5766_v5 }
 0x613   :  { %v746_v13 = vsel %vm186_vm0, %v742_v50, 0.0 }
 0x614   :  { %747 = vadd.xlane.f32.xlu0 %v746_v13  ;;  %v823_v13 = vld [vmem:[%s5639_s20 + $0x10] sm:$0xff] }
 0x615   :  { %889 = vmatpush.msrb.mxu1 %v823_v13 }
 0x617   :  { %890 = vmatpush.msrb.mxu1 %v822_v51 }
 0x619   :  { %891 = vmatpush.msrb.mxu1 %v821_v52 }
 0x624   :  { %811 = vperm.xlu2 %5115, %v166_v59  }
 0x67f   :  { %v745_v57 = vpop.xlane.xlu2 %744 }
 0x680   :  { %v756_v5 = vmul.f32 %v5894_v56, %v745_v57 }
 0x682   :  { %v758_v58 = vsub.f32 %v741_v44, %v756_v5 }
 0x684   :  { %v760_v60 = vmul.f32 %v758_v58, %v758_v58 }
 0x686   :  { %v762_v61 = vsel %vm186_vm0, %v760_v60, 0.0 }
 0x687   :  { %763 = vadd.xlane.f32.xlu1 %v762_v61  ;;  %v748_v62 = vpop.xlane.xlu0 %747  ;;  %v5919_v48 = vpop.permute.xlu2 %811 }
 0x688   :  { %v757_v63 = vmul.f32 %v5894_v56, %v748_v62 }
 0x68a   :  { %v759_v0 = vsub.f32 %v742_v50, %v757_v63 }
 0x68c   :  { %v761_v1 = vmul.f32 %v759_v0, %v759_v0 }
 0x68e   :  { %v765_v2 = vsel %vm186_vm0, %v761_v1, 0.0 }
 0x68f   :  { %766 = vadd.xlane.f32.xlu0 %v765_v2 }
 0x6a3   :  { %806 = vperm.xlu0 %5114, %v165_v3  }
 0x6fa   :  { %v764_v10 = vpop.xlane.xlu1 %763 }
 0x6fb   :  { %v768_v12 = vmul.f32 %v764_v10, %v5894_v56 }
 0x6fd   :  { %v770_v14 = vadd.f32 1e-05, %v768_v12 }
 0x6ff   :  { %5270 = vrsqrt.f32 %v770_v14  ;;  %vm778_vm5 = vweird.f32 %v770_v14 }
 0x702   :  { %v767_v19 = vpop.xlane.xlu0 %766 }
 0x703   :  { %v769_v20 = vmul.f32 %v767_v19, %v5894_v56  ;;  %v4777_v19 = vld [vmem:[%s5599_s3 + $0x38] sm:$0xff] }
 0x704   :  { %996 = vmatpush.msrb.mxu3 %v4777_v19 }
 0x705   :  { %v5271_v22 = vpop.eup %5270  ;;  %v771_v11 = vadd.f32 1e-05, %v769_v20  ;;  %v4776_v20 = vld [vmem:[%s5599_s3 + $0x30] sm:$0xff] }
 0x706   :  { %v773_v25 = vmul.f32 %v5271_v22, %v770_v14  ;;  %vm779_vm4 = vweird.f32 %v5271_v22  ;;  %997 = vmatpush.msrb.mxu3 %v4776_v20 }
 0x707   :  { %5272 = vrsqrt.f32 %v771_v11  ;;  %vm780_vm6 = vmor %vm778_vm5, %vm779_vm4  ;;  %vm788_vm8 = vweird.f32 %v771_v11  ;;  %vm1821_vm4 = vcmask 113664   ;;  %vm1825_vm5 = vcmask 111616  }
 0x708   :  { %v774_v27 = vmul.f32 %v5271_v22, %v773_v25  ;;  %998 = vmatpush.msrb.mxu3 %v4775_v21 }
 0x70a   :  { %v775_v28 = vmul.f32 0.5, %v774_v27 }
 0x70c   :  { %v776_v29 = vsub.f32 1.5, %v775_v28 }
 0x70d   :  { %v5273_v30 = vpop.eup %5272 }
 0x70e   :  { %v777_v31 = vmul.f32 %v5271_v22, %v776_v29  ;;  %v783_v32 = vmul.f32 %v5273_v30, %v771_v11  ;;  %vm789_vm7 = vweird.f32 %v5273_v30 }
 0x70f   :  { %vm790_vm9 = vmor %vm788_vm8, %vm789_vm7 }
 0x710   :  { %v781_v34 = vsel %vm780_vm6, %v5271_v22, %v777_v31  ;;  %v784_v35 = vmul.f32 %v5273_v30, %v783_v32  ;;  %v4774_v22 = vld [vmem:[%s5599_s3 + $0x20] sm:$0xff]  ;;  %s6847_s3 = sld [smem:[#allocation5_spill]] }
 0x711   :  { %v792_v36 = vmul.f32 %v781_v34, %v758_v58  ;;  %v5201_v58 = vld [vmem:[%s5644_s27] ss:$0 sm:$0xff]  ;;  %999 = vmatpush.msrb.mxu3 %v4774_v22 }
 0x712   :  { %v785_v38 = vmul.f32 0.5, %v784_v35 }
 0x713   :  { %v797_v39 = vmul.f32 %v5198_v33, %v792_v36 }
 0x714   :  { %v786_v40 = vsub.f32 1.5, %v785_v38 }
 0x715   :  { %v802_v41 = vadd.f32 %v5199_v37, %v797_v39  ;;  %v5915_v42 = vpop.permute.xlu0 %806 }
 0x716   :  { %v787_v43 = vmul.f32 %v5273_v30, %v786_v40 }
 0x717   :  { %v814_v44 = vmul.f32 %v5915_v42, %v802_v41  ;;  %v5203_v41 = vld [vmem:[%s6845_s25] ss:$0 sm:$0xff] }
 0x718   :  { %v791_v45 = vsel %vm790_vm9, %v5273_v30, %v787_v43 }
 0x719   :  { %4770 = vmatmul.msk.f32.vlgmr.msra.gmra.mxu0 %vm186_vm0, %v814_v44  ;;  %v793_v46 = vmul.f32 %v791_v45, %v759_v0 }
 0x71b   :  { %v798_v47 = vmul.f32 %v5198_v33, %v793_v46 }
 0x71d   :  { %v803_v49 = vadd.f32 %v5199_v37, %v798_v47  ;;  %v5202_v37 = vld [vmem:[%s5649_s4] ss:$0 sm:$0xff] }
 0x71f   :  { %v815_v50 = vmul.f32 %v5919_v48, %v803_v49 }
 0x721   :  { %4771 = vmatmul.msk.f32.gmra.mxu0 %vm186_vm0, %v815_v50 }
 0x796   :  { %v858_v17 = vpop.f32.mrf.mxu0 }
 0x797   :  { %v859_v4 = vadd.f32 %v5200_v53, %v858_v17  ;;  %v5204_v17 = vld [vmem:[%s5604_s8 + $0x1] ss:$0 sm:$0xff]  ;;  %s6848_s8 = sld [smem:[#allocation11_spill]] }
 0x799   :  { %v864_v54 = vmax.f32 %v859_v4, 0.0 }
 0x79b   :  { %4772 = vmatmul.msk.f32.vlgmr.msrb.gmra.mxu1 %vm869_vm10, %v864_v54 }
 0x79e   :  { %v861_v55 = vpop.f32.mrf.mxu0 }
 0x79f   :  { %v862_v57 = vadd.f32 %v5200_v53, %v861_v55 }
 0x7a1   :  { %v865_v5 = vmax.f32 %v862_v57, 0.0 }
 0x7a3   :  { %4773 = vmatmul.msk.f32.gmra.mxu1 %vm869_vm10, %v865_v5 }
 0x818   :  { %v893_v59 = vpop.f32.mrf.mxu1 }
 0x819   :  { %v894_v60 = vadd.f32 %v5201_v58, %v893_v59 }
 0x81b   :  { %v899_v61 = vadd.f32 %v894_v60, %v814_v44 }
 0x81d   :  { %v901_v62 = vsel %vm186_vm0, %v899_v61, 0.0 }
 0x81e   :  { %902 = vadd.xlane.f32.xlu1 %v901_v62 }
 0x820   :  { %v896_v63 = vpop.f32.mrf.mxu1 }
 0x821   :  { %v897_v0 = vadd.f32 %v5201_v58, %v896_v63 }
 0x823   :  { %v900_v1 = vadd.f32 %v897_v0, %v815_v50 }
 0x825   :  { %v904_v2 = vsel %vm186_vm0, %v900_v1, 0.0 }
 0x826   :  { %905 = vadd.xlane.f32.xlu1 %v904_v2 }
 0x891   :  { %v903_v3 = vpop.xlane.xlu1 %902 }
 0x892   :  { %v907_v6 = vmul.f32 %v903_v3, %v5894_v56 }
 0x894   :  { %v909_v7 = vsub.f32 %v899_v61, %v907_v6 }
 0x896   :  { %v911_v8 = vmul.f32 %v909_v7, %v909_v7 }
 0x898   :  { %v913_v9 = vsel %vm186_vm0, %v911_v8, 0.0 }
 0x899   :  { %914 = vadd.xlane.f32.xlu0 %v913_v9  ;;  %v906_v10 = vpop.xlane.xlu1 %905 }
 0x89a   :  { %v908_v12 = vmul.f32 %v906_v10, %v5894_v56 }
 0x89c   :  { %v910_v14 = vsub.f32 %v900_v1, %v908_v12 }
 0x89e   :  { %v912_v15 = vmul.f32 %v910_v14, %v910_v14 }
 0x8a0   :  { %v916_v16 = vsel %vm186_vm0, %v912_v15, 0.0 }
 0x8a1   :  { %917 = vadd.xlane.f32.xlu1 %v916_v16 }
 0x90c   :  { %v915_v11 = vpop.xlane.xlu0 %914 }
 0x90d   :  { %v919_v24 = vmul.f32 %v915_v11, %v5894_v56 }
 0x90f   :  { %v921_v25 = vadd.f32 1e-05, %v919_v24 }
 0x911   :  { %5274 = vrsqrt.f32 %v921_v25  ;;  %vm929_vm12 = vweird.f32 %v921_v25 }
 0x914   :  { %v918_v26 = vpop.xlane.xlu1 %917 }
 0x915   :  { %v920_v27 = vmul.f32 %v918_v26, %v5894_v56  ;;  %v4779_v26 = vld [vmem:[%s5609_s14 + $0x20] sm:$0xff] }
 0x917   :  { %v5275_v28 = vpop.eup %5274  ;;  %v922_v29 = vadd.f32 1e-05, %v920_v27 }
 0x918   :  { %v924_v30 = vmul.f32 %v5275_v28, %v921_v25  ;;  %vm930_vm11 = vweird.f32 %v5275_v28 }
 0x919   :  { %5276 = vrsqrt.f32 %v922_v29  ;;  %vm931_vm13 = vmor %vm929_vm12, %vm930_vm11  ;;  %vm939_vm15 = vweird.f32 %v922_v29 }
 0x91a   :  { %v925_v31 = vmul.f32 %v5275_v28, %v924_v30 }
 0x91c   :  { %v926_v32 = vmul.f32 0.5, %v925_v31 }
 0x91e   :  { %v927_v33 = vsub.f32 1.5, %v926_v32 }
 0x91f   :  { %v5277_v34 = vpop.eup %5276 }
 0x920   :  { %v928_v35 = vmul.f32 %v5275_v28, %v927_v33  ;;  %v934_v36 = vmul.f32 %v5277_v34, %v922_v29  ;;  %vm940_vm14 = vweird.f32 %v5277_v34 }
 0x921   :  { %vm941_vm3 = vmor %vm939_vm15, %vm940_vm14  ;;  %vm2315_vm14 = vcmask 259072  }
 0x922   :  { %v932_v38 = vsel %vm931_vm13, %v5275_v28, %v928_v35  ;;  %v935_v39 = vmul.f32 %v5277_v34, %v934_v36  ;;  %vm1856_vm13 = vcmask 1045504  }
 0x923   :  { %v943_v40 = vmul.f32 %v932_v38, %v909_v7 }
 0x924   :  { %v936_v43 = vmul.f32 0.5, %v935_v39 }
 0x925   :  { %v948_v44 = vmul.f32 %v5202_v37, %v943_v40 }
 0x926   :  { %v937_v45 = vsub.f32 1.5, %v936_v43 }
 0x927   :  { %v953_v46 = vadd.f32 %v5203_v41, %v948_v44 }
 0x928   :  { %v938_v47 = vmul.f32 %v5277_v34, %v937_v45  ;;  %v5470_v45 = vld [vmem:[%s5574_s13] sm:$0xff] }
 0x929   :  { %v5945_v49 = vmul.f32 %v953_v46, %v5915_v42 }
 0x92a   :  { %v942_v50 = vsel %vm941_vm3, %v5277_v34, %v938_v47 }
 0x92b   :  { %4786 = vmatmul.msk.f32.vlgmr.msrb.gmra.mxu3 %vm186_vm0, %v5945_v49  ;;  %v944_v13 = vmul.f32 %v942_v50, %v910_v14 }
 0x92d   :  { %v949_v51 = vmul.f32 %v5202_v37, %v944_v13 }
 0x92f   :  { %v954_v52 = vadd.f32 %v5203_v41, %v949_v51 }
 0x931   :  { %v5950_v53 = vmul.f32 %v954_v52, %v5919_v48 }
 0x933   :  { %4787 = vmatmul.msk.f32.gmra.mxu3 %vm186_vm0, %v5950_v53 }
 0x9ae   :  { %v1001_v4 = vpop.f32.mrf.mxu3 }
 0x9af   :  { %v1002_v54 = vadd.f32 %v5204_v17, %v1001_v4 }
 0x9b1   :  { %1009 = vrot.lane.b32.xlu1 %v1002_v54, %s5540_s0 }
 0x9b6   :  { %v1004_v55 = vpop.f32.mrf.mxu3 }
 0x9b7   :  { %v1005_v57 = vadd.f32 %v5204_v17, %v1004_v55 }
 0x9b9   :  { %1011 = vrot.lane.b32.xlu2 %v1005_v57, %s5540_s0  ;;  %v5969_v15 = vpack.i.bf16 %v1002_v54, %v1005_v57 }
 0xa13   :  { %v1012_v5 = vpop.permute.xlu2 %1011 }
 0xa14   :  { %4788 = vmatpush.xpose.msk.msra.mxu2 %vm222_vm1, %v1012_v5 }
 0xa23   :  { %v1010_v58 = vpop.permute.xlu1 %1009 }
 0xa24   :  { %4789 = vmatpush.xpose.msk.msra.mxu2 %vm222_vm1, %v1010_v58 }
 0xa27   :  { %4790 = vmatmul.msk.f32.vlgmr.msra.gmra.mxu2 %vm222_vm1, %v1002_v54 }
 0xa2f   :  { %4791 = vmatmul.msk.f32.gmra.mxu2 %vm222_vm1, %v1005_v57 }
 0xaaa   :  { %v1038_v59 = vpop.f32.mrf.mxu2 }
 0xaab   :  { %v1044_v60 = vmul.f32 0.35355338, %v1038_v59 }
 0xaad   :  { %v1046_v61 = vadd.f32 %v1044_v60, %v5802_v18 }
 0xaaf   :  { %v1048_v62 = vsel %vm258_vm2, %v1046_v61, -inf }
 0xab0   :  { %1049 = vmax.xlane.f32.xlu2 %v1048_v62 }
 0xab2   :  { %v1041_v63 = vpop.f32.mrf.mxu2 }
 0xab3   :  { %v1045_v0 = vmul.f32 0.35355338, %v1041_v63  ;;  %v5471_v63 = vld [vmem:[%s5574_s13 + $0x8] sm:$0xff]  ;;  %s6846_s13 = sld [smem:[#allocation10_spill]] }
 0xab5   :  { %v1047_v1 = vadd.f32 %v1045_v0, %v5807_v23 }
 0xab7   :  { %v1051_v2 = vsel %vm258_vm2, %v1047_v1, -inf }
 0xab8   :  { %1052 = vmax.xlane.f32.xlu1 %v1051_v2 }
 0xad1   :  { %1111 = vrot.lane.b32.xlu1 %v1005_v57, %s5546_s23 }
 0xad9   :  { %1267 = vrot.lane.b32.xlu1 %v1002_v54, %s5543_s16 }
 0xb23   :  { %v1050_v3 = vpop.xlane.xlu2 %1049 }
 0xb24   :  { %v1054_v6 = vsub.f32 %v1046_v61, %v1050_v3 }
 0xb26   :  { %v1056_v7 = vmul.f32 1.442695, %v1054_v6 }
 0xb28   :  { %5278 = vpow2.f32 %v1056_v7 }
 0xb2b   :  { %v1053_v8 = vpop.xlane.xlu1 %1052 }
 0xb2c   :  { %v1055_v18 = vsub.f32 %v1047_v1, %v1053_v8 }
 0xb2e   :  { %v5279_v9 = vpop.eup %5278  ;;  %v1058_v10 = vmul.f32 1.442695, %v1055_v18 }
 0xb2f   :  { %v1060_v12 = vsel %vm258_vm2, %v5279_v9, 0.0 }
 0xb30   :  { %5280 = vpow2.f32 %v1058_v10  ;;  %1061 = vadd.xlane.f32.xlu0 %v1060_v12 }
 0xb36   :  { %v5281_v23 = vpop.eup %5280 }
 0xb37   :  { %v1063_v14 = vsel %vm258_vm2, %v5281_v23, 0.0 }
 0xb38   :  { %1064 = vadd.xlane.f32.xlu2 %v1063_v14 }
 0xb43   :  { %v1112_v16 = vpop.permute.xlu1 %1111 }
 0xb44   :  { %5117 = vrot.lane.b32.xlu0 %v5969_v15, %s5541_s5  ;;  %4794 = vmatpush.xpose.msk.msra.mxu1 %vm222_vm1, %v1112_v16 }
 0xb4b   :  { %v1268_v37 = vpop.permute.xlu1 %1267 }
 0xb4c   :  { %1398 = vrot.lane.b32.xlu0 %v1002_v54, %s5544_s18 }
 0xb50   :  { %1400 = vrot.lane.b32.xlu2 %v1005_v57, %s5544_s18 }
 0xb54   :  { %1394 = vrot.lane.b32.xlu0 %v1002_v54, %s5547_s26 }
 0xb58   :  { %1105 = vrot.lane.b32.xlu2 %v1002_v54, %s5542_s15 }
 0xb5c   :  { %1109 = vrot.lane.b32.xlu0 %v1002_v54, %s5546_s23 }
 0xb60   :  { %1107 = vrot.lane.b32.xlu2 %v1005_v57, %s5542_s15 }
 0xb64   :  { %1396 = vrot.lane.b32.xlu0 %v1005_v57, %s5547_s26 }
 0xb68   :  { %1263 = vrot.lane.b32.xlu2 %v1002_v54, %s5545_s22 }
 0xb6c   :  { %1269 = vrot.lane.b32.xlu0 %v1005_v57, %s5543_s16 }
 0xb74   :  { %1265 = vrot.lane.b32.xlu0 %v1005_v57, %s5545_s22 }
 0xba3   :  { %v1062_v19 = vpop.xlane.xlu0 %1061 }
 0xba4   :  { %5282 = vrcp.f32 %v1062_v19 }
 0xbaa   :  { %v5283_v22 = vpop.eup %5282 }
 0xbab   :  { %v1065_v20 = vpop.xlane.xlu2 %1064  ;;  %v1068_v25 = vmul.f32 %v5283_v22, %v5279_v9 }
 0xbac   :  { %5284 = vrcp.f32 %v1065_v20 }
 0xbb2   :  { %v5285_v29 = vpop.eup %5284 }
 0xbb3   :  { %v1401_v27 = vpop.permute.xlu2 %1400  ;;  %v1069_v30 = vmul.f32 %v5285_v29, %v5281_v23 }
 0xbb6   :  { %v5118_v21 = vpop.permute.xlu0 %5117 }
 0xbb7   :  { %v5119_v11 = vunpack.i.l.bf16 %v5118_v21  ;;  %v5120_v24 = vunpack.i.h.bf16 %v5118_v21 }
 0xbb9   :  { %1096 = vmatpush.msrb.mxu0 %v5119_v11 }
 0xbbb   :  { %1097 = vmatpush.msrb.mxu0 %v5120_v24  ;;  %v1106_v33 = vpop.permute.xlu2 %1105 }
 0xbbc   :  { %4792 = vmatmul.msk.f32.vlgmr.msrb.gmra.mxu0 %vm258_vm2, %v1068_v25 }
 0xbbd   :  { %1255 = vmatpush.msra.mxu0 %v4779_v26 }
 0xbbe   :  { %v1399_v28 = vpop.permute.xlu0 %1398 }
 0xbbf   :  { %4812 = vmatpush.xpose.msk.msrb.mxu0 %vm222_vm1, %v1401_v27 }
 0xbc3   :  { %4813 = vmatpush.xpose.msk.msrb.mxu0 %vm222_vm1, %v1399_v28  ;;  %v1108_v35 = vpop.permute.xlu2 %1107 }
 0xbc4   :  { %4793 = vmatmul.msk.f32.gmra.mxu0 %vm258_vm2, %v1069_v30 }
 0xbc6   :  { %v1395_v31 = vpop.permute.xlu0 %1394 }
 0xbcb   :  { %v1264_v38 = vpop.permute.xlu2 %1263 }
 0xbce   :  { %v1110_v32 = vpop.permute.xlu0 %1109 }
 0xbcf   :  { %4795 = vmatpush.xpose.msk.msra.mxu1 %vm222_vm1, %v1110_v32 }
 0xbd2   :  { %4796 = vmatmul.msk.f32.vlgmr.msra.gmra.mxu1 %vm222_vm1, %v1106_v33 }
 0xbd6   :  { %v1397_v34 = vpop.permute.xlu0 %1396 }
 0xbda   :  { %4797 = vmatmul.msk.f32.gmra.mxu1 %vm222_vm1, %v1108_v35 }
 0xbde   :  { %v1270_v36 = vpop.permute.xlu0 %1269 }
 0xbdf   :  { %4804 = vmatpush.xpose.msk.msrb.mxu1 %vm222_vm1, %v1270_v36 }
 0xbe3   :  { %4805 = vmatpush.xpose.msk.msrb.mxu1 %vm222_vm1, %v1268_v37 }
 0xbe6   :  { %4806 = vmatmul.msk.f32.vlgmr.msrb.gmra.mxu1 %vm222_vm1, %v1264_v38  ;;  %v1266_v39 = vpop.permute.xlu0 %1265 }
 0xbee   :  { %4807 = vmatmul.msk.f32.gmra.mxu1 %vm222_vm1, %v1266_v39 }
 0xc39   :  { %v1099_v40 = vpop.f32.mrf.mxu0 }
 0xc3a   :  { %4802 = vmatmul.msk.f32.vlgmr.msra.gmra.mxu0 %vm222_vm1, %v1099_v40 }
 0xc41   :  { %v1102_v41 = vpop.f32.mrf.mxu0 }
 0xc42   :  { %4803 = vmatmul.msk.f32.gmra.mxu0 %vm222_vm1, %v1102_v41 }
 0xc4a   :  { %4814 = vmatmul.msk.f32.vlgmr.msrb.gmra.mxu0 %vm222_vm1, %v1395_v31 }
 0xc4f   :  { %v1138_v43 = vpop.f32.mrf.mxu1 }
 0xc50   :  { %v1144_v44 = vmul.f32 0.35355338, %v1138_v43 }
 0xc52   :  { %4815 = vmatmul.msk.f32.gmra.mxu0 %vm222_vm1, %v1397_v34  ;;  %v1146_v46 = vadd.f32 %v5470_v45, %v1144_v44 }
 0xc54   :  { %v1148_v47 = vsel %vm258_vm2, %v1146_v46, -inf }
 0xc55   :  { %1149 = vmax.xlane.f32.xlu2 %v1148_v47 }
 0xc57   :  { %v1141_v50 = vpop.f32.mrf.mxu1 }
 0xc58   :  { %v1145_v58 = vmul.f32 0.35355338, %v1141_v50 }
 0xc5a   :  { %v1147_v0 = vadd.f32 %v5471_v63, %v1145_v58  ;;  %v1737_v58 = vld [vmem:[%s6846_s13 + $0x8] sm:$0xff] }
 0xc5c   :  { %v1151_v8 = vsel %vm258_vm2, %v1147_v0, -inf }
 0xc63   :  { %v1296_v13 = vpop.f32.mrf.mxu1 }
 0xc64   :  { %v1302_v51 = vmul.f32 0.35355338, %v1296_v13 }
 0xc66   :  { %v1304_v52 = vadd.f32 %v5470_v45, %v1302_v51 }
 0xc68   :  { %v1306_v17 = vsel %vm258_vm2, %v1304_v52, -inf }
 0xc69   :  { %1307 = vmax.xlane.f32.xlu2 %v1306_v17 }
 0xc6b   :  { %v1299_v1 = vpop.f32.mrf.mxu1 }
 0xc6c   :  { %v1303_v6 = vmul.f32 0.35355338, %v1299_v1 }
 0xc6e   :  { %v1305_v9 = vadd.f32 %v5471_v63, %v1303_v6 }
 0xc70   :  { %v1309_v12 = vsel %vm258_vm2, %v1305_v9, -inf }
 0xc81   :  { %5122 = vrot.lane.b32.xlu2 %v5969_v15, %s6820_s2 }
 0xc89   :  { %5132 = vrot.lane.b32.xlu2 %v5969_v15, %s6822_s1 }
 0xcb7   :  { %v6007_v4 = vpop.f32.mrf.mxu0 }
 0xcbf   :  { %v6009_v54 = vpop.f32.mrf.mxu0 }
 0xcc7   :  { %v1427_v55 = vpop.f32.mrf.mxu0 }
 0xcc8   :  { %v1433_v57 = vmul.f32 0.35355338, %v1427_v55  ;;  %v1150_v61 = vpop.xlane.xlu2 %1149 }
 0xcc9   :  { %v1154_v3 = vsub.f32 %v1146_v46, %v1150_v61 }
 0xcca   :  { %v1435_v5 = vadd.f32 %v5470_v45, %v1433_v57  ;;  %v1739_v57 = vld [vmem:[%s6846_s13 + $0x18] sm:$0xff] }
 0xccb   :  { %v1156_v18 = vmul.f32 1.442695, %v1154_v3  ;;  %v4780_v3 = vld [vmem:[%s5609_s14 + $0x28] sm:$0xff] }
 0xccc   :  { %v1437_v59 = vsel %vm258_vm2, %v1435_v5, -inf  ;;  %1226 = vmatpush.msrb.mxu2 %v4780_v3 }
 0xccd   :  { %1438 = vmax.xlane.f32.xlu1 %v1437_v59  ;;  %5286 = vpow2.f32 %v1156_v18  ;;  %v1736_v59 = vld [vmem:[%s6846_s13] sm:$0xff] }
 0xccf   :  { %v1430_v60 = vpop.f32.mrf.mxu0 }
 0xcd0   :  { %v1434_v62 = vmul.f32 0.35355338, %v1430_v60 }
 0xcd2   :  { %v1436_v2 = vadd.f32 %v5471_v63, %v1434_v62 }
 0xcd3   :  { %v5287_v23 = vpop.eup %5286 }
 0xcd4   :  { %v1440_v7 = vsel %vm258_vm2, %v1436_v2, -inf  ;;  %v1160_v16 = vsel %vm258_vm2, %v5287_v23, 0.0 }
 0xcd5   :  { %1441 = vmax.xlane.f32.xlu0 %v1440_v7  ;;  %1152 = vmax.xlane.f32.xlu1 %v1151_v8  ;;  %v6033_v7 = vld [vmem:[%s6847_s3] sm:$0xff] }
 0xcdc   :  { %v1308_v10 = vpop.xlane.xlu2 %1307 }
 0xcdd   :  { %1310 = vmax.xlane.f32.xlu0 %v1309_v12  ;;  %v1312_v33 = vsub.f32 %v1304_v52, %v1308_v10  ;;  %v6039_v10 = vld [vmem:[%s6847_s3 + $0x8] sm:$0x3f]  ;;  %s6862_s3 = sld [smem:[#allocation20_spill]] }
 0xcdf   :  { %v1314_v34 = vmul.f32 1.442695, %v1312_v33 }
 0xce4   :  { %v5123_v14 = vpop.permute.xlu2 %5122 }
 0xce5   :  { %v5124_v19 = vunpack.i.l.bf16 %v5123_v14  ;;  %1161 = vadd.xlane.f32.xlu0 %v1160_v16  ;;  %v5125_v20 = vunpack.i.h.bf16 %v5123_v14 }
 0xce7   :  { %1485 = vmatpush.msra.mxu1 %v5124_v19 }
 0xce9   :  { %1486 = vmatpush.msra.mxu1 %v5125_v20  ;;  %v4782_v20 = vld [vmem:[%s5609_s14 + $0x38] sm:$0xff] }
 0xceb   :  { %1769 = vmatpush.msrb.mxu1 %v1739_v57 }
 0xcec   :  { %v5133_v13 = vpop.permute.xlu2 %5132 }
 0xced   :  { %v5134_v17 = vunpack.i.l.bf16 %v5133_v13  ;;  %v5135_v55 = vunpack.i.h.bf16 %v5133_v13 }
 0xcf9   :  { %5127 = vrot.lane.b32.xlu0 %v5969_v15, %s5548_s28 }
 0xd40   :  { %v1439_v21 = vpop.xlane.xlu1 %1438 }
 0xd41   :  { %v1443_v22 = vsub.f32 %v1435_v5, %v1439_v21  ;;  %v1738_v5 = vld [vmem:[%s6846_s13 + $0x10] sm:$0xff] }
 0xd42   :  { %1770 = vmatpush.msrb.mxu1 %v1738_v5  ;;  %v4781_v21 = vld [vmem:[%s5609_s14 + $0x30] sm:$0xff]  ;;  %s6849_s14 = sld [smem:[#allocation6_spill]] }
 0xd43   :  { %v1445_v11 = vmul.f32 1.442695, %v1443_v22  ;;  %1384 = vmatpush.msra.mxu2 %v4781_v21  ;;  %v4821_v21 = vld [vmem:[%s5629_s6 + $0x28] sm:$0xff] }
 0xd44   :  { %1771 = vmatpush.msrb.mxu1 %v1737_v58 }
 0xd45   :  { %5288 = vpow2.f32 %v1445_v11 }
 0xd46   :  { %1772 = vmatpush.msrb.mxu1 %v1736_v59 }
 0xd48   :  { %v1442_v24 = vpop.xlane.xlu0 %1441  ;;  %v1153_v25 = vpop.xlane.xlu1 %1152 }
 0xd49   :  { %v1444_v26 = vsub.f32 %v1436_v2, %v1442_v24  ;;  %v1155_v29 = vsub.f32 %v1147_v0, %v1153_v25  ;;  %v5205_v24 = vld [vmem:[%s6848_s8] ss:$0 sm:$0xff] }
 0xd4b   :  { %v5289_v27 = vpop.eup %5288  ;;  %v1447_v28 = vmul.f32 1.442695, %v1444_v26  ;;  %v1158_v31 = vmul.f32 1.442695, %v1155_v29 }
 0xd4c   :  { %v1449_v30 = vsel %vm258_vm2, %v5289_v27, 0.0 }
 0xd4d   :  { %5290 = vpow2.f32 %v1447_v28  ;;  %1450 = vadd.xlane.f32.xlu1 %v1449_v30 }
 0xd4e   :  { %5292 = vpow2.f32 %v1158_v31 }
 0xd4f   :  { %5294 = vpow2.f32 %v1314_v34 }
 0xd50   :  { %v1311_v35 = vpop.xlane.xlu0 %1310 }
 0xd51   :  { %v1313_v37 = vsub.f32 %v1305_v9, %v1311_v35 }
 0xd53   :  { %v5291_v32 = vpop.eup %5290  ;;  %v1316_v39 = vmul.f32 1.442695, %v1313_v37 }
 0xd54   :  { %v1452_v15 = vsel %vm258_vm2, %v5291_v32, 0.0  ;;  %v5293_v36 = vpop.eup %5292 }
 0xd55   :  { %1453 = vadd.xlane.f32.xlu1 %v1452_v15  ;;  %v1163_v38 = vsel %vm258_vm2, %v5293_v36, 0.0  ;;  %v5295_v40 = vpop.eup %5294  ;;  %5296 = vpow2.f32 %v1316_v39  ;;  %v5206_v39 = vld [vmem:[%s5614_s19 + $0x1] ss:$0 sm:$0xff]  ;;  %s6850_s19 = sld [smem:[#allocation12_spill]] }
 0xd56   :  { %v1318_v43 = vsel %vm258_vm2, %v5295_v40, 0.0 }
 0xd58   :  { %v1162_v41 = vpop.xlane.xlu0 %1161 }
 0xd59   :  { %5298 = vrcp.f32 %v1162_v41 }
 0xd5b   :  { %v5297_v44 = vpop.eup %5296 }
 0xd5c   :  { %v1321_v50 = vsel %vm258_vm2, %v5297_v44, 0.0 }
 0xd5d   :  { %1164 = vadd.xlane.f32.xlu1 %v1163_v38 }
 0xd5f   :  { %v5299_v46 = vpop.eup %5298 }
 0xd60   :  { %v1168_v52 = vmul.f32 %v5299_v46, %v5287_v23 }
 0xd65   :  { %1319 = vadd.xlane.f32.xlu1 %v1318_v43 }
 0xd6b   :  { %v5128_v45 = vpop.permute.xlu0 %5127 }
 0xd6c   :  { %v5129_v47 = vunpack.i.l.bf16 %v5128_v45  ;;  %v5130_v51 = vunpack.i.h.bf16 %v5128_v45 }
 0xd6d   :  { %1322 = vadd.xlane.f32.xlu1 %v1321_v50 }
 0xd6e   :  { %1196 = vmatpush.msra.mxu3 %v5129_v47 }
 0xd70   :  { %1197 = vmatpush.msra.mxu3 %v5130_v51 }
 0xd71   :  { %4798 = vmatmul.msk.f32.vlgmr.msra.gmra.mxu3 %vm258_vm2, %v1168_v52 }
 0xd72   :  { %1354 = vmatpush.msrb.mxu3 %v5134_v17 }
 0xd74   :  { %1355 = vmatpush.msrb.mxu3 %v5135_v55  ;;  %v6076_v55 = vld [vmem:[%s6849_s14] sm:$0xff] }
 0xd76   :  { %1515 = vmatpush.msra.mxu3 %v4782_v20  ;;  %v4822_v20 = vld [vmem:[%s5629_s6 + $0x30] sm:$0xff] }
 0xdc0   :  { %v1451_v60 = vpop.xlane.xlu1 %1450 }
 0xdc1   :  { %5300 = vrcp.f32 %v1451_v60 }
 0xdc7   :  { %v5301_v61 = vpop.eup %5300 }
 0xdc8   :  { %v1457_v62 = vmul.f32 %v5301_v61, %v5289_v27  ;;  %v1454_v63 = vpop.xlane.xlu1 %1453 }
 0xdc9   :  { %5302 = vrcp.f32 %v1454_v63 }
 0xdca   :  { %4816 = vmatmul.msk.f32.vlgmr.msra.gmra.mxu1 %vm258_vm2, %v1457_v62 }
 0xdcf   :  { %v5303_v0 = vpop.eup %5302 }
 0xdd0   :  { %v1165_v1 = vpop.xlane.xlu1 %1164  ;;  %v1458_v2 = vmul.f32 %v5303_v0, %v5291_v32  ;;  %v6089_v0 = vld [vmem:[%s6849_s14 + $0x8] sm:$0x3f] }
 0xdd1   :  { %5304 = vrcp.f32 %v1165_v1 }
 0xdd2   :  { %4817 = vmatmul.msk.f32.gmra.mxu1 %vm258_vm2, %v1458_v2 }
 0xdd7   :  { %v5305_v6 = vpop.eup %5304 }
 0xdd8   :  { %v1320_v8 = vpop.xlane.xlu1 %1319  ;;  %v1169_v18 = vmul.f32 %v5305_v6, %v5293_v36 }
 0xdd9   :  { %5306 = vrcp.f32 %v1320_v8 }
 0xdda   :  { %4799 = vmatmul.msk.f32.gmra.mxu3 %vm258_vm2, %v1169_v18  ;;  %4840 = vmatmul.msk.f32.vlgmr.msrb.gmra.mxu1 %vm186_vm0, %v6033_v7 }
 0xddf   :  { %v5307_v9 = vpop.eup %5306 }
 0xde0   :  { %v1326_v12 = vmul.f32 %v5307_v9, %v5295_v40  ;;  %v1323_v23 = vpop.xlane.xlu1 %1322 }
 0xde1   :  { %5308 = vrcp.f32 %v1323_v23 }
 0xde2   :  { %4808 = vmatmul.msk.f32.vlgmr.msrb.gmra.mxu3 %vm258_vm2, %v1326_v12  ;;  %4841 = vmatmul.msk.f32.gmra.mxu1 %vm186_vm0, %v6039_v10 }
 0xde7   :  { %v5309_v14 = vpop.eup %5308 }
 0xde8   :  { %v1327_v16 = vmul.f32 %v5309_v14, %v5297_v44 }
 0xdea   :  { %4809 = vmatmul.msk.f32.gmra.mxu3 %vm258_vm2, %v1327_v16 }
 0xdf4   :  { %v1199_v19 = vpop.f32.mrf.mxu3 }
 0xdf5   :  { %4800 = vmatmul.msk.f32.vlgmr.msrb.gmra.mxu2 %vm222_vm1, %v1199_v19  ;;  %v4823_v19 = vld [vmem:[%s5629_s6 + $0x38] sm:$0xff] }
 0xdf6   :  { %1631 = vmatpush.msrb.mxu2 %v4823_v19 }
 0xdf8   :  { %1632 = vmatpush.msrb.mxu2 %v4822_v20 }
 0xdfa   :  { %1633 = vmatpush.msrb.mxu2 %v4821_v21 }
 0xe47   :  { %v1488_v22 = vpop.f32.mrf.mxu1 }
 0xe48   :  { %4818 = vmatmul.msk.f32.vlgmr.msra.gmra.mxu3 %vm222_vm1, %v1488_v22  ;;  %v4820_v22 = vld [vmem:[%s5629_s6 + $0x20] sm:$0xff]  ;;  %s6853_s6 = sld [smem:[#allocation8_spill]] }
 0xe49   :  { %1634 = vmatpush.msrb.mxu2 %v4820_v22 }
 0xe4f   :  { %v1491_v11 = vpop.f32.mrf.mxu1 }
 0xe50   :  { %4819 = vmatmul.msk.f32.gmra.mxu3 %vm222_vm1, %v1491_v11 }
 0xe57   :  { %v1774_v25 = vpop.f32.mrf.mxu1 }
 0xe58   :  { %v6051_v26 = vadd.f32 %v5205_v24, %v1774_v25 }
 0xe5a   :  { %1782 = vrot.lane.b32.xlu0 %v6051_v26, %s5540_s0 }
 0xe5d   :  { %v1202_v27 = vpop.f32.mrf.mxu3 }
 0xe5e   :  { %4801 = vmatmul.msk.f32.gmra.mxu2 %vm222_vm1, %v1202_v27 }
 0xe5f   :  { %v1777_v28 = vpop.f32.mrf.mxu1 }
 0xe60   :  { %v6056_v29 = vadd.f32 %v5205_v24, %v1777_v28 }
 0xe62   :  { %1784 = vrot.lane.b32.xlu2 %v6056_v29, %s5540_s0 }
 0xe65   :  { %v1357_v30 = vpop.f32.mrf.mxu3 }
 0xe66   :  { %4810 = vmatmul.msk.f32.vlgmr.msra.gmra.mxu2 %vm222_vm1, %v1357_v30 }
 0xe6d   :  { %v1360_v31 = vpop.f32.mrf.mxu3 }
 0xe6e   :  { %4811 = vmatmul.msk.f32.gmra.mxu2 %vm222_vm1, %v1360_v31 }
 0xe78   :  { %v1228_v15 = vpop.f32.mrf.mxu2 }
 0xe79   :  { %v1258_v35 = vadd.f32 %v6007_v4, %v1228_v15 }
 0xebc   :  { %v1785_v32 = vpop.permute.xlu2 %1784 }
 0xebd   :  { %4842 = vmatpush.xpose.msk.msrb.mxu3 %vm222_vm1, %v1785_v32 }
 0xecb   :  { %v1517_v36 = vpop.f32.mrf.mxu3 }
 0xecc   :  { %v1783_v33 = vpop.permute.xlu0 %1782 }
 0xecd   :  { %4843 = vmatpush.xpose.msk.msrb.mxu3 %vm222_vm1, %v1783_v33 }
 0xed0   :  { %4844 = vmatmul.msk.f32.vlgmr.msrb.gmra.mxu3 %vm222_vm1, %v6051_v26 }
 0xed3   :  { %v1520_v50 = vpop.f32.mrf.mxu3 }
 0xed8   :  { %4845 = vmatmul.msk.f32.gmra.mxu3 %vm222_vm1, %v6056_v29 }
 0xee1   :  { %v1231_v34 = vpop.f32.mrf.mxu2 }
 0xee2   :  { %v1261_v43 = vadd.f32 %v6009_v54, %v1231_v34 }
 0xee9   :  { %v1386_v37 = vpop.f32.mrf.mxu2 }
 0xeea   :  { %v1392_v38 = vadd.f32 %v1386_v37, %v1258_v35 }
 0xeec   :  { %v1523_v40 = vadd.f32 %v1517_v36, %v1392_v38 }
 0xeee   :  { %v1528_v41 = vadd.f32 %v5206_v39, %v1523_v40 }
 0xef0   :  { %v1530_v44 = vadd.f32 %v1528_v41, %v5945_v49  ;;  %v5207_v41 = vld [vmem:[%s5619_s24 + $0x1] ss:$0 sm:$0xff]  ;;  %s6851_s24 = sld [smem:[#allocation13_spill]] }
 0xef1   :  { %v1389_v45 = vpop.f32.mrf.mxu2 }
 0xef2   :  { %v1393_v46 = vadd.f32 %v1389_v45, %v1261_v43  ;;  %v1532_v47 = vsel %vm186_vm0, %v1530_v44, 0.0  ;;  %v5208_v45 = vld [vmem:[%s5624_s30 + $0x1] ss:$0 sm:$0xff]  ;;  %s6852_s30 = sld [smem:[#allocation16_spill]] }
 0xef3   :  { %1533 = vadd.xlane.f32.xlu1 %v1532_v47 }
 0xef4   :  { %v1524_v13 = vadd.f32 %v1520_v50, %v1393_v46 }
 0xef6   :  { %v1529_v51 = vadd.f32 %v5206_v39, %v1524_v13 }
 0xef8   :  { %v1531_v4 = vadd.f32 %v1529_v51, %v5950_v53 }
 0xefa   :  { %v1535_v52 = vsel %vm186_vm0, %v1531_v4, 0.0 }
 0xefb   :  { %1536 = vadd.xlane.f32.xlu2 %v1535_v52 }
 0xf53   :  { %v1811_v17 = vpop.f32.mrf.mxu3 }
 0xf54   :  { %v1817_v54 = vmul.f32 0.35355338, %v1811_v17 }
 0xf56   :  { %v1819_v49 = vadd.f32 %v1817_v54, %v6076_v55 }
 0xf58   :  { %v1822_v57 = vsel %vm1821_vm4, %v1819_v49, -inf }
 0xf59   :  { %1823 = vmax.xlane.f32.xlu0 %v1822_v57 }
 0xf5b   :  { %v1814_v53 = vpop.f32.mrf.mxu3 }
 0xf5c   :  { %v1818_v61 = vmul.f32 0.35355338, %v1814_v53  ;;  %v4832_v53 = vld [vmem:[%s5639_s20 + $0x78] sm:$0xff] }
 0xf5d   :  { %1661 = vmatpush.msra.mxu0 %v4832_v53 }
 0xf5e   :  { %v1820_v2 = vadd.f32 %v1818_v61, %v6089_v0  ;;  %v4830_v61 = vld [vmem:[%s5639_s20 + $0x68] sm:$0xff] }
 0xf60   :  { %v1826_v6 = vsel %vm1825_vm5, %v1820_v2, -inf }
 0xf66   :  { %v1534_v5 = vpop.xlane.xlu1 %1533 }
 0xf67   :  { %v1538_v58 = vmul.f32 %v1534_v5, %v5894_v56 }
 0xf69   :  { %v6081_v59 = vsub.f32 %v1530_v44, %v1538_v58 }
 0xf6b   :  { %v1542_v60 = vmul.f32 %v6081_v59, %v6081_v59 }
 0xf6d   :  { %1845 = vrot.lane.b32.xlu0 %v6051_v26, %s5541_s5  ;;  %v1544_v62 = vsel %vm186_vm0, %v1542_v60, 0.0  ;;  %v4831_v60 = vld [vmem:[%s5639_s20 + $0x70] sm:$0xff] }
 0xf6e   :  { %1545 = vadd.xlane.f32.xlu1 %v1544_v62  ;;  %v1537_v63 = vpop.xlane.xlu2 %1536  ;;  %1662 = vmatpush.msra.mxu0 %v4831_v60  ;;  %v4829_v62 = vld [vmem:[%s5639_s20 + $0x60] sm:$0xff] }
 0xf6f   :  { %v1539_v1 = vmul.f32 %v1537_v63, %v5894_v56  ;;  %v4828_v63 = vld [vmem:[%s5639_s20 + $0x58] sm:$0xff] }
 0xf70   :  { %1663 = vmatpush.msra.mxu0 %v4830_v61 }
 0xf71   :  { %v6093_v3 = vsub.f32 %v1531_v4, %v1539_v1  ;;  %v4827_v1 = vld [vmem:[%s5639_s20 + $0x50] sm:$0xff] }
 0xf72   :  { %1664 = vmatpush.msra.mxu0 %v4829_v62 }
 0xf73   :  { %v1543_v8 = vmul.f32 %v6093_v3, %v6093_v3 }
 0xf74   :  { %1665 = vmatpush.msra.mxu0 %v4828_v63 }
 0xf75   :  { %1886 = vrot.lane.b32.xlu0 %v6051_v26, %s5546_s23  ;;  %v1547_v18 = vsel %vm186_vm0, %v1543_v8, 0.0 }
 0xf76   :  { %1827 = vmax.xlane.f32.xlu1 %v1826_v6  ;;  %1666 = vmatpush.msra.mxu0 %v4827_v1 }
 0xf7d   :  { %1884 = vrot.lane.b32.xlu0 %v6056_v29, %s5542_s15 }
 0xf7e   :  { %1548 = vadd.xlane.f32.xlu1 %v1547_v18 }
 0xf85   :  { %2045 = vrot.lane.b32.xlu0 %v6051_v26, %s5543_s16 }
 0xf8d   :  { %2173 = vrot.lane.b32.xlu0 %v6051_v26, %s5547_s26 }
 0xfcc   :  { %v1824_v9 = vpop.xlane.xlu0 %1823 }
 0xfcd   :  { %v1829_v12 = vsub.f32 %v1819_v49, %v1824_v9 }
 0xfcf   :  { %v1831_v23 = vmul.f32 1.442695, %v1829_v12 }
 0xfd1   :  { %5310 = vpow2.f32 %v1831_v23  ;;  %v1741_v23 = vld [vmem:[%s6850_s19] sm:$0xff] }
 0xfd7   :  { %v6107_v14 = vpop.eup %5310 }
 0xfd8   :  { %v1835_v16 = vsel %vm1821_vm4, %v6107_v14, 0.0 }
 0xfd9   :  { %1836 = vadd.xlane.f32.xlu1 %v1835_v16 }
 0xfdf   :  { %v1846_v9 = vpop.permute.xlu0 %1845 }
 0xfe1   :  { %v1546_v11 = vpop.xlane.xlu1 %1545 }
 0xfe2   :  { %v1550_v24 = vmul.f32 %v1546_v11, %v5894_v56 }
 0xfe4   :  { %v1552_v25 = vadd.f32 1e-05, %v1550_v24 }
 0xfe6   :  { %5312 = vrsqrt.f32 %v1552_v25  ;;  %vm1560_vm7 = vweird.f32 %v1552_v25 }
 0xfe7   :  { %v1887_v24 = vpop.permute.xlu0 %1886 }
 0xfe9   :  { %v1828_v27 = vpop.xlane.xlu1 %1827 }
 0xfea   :  { %v1830_v28 = vsub.f32 %v1820_v2, %v1828_v27  ;;  %v4826_v2 = vld [vmem:[%s5639_s20 + $0x48] sm:$0xff]  ;;  %v5209_v27 = vld [vmem:[%s5634_s12 + $0x1] ss:$0 sm:$0xff]  ;;  %s6854_s12 = sld [smem:[#allocation14_spill]] }
 0xfeb   :  { %1667 = vmatpush.msra.mxu0 %v4826_v2 }
 0xfec   :  { %v5313_v30 = vpop.eup %5312  ;;  %v1833_v31 = vmul.f32 1.442695, %v1830_v28 }
 0xfed   :  { %v1555_v32 = vmul.f32 %v5313_v30, %v1552_v25  ;;  %vm1561_vm6 = vweird.f32 %v5313_v30 }
 0xfee   :  { %5314 = vpow2.f32 %v1833_v31  ;;  %vm1562_vm8 = vmor %vm1560_vm7, %vm1561_vm6 }
 0xfef   :  { %v1556_v33 = vmul.f32 %v5313_v30, %v1555_v32  ;;  %v1885_v28 = vpop.permute.xlu0 %1884 }
 0xff1   :  { %v1557_v15 = vmul.f32 0.5, %v1556_v33  ;;  %v1549_v34 = vpop.xlane.xlu1 %1548 }
 0xff2   :  { %v1551_v35 = vmul.f32 %v1549_v34, %v5894_v56  ;;  %1847 = vrot.lane.b32.xlu1 %v6056_v29, %s5541_s5 }
 0xff3   :  { %v1558_v36 = vsub.f32 1.5, %v1557_v15 }
 0xff4   :  { %v6119_v37 = vpop.eup %5314  ;;  %v1553_v38 = vadd.f32 1e-05, %v1551_v35 }
 0xff5   :  { %v1559_v39 = vmul.f32 %v5313_v30, %v1558_v36  ;;  %v1838_v40 = vsel %vm1825_vm5, %v6119_v37, 0.0 }
 0xff6   :  { %5316 = vrsqrt.f32 %v1553_v38  ;;  %1839 = vadd.xlane.f32.xlu2 %v1838_v40  ;;  %vm1570_vm11 = vweird.f32 %v1553_v38 }
 0xff7   :  { %v1563_v43 = vsel %vm1562_vm8, %v5313_v30, %v1559_v39  ;;  %v2046_v33 = vpop.permute.xlu0 %2045 }
 0xff8   :  { %v1574_v44 = vmul.f32 %v1563_v43, %v6081_v59 }
 0xffa   :  { %v1579_v46 = vmul.f32 %v5207_v41, %v1574_v44  ;;  %1882 = vrot.lane.b32.xlu1 %v6051_v26, %s5542_s15 }
 0xffc   :  { %v5317_v47 = vpop.eup %5316  ;;  %v1584_v50 = vadd.f32 %v5208_v45, %v1579_v46 }
 0xffd   :  { %v1565_v13 = vmul.f32 %v5317_v47, %v1553_v38  ;;  %vm1571_vm9 = vweird.f32 %v5317_v47 }
 0xffe   :  { %v6129_v51 = vmul.f32 %v1584_v50, %v5915_v42  ;;  %vm1572_vm12 = vmor %vm1570_vm11, %vm1571_vm9 }
 0xfff   :  { %v1566_v4 = vmul.f32 %v5317_v47, %v1565_v13  ;;  %v2174_v40 = vpop.permute.xlu0 %2173 }
0x1000   :  { %4836 = vmatmul.msk.f32.vlgmr.msrb.gmra.mxu2 %vm186_vm0, %v6129_v51 }
0x1001   :  { %v1567_v52 = vmul.f32 0.5, %v1566_v4 }
0x1002   :  { %2047 = vrot.lane.b32.xlu1 %v6056_v29, %s5543_s16 }
0x1003   :  { %v1568_v17 = vsub.f32 1.5, %v1567_v52 }
0x1005   :  { %v1569_v54 = vmul.f32 %v5317_v47, %v1568_v17 }
0x1007   :  { %v1573_v49 = vsel %vm1572_vm12, %v5317_v47, %v1569_v54 }
0x1008   :  { %v1575_v57 = vmul.f32 %v1573_v49, %v6093_v3  ;;  %v4825_v3 = vld [vmem:[%s5639_s20 + $0x40] sm:$0xff]  ;;  %s6855_s20 = sld [smem:[#allocation15_spill]] }
0x1009   :  { %1668 = vmatpush.msra.mxu0 %v4825_v3 }
0x100a   :  { %2177 = vrot.lane.b32.xlu1 %v6051_v26, %s5544_s18  ;;  %v1580_v5 = vmul.f32 %v5207_v41, %v1575_v57 }
0x100c   :  { %v1585_v58 = vadd.f32 %v5208_v45, %v1580_v5 }
0x100e   :  { %1888 = vrot.lane.b32.xlu2 %v6056_v29, %s5546_s23  ;;  %v6141_v59 = vmul.f32 %v1585_v58, %v5919_v48 }
0x1010   :  { %4837 = vmatmul.msk.f32.gmra.mxu2 %vm186_vm0, %v6141_v59 }
0x1012   :  { %2043 = vrot.lane.b32.xlu1 %v6056_v29, %s5545_s22 }
0x1016   :  { %2179 = vrot.lane.b32.xlu2 %v6056_v29, %s5544_s18 }
0x101e   :  { %2041 = vrot.lane.b32.xlu2 %v6051_v26, %s5545_s22 }
0x1026   :  { %2175 = vrot.lane.b32.xlu2 %v6056_v29, %s5547_s26 }
0x104c   :  { %v1837_v6 = vpop.xlane.xlu1 %1836 }
0x104d   :  { %5318 = vrcp.f32 %v1837_v6 }
0x1053   :  { %v5319_v8 = vpop.eup %5318 }
0x1054   :  { %v1843_v12 = vmul.f32 %v5319_v8, %v6107_v14 }
0x1064   :  { %v1848_v18 = vpop.permute.xlu1 %1847 }
0x1065   :  { %4846 = vmatpush.msk.msra.mxu2 %vm1856_vm13, %v1848_v18 }
0x1067   :  { %1874 = vmatpush.msra.mxu2 %v1846_v9 }
0x1068   :  { %4847 = vmatmul.msk.f32.vlgmr.msra.gmra.mxu2 %vm1821_vm4, %v1843_v12 }
0x1069   :  { %v1840_v16 = vpop.xlane.xlu2 %1839  ;;  %2033 = vmatpush.msrb.mxu2 %v1741_v23 }
0x106a   :  { %5320 = vrcp.f32 %v1840_v16 }
0x106c   :  { %v1883_v19 = vpop.permute.xlu1 %1882 }
0x1070   :  { %v5321_v20 = vpop.eup %5320 }
0x1071   :  { %v1889_v21 = vpop.permute.xlu2 %1888  ;;  %v1844_v22 = vmul.f32 %v5321_v20, %v6119_v37 }
0x1072   :  { %4849 = vmatpush.xpose.msk.msrb.mxu0 %vm222_vm1, %v1889_v21 }
0x1073   :  { %4848 = vmatmul.msk.f32.gmra.mxu2 %vm1821_vm4, %v1844_v22 }
0x1074   :  { %v2048_v11 = vpop.permute.xlu1 %2047 }
0x1076   :  { %4850 = vmatpush.xpose.msk.msrb.mxu0 %vm222_vm1, %v1887_v24 }
0x1079   :  { %v2180_v14 = vpop.permute.xlu2 %2179 }
0x107a   :  { %4869 = vmatpush.xpose.msk.msra.mxu2 %vm222_vm1, %v2180_v14 }
0x107c   :  { %v2178_v25 = vpop.permute.xlu1 %2177 }
0x107e   :  { %4870 = vmatpush.xpose.msk.msra.mxu2 %vm222_vm1, %v2178_v25 }
0x1081   :  { %v2042_v36 = vpop.permute.xlu2 %2041 }
0x1083   :  { %v1636_v30 = vpop.f32.mrf.mxu2 }
0x1084   :  { %v1637_v31 = vadd.f32 %v5209_v27, %v1636_v30  ;;  %v2044_v37 = vpop.permute.xlu1 %2043 }
0x1086   :  { %v1642_v32 = vmax.f32 %v1637_v31, 0.0 }
0x1088   :  { %4838 = vmatmul.msk.f32.vlgmr.msra.gmra.mxu0 %vm869_vm10, %v1642_v32 }
0x1089   :  { %4860 = vmatpush.xpose.msk.msra.mxu0 %vm222_vm1, %v2048_v11  ;;  %v2176_v41 = vpop.permute.xlu2 %2175 }
0x108d   :  { %4861 = vmatpush.xpose.msk.msra.mxu0 %vm222_vm1, %v2046_v33 }
0x1093   :  { %v1639_v15 = vpop.f32.mrf.mxu2 }
0x1094   :  { %v1640_v34 = vadd.f32 %v5209_v27, %v1639_v15 }
0x1096   :  { %v1643_v35 = vmax.f32 %v1640_v34, 0.0 }
0x1098   :  { %4839 = vmatmul.msk.f32.gmra.mxu0 %vm869_vm10, %v1643_v35 }
0x10a0   :  { %4851 = vmatmul.msk.f32.vlgmr.msrb.gmra.mxu0 %vm222_vm1, %v1883_v19 }
0x10a8   :  { %4852 = vmatmul.msk.f32.gmra.mxu0 %vm222_vm1, %v1885_v28 }
0x10b0   :  { %4862 = vmatmul.msk.f32.vlgmr.msra.gmra.mxu0 %vm222_vm1, %v2042_v36 }
0x10b8   :  { %4863 = vmatmul.msk.f32.gmra.mxu0 %vm222_vm1, %v2044_v37 }
0x10eb   :  { %v1876_v38 = vpop.f32.mrf.mxu2 }
0x10ec   :  { %4858 = vmatmul.msk.f32.vlgmr.msrb.gmra.mxu2 %vm222_vm1, %v1876_v38  ;;  %v5210_v38 = vld [vmem:[%s5644_s27 + $0x1] ss:$0 sm:$0xff]  ;;  %s6856_s27 = sld [smem:[#allocation17_spill]] }
0x10f6   :  { %v1879_v39 = vpop.f32.mrf.mxu2 }
0x10f7   :  { %4859 = vmatmul.msk.f32.gmra.mxu2 %vm222_vm1, %v1879_v39 }
0x10ff   :  { %4871 = vmatmul.msk.f32.vlgmr.msra.gmra.mxu2 %vm222_vm1, %v2174_v40 }
0x1105   :  { %v6184_v43 = vpop.f32.mrf.mxu0 }
0x1107   :  { %4872 = vmatmul.msk.f32.gmra.mxu2 %vm222_vm1, %v2176_v41  ;;  %v1671_v41 = vadd.f32 %v5210_v38, %v6184_v43 }
0x1115   :  { %v6186_v44 = vpop.f32.mrf.mxu0 }
0x111d   :  { %v1915_v45 = vpop.f32.mrf.mxu0 }
0x111e   :  { %v1921_v46 = vmul.f32 0.35355338, %v1915_v45 }
0x1120   :  { %v1923_v47 = vadd.f32 %v1921_v46, %v6076_v55  ;;  %v6225_v46 = vadd.f32 %v1671_v41, %v6129_v51 }
0x1122   :  { %v1925_v50 = vsel %vm1821_vm4, %v1923_v47, -inf }
0x1123   :  { %1926 = vmax.xlane.f32.xlu0 %v1925_v50 }
0x1125   :  { %v1918_v13 = vpop.f32.mrf.mxu0 }
0x1126   :  { %v1922_v4 = vmul.f32 0.35355338, %v1918_v13 }
0x1128   :  { %v1924_v52 = vadd.f32 %v1922_v4, %v6089_v0 }
0x112a   :  { %v1928_v17 = vsel %vm1825_vm5, %v1924_v52, -inf }
0x112b   :  { %1929 = vmax.xlane.f32.xlu1 %v1928_v17 }
0x112d   :  { %v2074_v54 = vpop.f32.mrf.mxu0 }
0x112e   :  { %v2080_v49 = vmul.f32 0.35355338, %v2074_v54 }
0x1130   :  { %v2082_v57 = vadd.f32 %v2080_v49, %v6076_v55 }
0x1132   :  { %v2084_v5 = vsel %vm1821_vm4, %v2082_v57, -inf }
0x1133   :  { %2085 = vmax.xlane.f32.xlu2 %v2084_v5 }
0x1135   :  { %v2077_v58 = vpop.f32.mrf.mxu0 }
0x1136   :  { %v2081_v53 = vmul.f32 0.35355338, %v2077_v58 }
0x1138   :  { %v2083_v60 = vadd.f32 %v2081_v53, %v6089_v0 }
0x113a   :  { %v2087_v61 = vsel %vm1825_vm5, %v2083_v60, -inf }
0x113b   :  { %2088 = vmax.xlane.f32.xlu0 %v2087_v61 }
0x1144   :  { %2108 = vrot.lane.b32.xlu1 %v6056_v29, %s6822_s1 }
0x116f   :  { %v6198_v62 = vpop.f32.mrf.mxu2 }
0x117a   :  { %v6200_v63 = vpop.f32.mrf.mxu2 }
0x1182   :  { %v2206_v1 = vpop.f32.mrf.mxu2 }
0x1183   :  { %v2212_v2 = vmul.f32 0.35355338, %v2206_v1 }
0x1185   :  { %v2214_v3 = vadd.f32 %v2212_v2, %v6076_v55 }
0x1187   :  { %v2216_v6 = vsel %vm1821_vm4, %v2214_v3, -inf }
0x1188   :  { %2217 = vmax.xlane.f32.xlu2 %v2216_v6 }
0x118a   :  { %v2209_v55 = vpop.f32.mrf.mxu2 }
0x118b   :  { %v2213_v24 = vmul.f32 0.35355338, %v2209_v55 }
0x118d   :  { %v2215_v27 = vadd.f32 %v2213_v24, %v6089_v0  ;;  %v1743_v24 = vld [vmem:[%s6850_s19 + $0x10] sm:$0xff] }
0x118f   :  { %v2219_v28 = vsel %vm1825_vm5, %v2215_v27, -inf }
0x1196   :  { %v1927_v8 = vpop.xlane.xlu0 %1926 }
0x1197   :  { %v1931_v18 = vsub.f32 %v1923_v47, %v1927_v8 }
0x1199   :  { %v1933_v9 = vmul.f32 1.442695, %v1931_v18 }
0x119b   :  { %5322 = vpow2.f32 %v1933_v9 }
0x119e   :  { %v1930_v12 = vpop.xlane.xlu1 %1929 }
0x119f   :  { %v1932_v23 = vsub.f32 %v1924_v52, %v1930_v12 }
0x11a0   :  { %1949 = vrot.lane.b32.xlu2 %v6056_v29, %s5548_s28 }
0x11a1   :  { %v5323_v16 = vpop.eup %5322  ;;  %v1935_v19 = vmul.f32 1.442695, %v1932_v23 }
0x11a2   :  { %v1937_v20 = vsel %vm1821_vm4, %v5323_v16, 0.0 }
0x11a3   :  { %5324 = vpow2.f32 %v1935_v19  ;;  %1938 = vadd.xlane.f32.xlu0 %v1937_v20  ;;  %v1742_v19 = vld [vmem:[%s6850_s19 + $0x8] sm:$0xff] }
0x11a4   :  { %2004 = vmatpush.msra.mxu3 %v1742_v19 }
0x11a6   :  { %v2086_v21 = vpop.xlane.xlu2 %2085  ;;  %2163 = vmatpush.msrb.mxu3 %v1743_v24 }
0x11a7   :  { %v2090_v11 = vsub.f32 %v2082_v57, %v2086_v21 }
0x11a9   :  { %v5325_v22 = vpop.eup %5324  ;;  %v2092_v25 = vmul.f32 1.442695, %v2090_v11 }
0x11aa   :  { %v1940_v14 = vsel %vm1825_vm5, %v5325_v22, 0.0 }
0x11ab   :  { %1941 = vadd.xlane.f32.xlu1 %v1940_v14  ;;  %5326 = vpow2.f32 %v2092_v25 }
0x11ae   :  { %v2089_v30 = vpop.xlane.xlu0 %2088 }
0x11af   :  { %v2091_v32 = vsub.f32 %v2083_v60, %v2089_v30 }
0x11b1   :  { %v5327_v31 = vpop.eup %5326  ;;  %v2094_v15 = vmul.f32 1.442695, %v2091_v32 }
0x11b2   :  { %v2096_v33 = vsel %vm1821_vm4, %v5327_v31, 0.0 }
0x11b3   :  { %2220 = vmax.xlane.f32.xlu1 %v2219_v28  ;;  %5328 = vpow2.f32 %v2094_v15 }
0x11b6   :  { %v2109_v50 = vpop.permute.xlu1 %2108 }
0x11b7   :  { %1947 = vrot.lane.b32.xlu0 %v6051_v26, %s5548_s28 }
0x11b9   :  { %v5329_v34 = vpop.eup %5328 }
0x11ba   :  { %v2099_v35 = vsel %vm1825_vm5, %v5329_v34, 0.0 }
0x11bb   :  { %2097 = vadd.xlane.f32.xlu1 %v2096_v33  ;;  %v1744_v33 = vld [vmem:[%s6850_s19 + $0x18] sm:$0xff] }
0x11c9   :  { %2100 = vadd.xlane.f32.xlu2 %v2099_v35 }
0x11d4   :  { %2106 = vrot.lane.b32.xlu1 %v6051_v26, %s6822_s1  ;;  %s6865_s1 = sld [smem:[#allocation25_spill]] }
0x11dc   :  { %2240 = vrot.lane.b32.xlu1 %v6056_v29, %s6820_s2  ;;  %v1674_v29 = vadd.f32 %v5210_v38, %v6186_v44 }
0x11de   :  { %v1677_v47 = vadd.f32 %v1674_v29, %v6141_v59 }
0x11e0   :  { %v1681_v13 = vsel %vm186_vm0, %v1677_v47, 0.0 }
0x11e1   :  { %2238 = vrot.lane.b32.xlu2 %v6051_v26, %s6820_s2  ;;  %v1678_v26 = vsel %vm186_vm0, %v6225_v46, 0.0  ;;  %s6864_s2 = sld [smem:[#allocation23_spill]] }
0x11fb   :  { %v2218_v0 = vpop.xlane.xlu2 %2217 }
0x11fc   :  { %v2222_v36 = vsub.f32 %v2214_v3, %v2218_v0 }
0x11fe   :  { %v2224_v37 = vmul.f32 1.442695, %v2222_v36 }
0x1200   :  { %5330 = vpow2.f32 %v2224_v37 }
0x1203   :  { %v1950_v39 = vpop.permute.xlu2 %1949 }
0x1204   :  { %4853 = vmatpush.msk.msra.mxu1 %vm1856_vm13, %v1950_v39  ;;  %v5211_v39 = vld [vmem:[%s6851_s24] ss:$0 sm:$0xff] }
0x1206   :  { %v5331_v40 = vpop.eup %5330 }
0x1207   :  { %v2228_v45 = vsel %vm1821_vm4, %v5331_v40, 0.0 }
0x1208   :  { %2229 = vadd.xlane.f32.xlu0 %v2228_v45 }
0x1210   :  { %1679 = vadd.xlane.f32.xlu0 %v1678_v26 }
0x1216   :  { %v1939_v4 = vpop.xlane.xlu0 %1938 }
0x1217   :  { %5332 = vrcp.f32 %v1939_v4 }
0x1218   :  { %1682 = vadd.xlane.f32.xlu0 %v1681_v13 }
0x121d   :  { %v5333_v52 = vpop.eup %5332 }
0x121e   :  { %v1942_v43 = vpop.xlane.xlu1 %1941  ;;  %v1945_v51 = vmul.f32 %v5333_v52, %v5323_v16 }
0x121f   :  { %5334 = vrcp.f32 %v1942_v43 }
0x1225   :  { %v5335_v59 = vpop.eup %5334 }
0x1226   :  { %v2221_v17 = vpop.xlane.xlu1 %2220  ;;  %v1946_v5 = vmul.f32 %v5335_v59, %v5325_v22 }
0x1227   :  { %v2223_v54 = vsub.f32 %v2215_v27, %v2221_v17 }
0x1229   :  { %v2226_v49 = vmul.f32 1.442695, %v2223_v54  ;;  %v1948_v44 = vpop.permute.xlu0 %1947  ;;  %v2381_v54 = vld [vmem:[%s6852_s30 + $0x10] sm:$0xff] }
0x122a   :  { %1975 = vmatpush.msra.mxu1 %v1948_v44 }
0x122b   :  { %5336 = vpow2.f32 %v2226_v49  ;;  %4854 = vmatmul.msk.f32.vlgmr.msra.gmra.mxu1 %vm1821_vm4, %v1945_v51 }
0x122c   :  { %4864 = vmatpush.msk.msrb.mxu1 %vm1856_vm13, %v2109_v50 }
0x122e   :  { %v2098_v53 = vpop.xlane.xlu1 %2097 }
0x122f   :  { %5338 = vrcp.f32 %v2098_v53 }
0x1231   :  { %v5337_v57 = vpop.eup %5336 }
0x1232   :  { %v2231_v58 = vsel %vm1825_vm5, %v5337_v57, 0.0 }
0x1233   :  { %2232 = vadd.xlane.f32.xlu1 %v2231_v58  ;;  %4855 = vmatmul.msk.f32.gmra.mxu1 %vm1821_vm4, %v1946_v5 }
0x1235   :  { %v5339_v61 = vpop.eup %5338 }
0x1236   :  { %v2104_v1 = vmul.f32 %v5339_v61, %v5327_v31  ;;  %v2380_v61 = vld [vmem:[%s6852_s30 + $0x8] sm:$0xff] }
0x123c   :  { %v2101_v60 = vpop.xlane.xlu2 %2100 }
0x123d   :  { %5340 = vrcp.f32 %v2101_v60 }
0x1243   :  { %v5341_v3 = vpop.eup %5340 }
0x1244   :  { %v2105_v8 = vmul.f32 %v5341_v3, %v5329_v34  ;;  %v2239_v18 = vpop.permute.xlu2 %2238 }
0x1246   :  { %v2107_v2 = vpop.permute.xlu1 %2106 }
0x1247   :  { %2134 = vmatpush.msrb.mxu1 %v2107_v2  ;;  %v167_v2 = vld [vmem:[%s6853_s6] sm:$0xff] }
0x1248   :  { %4865 = vmatmul.msk.f32.vlgmr.msrb.gmra.mxu1 %vm1821_vm4, %v2104_v1  ;;  %v2379_v1 = vld [vmem:[%s6852_s30] sm:$0xff] }
0x1249   :  { %2295 = vmatpush.msra.mxu1 %v1744_v33  ;;  %v5141_v19 = vpack.i.bf16 %v2379_v1, %v2380_v61 }
0x124e   :  { %v2241_v6 = vpop.permute.xlu1 %2240 }
0x124f   :  { %4873 = vmatpush.msk.msrb.mxu0 %vm1856_vm13, %v2241_v6 }
0x1250   :  { %4866 = vmatmul.msk.f32.gmra.mxu1 %vm1821_vm4, %v2105_v8 }
0x1251   :  { %2266 = vmatpush.msrb.mxu0 %v2239_v18 }
0x127b   :  { %v2230_v9 = vpop.xlane.xlu0 %2229 }
0x127c   :  { %5342 = vrcp.f32 %v2230_v9 }
0x1282   :  { %v5343_v12 = vpop.eup %5342 }
0x1283   :  { %v2236_v23 = vmul.f32 %v5343_v12, %v5331_v40  ;;  %v1680_v16 = vpop.xlane.xlu0 %1679 }
0x1284   :  { %v1684_v45 = vmul.f32 %v1680_v16, %v5894_v56 }
0x1285   :  { %4874 = vmatmul.msk.f32.vlgmr.msrb.gmra.mxu0 %vm1821_vm4, %v2236_v23 }
0x128b   :  { %v1683_v20 = vpop.xlane.xlu0 %1682 }
0x128c   :  { %v1685_v21 = vmul.f32 %v1683_v20, %v5894_v56 }
0x128e   :  { %v6242_v55 = vsub.f32 %v1677_v47, %v1685_v21  ;;  %v6261_v47 = vsub.f32 %v6225_v46, %v1684_v45 }
0x1290   :  { %v1689_v22 = vmul.f32 %v6242_v55, %v6242_v55 }
0x1292   :  { %v1693_v11 = vsel %vm186_vm0, %v1689_v22, 0.0 }
0x1293   :  { %1694 = vadd.xlane.f32.xlu1 %v1693_v11 }
0x12a6   :  { %v2233_v14 = vpop.xlane.xlu1 %2232 }
0x12a7   :  { %5344 = vrcp.f32 %v2233_v14 }
0x12a8   :  { %v1977_v25 = vpop.f32.mrf.mxu1 }
0x12a9   :  { %4856 = vmatmul.msk.f32.vlgmr.msra.gmra.mxu3 %vm222_vm1, %v1977_v25 }
0x12ad   :  { %v5345_v27 = vpop.eup %5344 }
0x12ae   :  { %v2237_v28 = vmul.f32 %v5345_v27, %v5337_v57 }
0x12b0   :  { %v1980_v30 = vpop.f32.mrf.mxu1  ;;  %4875 = vmatmul.msk.f32.gmra.mxu0 %vm1821_vm4, %v2237_v28 }
0x12b1   :  { %4857 = vmatmul.msk.f32.gmra.mxu3 %vm222_vm1, %v1980_v30 }
0x12c5   :  { %v2136_v31 = vpop.f32.mrf.mxu1 }
0x12c6   :  { %4867 = vmatmul.msk.f32.vlgmr.msrb.gmra.mxu3 %vm222_vm1, %v2136_v31  ;;  %v5214_v31 = vld [vmem:[%s6854_s12] ss:$0 sm:$0xff] }
0x12cd   :  { %v2139_v32 = vpop.f32.mrf.mxu1 }
0x12ce   :  { %4868 = vmatmul.msk.f32.gmra.mxu3 %vm222_vm1, %v2139_v32 }
0x1302   :  { %v2268_v15 = vpop.f32.mrf.mxu0 }
0x1303   :  { %4876 = vmatmul.msk.f32.vlgmr.msra.gmra.mxu1 %vm222_vm1, %v2268_v15 }
0x132c   :  { %v2006_v35 = vpop.f32.mrf.mxu3 }
0x132d   :  { %v2271_v34 = vpop.f32.mrf.mxu0  ;;  %v2036_v37 = vadd.f32 %v6198_v62, %v2006_v35  ;;  %v1688_v62 = vmul.f32 %v6261_v47, %v6261_v47  ;;  %v1695_v35 = vpop.xlane.xlu1 %1694 }
0x132e   :  { %4877 = vmatmul.msk.f32.gmra.mxu1 %vm222_vm1, %v2271_v34  ;;  %v5215_v34 = vld [vmem:[%s6855_s20] ss:$0 sm:$0xff] }
0x132f   :  { %v1690_v13 = vsel %vm186_vm0, %v1688_v62, 0.0 }
0x1334   :  { %v2009_v0 = vpop.f32.mrf.mxu3 }
0x1335   :  { %v2039_v43 = vadd.f32 %v6200_v63, %v2009_v0  ;;  %v168_v63 = vld [vmem:[%s6853_s6 + $0x8] sm:$0x3f]  ;;  %s6863_s6 = sld [smem:[#allocation21_spill]] }
0x1349   :  { %v2165_v36 = vpop.f32.mrf.mxu3 }
0x134a   :  { %v2171_v38 = vadd.f32 %v2165_v36, %v2036_v37  ;;  %v1697_v36 = vmul.f32 %v1695_v35, %v5894_v56 }
0x1351   :  { %v2168_v4 = vpop.f32.mrf.mxu3 }
0x1352   :  { %v2172_v52 = vadd.f32 %v2168_v4, %v2039_v43 }
0x1380   :  { %v2297_v40 = vpop.f32.mrf.mxu1 }
0x1381   :  { %v2303_v41 = vadd.f32 %v2297_v40, %v2171_v38  ;;  %v1699_v40 = vadd.f32 1e-05, %v1697_v36 }
0x1383   :  { %v2308_v29 = vadd.f32 %v5211_v39, %v2303_v41 }
0x1385   :  { %v2310_v26 = vadd.f32 %v2308_v29, %v6033_v7  ;;  %v2382_v7 = vld [vmem:[%s6852_s30 + $0x18] sm:$0xff] }
0x1386   :  { %v5136_v46 = vpack.i.bf16 %v2381_v54, %v2382_v7  ;;  %2412 = vmatpush.msra.mxu3 %v2382_v7 }
0x1387   :  { %v2312_v50 = vsel %vm186_vm0, %v2310_v26, 0.0 }
0x1388   :  { %2313 = vadd.xlane.f32.xlu0 %v2312_v50  ;;  %2413 = vmatpush.msra.mxu3 %v2381_v54  ;;  %v5216_v54 = vld [vmem:[%s6856_s27] ss:$0 sm:$0xff] }
0x138a   :  { %2414 = vmatpush.msra.mxu3 %v2380_v61 }
0x138c   :  { %2415 = vmatpush.msra.mxu3 %v2379_v1 }
0x1390   :  { %1691 = vadd.xlane.f32.xlu0 %v1690_v13 }
0x13a4   :  { %5137 = vrot.lane.b32.xlu0 %v5136_v46, %s5540_s0 }
0x13ab   :  { %v2300_v17 = vpop.f32.mrf.mxu1 }
0x13ac   :  { %v2304_v51 = vadd.f32 %v2300_v17, %v2172_v52 }
0x13ae   :  { %v2309_v49 = vadd.f32 %v5211_v39, %v2304_v51 }
0x13b0   :  { %v2311_v44 = vadd.f32 %v2309_v49, %v6039_v10 }
0x13b2   :  { %v2316_v59 = vsel %vm2315_vm14, %v2311_v44, 0.0 }
0x13b3   :  { %2317 = vadd.xlane.f32.xlu2 %v2316_v59 }
0x13cb   :  { %2374 = vperm.xlu2 %5115, %v168_v63  }
0x13fb   :  { %v2314_v57 = vpop.xlane.xlu0 %2313 }
0x13fc   :  { %v2319_v5 = vmul.f32 %v2314_v57, %v5894_v56 }
0x13fe   :  { %v2321_v58 = vsub.f32 %v2310_v26, %v2319_v5 }
0x1400   :  { %v2323_v53 = vmul.f32 %v2321_v58, %v2321_v58 }
0x1402   :  { %v2325_v60 = vsel %vm186_vm0, %v2323_v53, 0.0  ;;  %v5212_v53 = vld [vmem:[%s5649_s4 + $0x1] ss:$0 sm:$0xff]  ;;  %s6857_s4 = sld [smem:[#allocation7_spill]] }
0x1403   :  { %2326 = vadd.xlane.f32.xlu0 %v2325_v60  ;;  %v1692_v10 = vpop.xlane.xlu0 %1691 }
0x1404   :  { %v1696_v28 = vmul.f32 %v1692_v10, %v5894_v56  ;;  %v5213_v10 = vld [vmem:[%s6845_s25 + $0x1] ss:$0 sm:$0xff]  ;;  %s6861_s25 = sld [smem:[#allocation24_spill]] }
0x1406   :  { %v1698_v33 = vadd.f32 1e-05, %v1696_v28 }
0x1408   :  { %vm1706_vm8 = vweird.f32 %v1698_v33 }
0x1416   :  { %v5138_v8 = vpop.permute.xlu0 %5137 }
0x1417   :  { %2369 = vperm.xlu0 %5114, %v167_v2   ;;  %v5140_v18 = vunpack.i.h.bf16 %v5138_v8  ;;  %v5139_v9 = vunpack.i.l.bf16 %v5138_v8 }
0x1419   :  { %2460 = vmatpush.msrb.mxu2 %v5139_v9 }
0x141b   :  { %2461 = vmatpush.msrb.mxu2 %v5140_v18 }
0x141f   :  { %2439 = vrot.lane.b32.xlu0 %v5216_v54, %s5540_s0 }
0x1426   :  { %v2318_v3 = vpop.xlane.xlu2 %2317 }
0x1427   :  { %v2320_v6 = vmul.f32 %v2318_v3, %v5894_v56 }
0x1429   :  { %v6280_v12 = vsub.f32 %v2311_v44, %v2320_v6 }
0x142b   :  { %v2324_v23 = vmul.f32 %v6280_v12, %v6280_v12 }
0x142d   :  { %v2328_v16 = vsel %vm2315_vm14, %v2324_v23, 0.0 }
0x142e   :  { %2329 = vadd.xlane.f32.xlu1 %v2328_v16 }
0x1447   :  { %5142 = vrot.lane.b32.xlu1 %v5141_v19, %s5540_s0 }
0x1476   :  { %v2327_v20 = vpop.xlane.xlu0 %2326 }
0x1477   :  { %v2331_v21 = vmul.f32 %v2327_v20, %v5894_v56  ;;  %v6306_v20 = vpop.permute.xlu2 %2374 }
0x1479   :  { %v2333_v22 = vadd.f32 1e-05, %v2331_v21 }
0x147b   :  { %5346 = vrsqrt.f32 %v2333_v22  ;;  %vm2341_vm3 = vweird.f32 %v2333_v22 }
0x147c   :  { %5348 = vrsqrt.f32 %v1698_v33 }
0x147d   :  { %5350 = vrsqrt.f32 %v1699_v40 }
0x1481   :  { %v5347_v11 = vpop.eup %5346 }
0x1482   :  { %v2336_v24 = vmul.f32 %v5347_v11, %v2333_v22  ;;  %vm2342_vm15 = vweird.f32 %v5347_v11  ;;  %v5349_v41 = vpop.eup %5348 }
0x1483   :  { %vm2343_vm6 = vmor %vm2341_vm3, %vm2342_vm15  ;;  %v1701_v45 = vmul.f32 %v5349_v41, %v1698_v33  ;;  %v5351_v26 = vpop.eup %5350  ;;  %vm1707_vm7 = vweird.f32 %v5349_v41  ;;  %vm1716_vm15 = vweird.f32 %v1699_v40  ;;  %v6328_v33 = vld [vmem:[%s6857_s4] sm:$0xff] }
0x1484   :  { %v2337_v14 = vmul.f32 %v5347_v11, %v2336_v24  ;;  %v1711_v62 = vmul.f32 %v5351_v26, %v1699_v40  ;;  %vm1708_vm9 = vmor %vm1706_vm8, %vm1707_vm7  ;;  %vm1717_vm11 = vweird.f32 %v5351_v26  ;;  %vm2513_vm8 = vcmask 128000  }
0x1485   :  { %v1702_v29 = vmul.f32 %v5349_v41, %v1701_v45  ;;  %vm1718_vm3 = vmor %vm1716_vm15, %vm1717_vm11 }
0x1486   :  { %v2338_v25 = vmul.f32 0.5, %v2337_v14  ;;  %v1712_v52 = vmul.f32 %v5351_v26, %v1711_v62 }
0x1487   :  { %v1703_v13 = vmul.f32 0.5, %v1702_v29 }
0x1488   :  { %v2339_v27 = vsub.f32 1.5, %v2338_v25  ;;  %v1713_v7 = vmul.f32 0.5, %v1712_v52 }
0x1489   :  { %v6291_v38 = vpop.permute.xlu0 %2369  ;;  %v1704_v17 = vsub.f32 1.5, %v1703_v13 }
0x148a   :  { %v2340_v30 = vmul.f32 %v5347_v11, %v2339_v27  ;;  %v1714_v44 = vsub.f32 1.5, %v1713_v7 }
0x148b   :  { %v1705_v51 = vmul.f32 %v5349_v41, %v1704_v17 }
0x148c   :  { %v2344_v32 = vsel %vm2343_vm6, %v5347_v11, %v2340_v30 }
0x148d   :  { %v2355_v15 = vmul.f32 %v2344_v32, %v2321_v58  ;;  %v1709_v59 = vsel %vm1708_vm9, %v5349_v41, %v1705_v51  ;;  %v1715_v58 = vmul.f32 %v5351_v26, %v1714_v44 }
0x148e   :  { %v1720_v57 = vmul.f32 %v1709_v59, %v6261_v47 }
0x148f   :  { %v2360_v0 = vmul.f32 %v5214_v31, %v2355_v15  ;;  %v1719_v2 = vsel %vm1718_vm3, %v5351_v26, %v1715_v58 }
0x1490   :  { %v1725_v61 = vmul.f32 %v5212_v53, %v1720_v57  ;;  %v1721_v8 = vmul.f32 %v1719_v2, %v6242_v55 }
0x1491   :  { %v2365_v37 = vadd.f32 %v5215_v34, %v2360_v0  ;;  %v2440_v24 = vpop.permute.xlu0 %2439  ;;  %v6333_v0 = vld [vmem:[%s6857_s4 + $0x8] sm:$0x3f] }
0x1492   :  { %v1730_v47 = vadd.f32 %v5213_v10, %v1725_v61  ;;  %v1726_v22 = vmul.f32 %v5212_v53, %v1721_v8 }
0x1493   :  { %v6294_v39 = vmul.f32 %v6291_v38, %v2365_v37 }
0x1494   :  { %v6309_v21 = vmul.f32 %v1730_v47, %v5915_v42  ;;  %v1731_v55 = vadd.f32 %v5213_v10, %v1726_v22 }
0x1495   :  { %4878 = vmatmul.msk.f32.vlgmr.msra.gmra.mxu3 %vm186_vm0, %v6294_v39 }
0x14a1   :  { %v2330_v50 = vpop.xlane.xlu1 %2329 }
0x14a2   :  { %v2332_v4 = vmul.f32 %v2330_v50, %v5894_v56 }
0x14a4   :  { %v2334_v43 = vadd.f32 1e-05, %v2332_v4 }
0x14a6   :  { %5352 = vrsqrt.f32 %v2334_v43  ;;  %vm2351_vm6 = vweird.f32 %v2334_v43 }
0x14ac   :  { %v5353_v46 = vpop.eup %5352 }
0x14ad   :  { %v2346_v49 = vmul.f32 %v5353_v46, %v2334_v43  ;;  %vm2352_vm12 = vweird.f32 %v5353_v46 }
0x14ae   :  { %vm2353_vm7 = vmor %vm2351_vm6, %vm2352_vm12 }
0x14af   :  { %v2347_v63 = vmul.f32 %v5353_v46, %v2346_v49  ;;  %v2384_v49 = vld [vmem:[%s6858_s7] sm:$0xff] }
0x14b1   :  { %v2348_v5 = vmul.f32 0.5, %v2347_v63 }
0x14b3   :  { %v2349_v60 = vsub.f32 1.5, %v2348_v5 }
0x14b5   :  { %v2350_v1 = vmul.f32 %v5353_v46, %v2349_v60 }
0x14b7   :  { %v2354_v3 = vsel %vm2353_vm7, %v5353_v46, %v2350_v1 }
0x14b8   :  { %v2356_v6 = vmul.f32 %v2354_v3, %v6280_v12  ;;  %v6319_v12 = vmul.f32 %v1731_v55, %v5919_v48 }
0x14b9   :  { %v5143_v18 = vpop.permute.xlu1 %5142 }
0x14ba   :  { %v5144_v9 = vunpack.i.l.bf16 %v5143_v18  ;;  %v2361_v23 = vmul.f32 %v5214_v31, %v2356_v6  ;;  %v5145_v16 = vunpack.i.h.bf16 %v5143_v18 }
0x14bc   :  { %2462 = vmatpush.msrb.mxu2 %v5144_v9  ;;  %v2366_v19 = vadd.f32 %v5215_v34, %v2361_v23 }
0x14be   :  { %2463 = vmatpush.msrb.mxu2 %v5145_v16  ;;  %v6312_v11 = vmul.f32 %v6306_v20, %v2366_v19 }
0x14bf   :  { %4880 = vmatmul.msk.f32.vlgmr.msrb.gmra.mxu2 %vm186_vm0, %v6309_v21 }
0x14c0   :  { %4879 = vmatmul.msk.f32.gmra.mxu3 %vm186_vm0, %v6312_v11 }
0x14c7   :  { %4881 = vmatmul.msk.f32.gmra.mxu2 %vm186_vm0, %v6319_v12 }
0x1518   :  { %v2417_v27 = vpop.f32.mrf.mxu3 }
0x1519   :  { %v2418_v30 = vadd.f32 %v5216_v54, %v2417_v27 }
0x1542   :  { %v2465_v42 = vpop.f32.mrf.mxu2 }
0x1543   :  { %v2466_v28 = vadd.f32 %v2465_v42, %v2440_v24  ;;  %v2420_v48 = vpop.f32.mrf.mxu3 }
0x1544   :  { %v2421_v31 = vadd.f32 %v5216_v54, %v2420_v48 }
0x154a   :  { %v2468_v14 = vpop.f32.mrf.mxu2 }
0x154b   :  { %v2469_v25 = vadd.f32 %v2468_v14, %v2440_v24 }
0x154d   :  { %4882 = vmatpush.xpose.msk.msra.mxu0 %vm222_vm1, %v2469_v25  ;;  %v6337_v45 = vpack.i.bf16 %v2466_v28, %v2469_v25 }
0x1551   :  { %4883 = vmatpush.xpose.msk.msra.mxu0 %vm222_vm1, %v2466_v28 }
0x1554   :  { %4884 = vmatmul.msk.f32.vlgmr.msra.gmra.mxu0 %vm222_vm1, %v2418_v30 }
0x155c   :  { %4885 = vmatmul.msk.f32.gmra.mxu0 %vm222_vm1, %v2421_v31 }
0x15d1   :  { %v2500_v32 = vpop.f32.mrf.mxu0 }
0x15d2   :  { %v2506_v15 = vmul.f32 0.35355338, %v2500_v32 }
0x15d4   :  { %v2508_v34 = vadd.f32 %v2506_v15, %v6328_v33 }
0x15d6   :  { %v2510_v35 = vsel %vm258_vm2, %v2508_v34, -inf }
0x15d7   :  { %2511 = vmax.xlane.f32.xlu1 %v2510_v35 }
0x15d9   :  { %v2503_v36 = vpop.f32.mrf.mxu0 }
0x15da   :  { %v2507_v37 = vmul.f32 0.35355338, %v2503_v36 }
0x15dc   :  { %v2509_v40 = vadd.f32 %v2507_v37, %v6333_v0 }
0x15de   :  { %v2514_v41 = vsel %vm2513_vm8, %v2509_v40, -inf }
0x15df   :  { %2515 = vmax.xlane.f32.xlu0 %v2514_v41 }
0x15f0   :  { %5147 = vrot.lane.b32.xlu1 %v6337_v45, %s5540_s0 }
0x15f8   :  { %2568 = vrot.lane.b32.xlu1 %v2418_v30, %s5542_s15 }
0x1600   :  { %2732 = vrot.lane.b32.xlu1 %v2469_v25, %s5545_s22 }
0x1608   :  { %2861 = vrot.lane.b32.xlu1 %v2466_v28, %s5547_s26 }
0x1610   :  { %2728 = vrot.lane.b32.xlu1 %v2421_v31, %s5545_s22 }
0x164a   :  { %v2512_v29 = vpop.xlane.xlu1 %2511 }
0x164b   :  { %v2517_v26 = vsub.f32 %v2508_v34, %v2512_v29 }
0x164d   :  { %v2519_v50 = vmul.f32 1.442695, %v2517_v26 }
0x164f   :  { %5354 = vpow2.f32 %v2519_v50 }
0x1652   :  { %v2516_v62 = vpop.xlane.xlu0 %2515 }
0x1653   :  { %v2518_v13 = vsub.f32 %v2509_v40, %v2516_v62 }
0x1655   :  { %v5355_v4 = vpop.eup %5354  ;;  %v2521_v43 = vmul.f32 1.442695, %v2518_v13 }
0x1656   :  { %v2523_v52 = vsel %vm258_vm2, %v5355_v4, 0.0 }
0x1657   :  { %5356 = vpow2.f32 %v2521_v43  ;;  %2524 = vadd.xlane.f32.xlu2 %v2523_v52 }
0x165d   :  { %v5357_v17 = vpop.eup %5356 }
0x165e   :  { %v2526_v54 = vsel %vm2513_vm8, %v5357_v17, 0.0 }
0x165f   :  { %2527 = vadd.xlane.f32.xlu0 %v2526_v54 }
0x1662   :  { %v5148_v7 = vpop.permute.xlu1 %5147 }
0x1663   :  { %v5149_v51 = vunpack.i.l.bf16 %v5148_v7  ;;  %v5150_v46 = vunpack.i.h.bf16 %v5148_v7 }
0x1665   :  { %2559 = vmatpush.msrb.mxu1 %v5149_v51 }
0x1667   :  { %2560 = vmatpush.msrb.mxu1 %v5150_v46 }
0x1669   :  { %2718 = vmatpush.msra.mxu1 %v2384_v49 }
0x166a   :  { %v2569_v44 = vpop.permute.xlu1 %2568 }
0x166f   :  { %2574 = vrot.lane.b32.xlu2 %v2469_v25, %s5542_s15 }
0x1672   :  { %v2733_v53 = vpop.permute.xlu1 %2732 }
0x1673   :  { %2572 = vrot.lane.b32.xlu0 %v2466_v28, %s5542_s15 }
0x1677   :  { %2863 = vrot.lane.b32.xlu2 %v2469_v25, %s5547_s26 }
0x167a   :  { %v2862_v2 = vpop.permute.xlu1 %2861 }
0x167b   :  { %2570 = vrot.lane.b32.xlu0 %v2421_v31, %s5542_s15 }
0x167f   :  { %2726 = vrot.lane.b32.xlu2 %v2418_v30, %s5545_s22 }
0x1682   :  { %v2729_v47 = vpop.permute.xlu1 %2728 }
0x1683   :  { %2730 = vrot.lane.b32.xlu0 %v2466_v28, %s5545_s22 }
0x1687   :  { %2859 = vrot.lane.b32.xlu2 %v2421_v31, %s5547_s26 }
0x168b   :  { %2857 = vrot.lane.b32.xlu0 %v2418_v30, %s5547_s26 }
0x16ca   :  { %v2525_v59 = vpop.xlane.xlu2 %2524 }
0x16cb   :  { %5358 = vrcp.f32 %v2525_v59 }
0x16d1   :  { %v5359_v63 = vpop.eup %5358 }
0x16d2   :  { %v2531_v57 = vmul.f32 %v5359_v63, %v5355_v4  ;;  %v2528_v5 = vpop.xlane.xlu0 %2527  ;;  %v2575_v58 = vpop.permute.xlu2 %2574 }
0x16d3   :  { %5360 = vrcp.f32 %v2528_v5  ;;  %4888 = vmatpush.xpose.msk.msrb.mxu3 %vm222_vm1, %v2575_v58 }
0x16d4   :  { %4886 = vmatmul.msk.f32.vlgmr.msrb.gmra.mxu1 %vm258_vm2, %v2531_v57 }
0x16d9   :  { %v5361_v60 = vpop.eup %5360 }
0x16da   :  { %v2864_v61 = vpop.permute.xlu2 %2863  ;;  %v2532_v1 = vmul.f32 %v5361_v60, %v5357_v17 }
0x16db   :  { %4906 = vmatpush.xpose.msk.msrb.mxu1 %vm222_vm1, %v2864_v61 }
0x16dc   :  { %4887 = vmatmul.msk.f32.gmra.mxu1 %vm258_vm2, %v2532_v1 }
0x16df   :  { %4907 = vmatpush.xpose.msk.msrb.mxu1 %vm222_vm1, %v2862_v2 }
0x16e2   :  { %v2727_v8 = vpop.permute.xlu2 %2726 }
0x16e5   :  { %v2573_v10 = vpop.permute.xlu0 %2572 }
0x16e6   :  { %4889 = vmatpush.xpose.msk.msrb.mxu3 %vm222_vm1, %v2573_v10 }
0x16e9   :  { %4890 = vmatmul.msk.f32.vlgmr.msrb.gmra.mxu3 %vm222_vm1, %v2569_v44 }
0x16ea   :  { %4898 = vmatpush.xpose.msk.msra.mxu3 %vm222_vm1, %v2733_v53  ;;  %v2860_v16 = vpop.permute.xlu2 %2859 }
0x16ed   :  { %v2571_v3 = vpop.permute.xlu0 %2570 }
0x16f1   :  { %4891 = vmatmul.msk.f32.gmra.mxu3 %vm222_vm1, %v2571_v3 }
0x16f5   :  { %v2731_v6 = vpop.permute.xlu0 %2730 }
0x16f6   :  { %4899 = vmatpush.xpose.msk.msra.mxu3 %vm222_vm1, %v2731_v6 }
0x16f9   :  { %4900 = vmatmul.msk.f32.vlgmr.msra.gmra.mxu3 %vm222_vm1, %v2727_v8 }
0x16fd   :  { %v2858_v23 = vpop.permute.xlu0 %2857 }
0x1701   :  { %4901 = vmatmul.msk.f32.gmra.mxu3 %vm222_vm1, %v2729_v47 }
0x1751   :  { %v2562_v18 = vpop.f32.mrf.mxu1 }
0x1752   :  { %4896 = vmatmul.msk.f32.vlgmr.msra.gmra.mxu1 %vm222_vm1, %v2562_v18 }
0x1759   :  { %v2565_v9 = vpop.f32.mrf.mxu1 }
0x175a   :  { %4897 = vmatmul.msk.f32.gmra.mxu1 %vm222_vm1, %v2565_v9 }
0x1762   :  { %4908 = vmatmul.msk.f32.vlgmr.msrb.gmra.mxu1 %vm222_vm1, %v2858_v23 }
0x176a   :  { %4909 = vmatmul.msk.f32.gmra.mxu1 %vm222_vm1, %v2860_v16 }
0x176c   :  { %v2601_v19 = vpop.f32.mrf.mxu3 }
0x176d   :  { %v2607_v22 = vmul.f32 0.35355338, %v2601_v19 }
0x176f   :  { %v2609_v55 = vadd.f32 %v2607_v22, %v6328_v33 }
0x1771   :  { %v2611_v42 = vsel %vm258_vm2, %v2609_v55, -inf }
0x1772   :  { %2612 = vmax.xlane.f32.xlu0 %v2611_v42 }
0x1774   :  { %v2604_v24 = vpop.f32.mrf.mxu3 }
0x1775   :  { %v2608_v14 = vmul.f32 0.35355338, %v2604_v24 }
0x1777   :  { %v2610_v25 = vadd.f32 %v2608_v14, %v6333_v0 }
0x1779   :  { %v2614_v27 = vsel %vm2513_vm8, %v2610_v25, -inf }
0x177a   :  { %2615 = vmax.xlane.f32.xlu1 %v2614_v27 }
0x177c   :  { %v2759_v28 = vpop.f32.mrf.mxu3 }
0x177d   :  { %v2765_v30 = vmul.f32 0.35355338, %v2759_v28 }
0x177f   :  { %v2767_v48 = vadd.f32 %v2765_v30, %v6328_v33 }
0x1781   :  { %v2769_v31 = vsel %vm258_vm2, %v2767_v48, -inf }
0x1782   :  { %2770 = vmax.xlane.f32.xlu0 %v2769_v31 }
0x1784   :  { %v2762_v36 = vpop.f32.mrf.mxu3 }
0x1785   :  { %v2766_v40 = vmul.f32 0.35355338, %v2762_v36 }
0x1787   :  { %v2768_v4 = vadd.f32 %v2766_v40, %v6333_v0 }
0x1789   :  { %v2772_v52 = vsel %vm2513_vm8, %v2768_v4, -inf }
0x17cf   :  { %v6378_v32 = vpop.f32.mrf.mxu1 }
0x17d7   :  { %v6380_v15 = vpop.f32.mrf.mxu1 }
0x17df   :  { %v2890_v34 = vpop.f32.mrf.mxu1 }
0x17e0   :  { %v2896_v35 = vmul.f32 0.35355338, %v2890_v34 }
0x17e2   :  { %v2898_v37 = vadd.f32 %v2896_v35, %v6328_v33 }
0x17e4   :  { %v2900_v41 = vsel %vm258_vm2, %v2898_v37, -inf }
0x17e5   :  { %v2613_v29 = vpop.xlane.xlu0 %2612  ;;  %2901 = vmax.xlane.f32.xlu2 %v2900_v41 }
0x17e6   :  { %v2617_v26 = vsub.f32 %v2609_v55, %v2613_v29 }
0x17e7   :  { %v2893_v50 = vpop.f32.mrf.mxu1 }
0x17e8   :  { %v2619_v62 = vmul.f32 1.442695, %v2617_v26  ;;  %v2897_v13 = vmul.f32 0.35355338, %v2893_v50 }
0x17ea   :  { %5362 = vpow2.f32 %v2619_v62  ;;  %v2899_v43 = vadd.f32 %v2897_v13, %v6333_v0 }
0x17ec   :  { %v2903_v17 = vsel %vm2513_vm8, %v2899_v43, -inf }
0x17ed   :  { %v2616_v54 = vpop.xlane.xlu1 %2615  ;;  %2773 = vmax.xlane.f32.xlu2 %v2772_v52  ;;  %2904 = vmax.xlane.f32.xlu1 %v2903_v17  ;;  %v2386_v52 = vld [vmem:[%s6858_s7 + $0x10] sm:$0xff]  ;;  %v2387_v17 = vld [vmem:[%s6858_s7 + $0x18] sm:$0xff] }
0x17ee   :  { %v2618_v33 = vsub.f32 %v2610_v25, %v2616_v54 }
0x17f0   :  { %v5363_v7 = vpop.eup %5362  ;;  %v2621_v51 = vmul.f32 1.442695, %v2618_v33 }
0x17f1   :  { %v2623_v46 = vsel %vm258_vm2, %v5363_v7, 0.0 }
0x17f2   :  { %5364 = vpow2.f32 %v2621_v51  ;;  %2624 = vadd.xlane.f32.xlu0 %v2623_v46 }
0x17f5   :  { %v2771_v49 = vpop.xlane.xlu0 %2770 }
0x17f6   :  { %v2775_v44 = vsub.f32 %v2767_v48, %v2771_v49 }
0x17f8   :  { %v5365_v59 = vpop.eup %5364  ;;  %v2777_v63 = vmul.f32 1.442695, %v2775_v44 }
0x17f9   :  { %v2626_v0 = vsel %vm2513_vm8, %v5365_v59, 0.0 }
0x17fa   :  { %5366 = vpow2.f32 %v2777_v63  ;;  %2627 = vadd.xlane.f32.xlu2 %v2626_v0 }
0x1800   :  { %v5367_v57 = vpop.eup %5366 }
0x1801   :  { %v2781_v5 = vsel %vm258_vm2, %v5367_v57, 0.0 }
0x1802   :  { %2782 = vadd.xlane.f32.xlu2 %v2781_v5 }
0x1806   :  { %5152 = vrot.lane.b32.xlu1 %v6337_v45, %s5546_s23 }
0x180e   :  { %5162 = vrot.lane.b32.xlu1 %v6337_v45, %s5543_s16 }
0x1858   :  { %v2902_v58 = vpop.xlane.xlu2 %2901 }
0x1859   :  { %v2906_v53 = vsub.f32 %v2898_v37, %v2902_v58  ;;  %v2385_v37 = vld [vmem:[%s6858_s7 + $0x8] sm:$0xff] }
0x185a   :  { %2689 = vmatpush.msrb.mxu0 %v2385_v37 }
0x185b   :  { %v2908_v60 = vmul.f32 1.442695, %v2906_v53  ;;  %v5217_v53 = vld [vmem:[%s6859_s10] ss:$0 sm:$0xff] }
0x185c   :  { %2847 = vmatpush.msra.mxu0 %v2386_v52 }
0x185d   :  { %5368 = vpow2.f32 %v2908_v60 }
0x1860   :  { %v2905_v61 = vpop.xlane.xlu1 %2904  ;;  %v2774_v1 = vpop.xlane.xlu2 %2773 }
0x1861   :  { %v2907_v2 = vsub.f32 %v2899_v43, %v2905_v61  ;;  %v2776_v6 = vsub.f32 %v2768_v4, %v2774_v1 }
0x1863   :  { %v5369_v10 = vpop.eup %5368  ;;  %v2910_v3 = vmul.f32 1.442695, %v2907_v2  ;;  %v2779_v47 = vmul.f32 1.442695, %v2776_v6 }
0x1864   :  { %v2912_v8 = vsel %vm258_vm2, %v5369_v10, 0.0 }
0x1865   :  { %5370 = vpow2.f32 %v2910_v3  ;;  %2913 = vadd.xlane.f32.xlu0 %v2912_v8  ;;  %v2625_v23 = vpop.xlane.xlu0 %2624 }
0x1866   :  { %5372 = vpow2.f32 %v2779_v47 }
0x1867   :  { %5374 = vrcp.f32 %v2625_v23 }
0x186b   :  { %v5371_v18 = vpop.eup %5370 }
0x186c   :  { %v2915_v9 = vsel %vm2513_vm8, %v5371_v18, 0.0  ;;  %v5373_v16 = vpop.eup %5372 }
0x186d   :  { %2916 = vadd.xlane.f32.xlu2 %v2915_v9  ;;  %v2784_v19 = vsel %vm2513_vm8, %v5373_v16, 0.0  ;;  %v2628_v22 = vpop.xlane.xlu2 %2627  ;;  %v5375_v42 = vpop.eup %5374 }
0x186e   :  { %5376 = vrcp.f32 %v2628_v22  ;;  %v2631_v25 = vmul.f32 %v5375_v42, %v5363_v7 }
0x1874   :  { %v5377_v30 = vpop.eup %5376 }
0x1875   :  { %2785 = vadd.xlane.f32.xlu2 %v2784_v19  ;;  %v2783_v27 = vpop.xlane.xlu2 %2782  ;;  %v2632_v34 = vmul.f32 %v5377_v30, %v5365_v59  ;;  %v3051_v30 = vld [vmem:[%s6860_s11] sm:$0xff] }
0x1876   :  { %5378 = vrcp.f32 %v2783_v27  ;;  %v3053_v27 = vld [vmem:[%s6860_s11 + $0x10] sm:$0xff] }
0x1878   :  { %v5153_v55 = vpop.permute.xlu1 %5152 }
0x1879   :  { %v5154_v24 = vunpack.i.l.bf16 %v5153_v55  ;;  %5157 = vrot.lane.b32.xlu0 %v6337_v45, %s5544_s18  ;;  %v5155_v14 = vunpack.i.h.bf16 %v5153_v55 }
0x187b   :  { %2659 = vmatpush.msra.mxu2 %v5154_v24 }
0x187c   :  { %v5379_v45 = vpop.eup %5378 }
0x187d   :  { %2660 = vmatpush.msra.mxu2 %v5155_v14  ;;  %v2789_v35 = vmul.f32 %v5379_v45, %v5367_v57  ;;  %v3063_v45 = vld [vmem:[%s6861_s25 + $0x38] sm:$0xff] }
0x187e   :  { %4892 = vmatmul.msk.f32.vlgmr.msra.gmra.mxu2 %vm258_vm2, %v2631_v25  ;;  %v3054_v25 = vld [vmem:[%s6860_s11 + $0x18] sm:$0xff]  ;;  %3118 = vmatpush.msra.mxu1 %v3063_v45 }
0x1880   :  { %v5163_v28 = vpop.permute.xlu1 %5162 }
0x1881   :  { %v5164_v48 = vunpack.i.l.bf16 %v5163_v28  ;;  %v5165_v31 = vunpack.i.h.bf16 %v5163_v28  ;;  %v3052_v28 = vld [vmem:[%s6860_s11 + $0x8] sm:$0xff] }
0x1883   :  { %2817 = vmatpush.msrb.mxu2 %v5164_v48 }
0x1885   :  { %2818 = vmatpush.msrb.mxu2 %v5165_v31 }
0x1886   :  { %4893 = vmatmul.msk.f32.gmra.mxu2 %vm258_vm2, %v2632_v34 }
0x1887   :  { %2978 = vmatpush.msra.mxu2 %v2387_v17 }
0x188e   :  { %4902 = vmatmul.msk.f32.vlgmr.msrb.gmra.mxu2 %vm258_vm2, %v2789_v35  ;;  %v3062_v35 = vld [vmem:[%s6861_s25 + $0x30] sm:$0xff] }
0x188f   :  { %3119 = vmatpush.msra.mxu1 %v3062_v35 }
0x18d8   :  { %v2914_v40 = vpop.xlane.xlu0 %2913 }
0x18d9   :  { %5380 = vrcp.f32 %v2914_v40  ;;  %v3061_v40 = vld [vmem:[%s6861_s25 + $0x28] sm:$0xff] }
0x18da   :  { %3120 = vmatpush.msra.mxu1 %v3061_v40  ;;  %v4919_v40 = vld [vmem:[%s6846_s13 + $0x28] sm:$0xff] }
0x18df   :  { %v5381_v26 = vpop.eup %5380 }
0x18e0   :  { %v2917_v36 = vpop.xlane.xlu2 %2916  ;;  %v2920_v4 = vmul.f32 %v5381_v26, %v5369_v10  ;;  %v3060_v26 = vld [vmem:[%s6861_s25 + $0x20] sm:$0xff] }
0x18e1   :  { %3121 = vmatpush.msra.mxu1 %v3060_v26 }
0x18e8   :  { %v2786_v41 = vpop.xlane.xlu2 %2785 }
0x18e9   :  { %5382 = vrcp.f32 %v2786_v41 }
0x18ea   :  { %5384 = vrcp.f32 %v2917_v36 }
0x18eb   :  { %v5158_v29 = vpop.permute.xlu0 %5157 }
0x18ec   :  { %v5159_v50 = vunpack.i.l.bf16 %v5158_v29  ;;  %v5160_v62 = vunpack.i.h.bf16 %v5158_v29 }
0x18ee   :  { %2948 = vmatpush.msrb.mxu3 %v5159_v50 }
0x18ef   :  { %v5383_v13 = vpop.eup %5382 }
0x18f0   :  { %2949 = vmatpush.msrb.mxu3 %v5160_v62  ;;  %v2790_v43 = vmul.f32 %v5383_v13, %v5373_v16  ;;  %v5385_v54 = vpop.eup %5384  ;;  %v3059_v62 = vld [vmem:[%s6861_s25 + $0x18] sm:$0xff] }
0x18f1   :  { %4910 = vmatmul.msk.f32.vlgmr.msrb.gmra.mxu3 %vm258_vm2, %v2920_v4  ;;  %v2921_v33 = vmul.f32 %v5385_v54, %v5371_v18  ;;  %3122 = vmatpush.msra.mxu1 %v3059_v62 }
0x18f2   :  { %4903 = vmatmul.msk.f32.gmra.mxu2 %vm258_vm2, %v2790_v43 }
0x18f9   :  { %4911 = vmatmul.msk.f32.gmra.mxu3 %vm258_vm2, %v2921_v33  ;;  %v5218_v33 = vld [vmem:[%s6862_s3] ss:$0 sm:$0xff] }
0x1901   :  { %v2662_v7 = vpop.f32.mrf.mxu2 }
0x1902   :  { %4894 = vmatmul.msk.f32.vlgmr.msrb.gmra.mxu0 %vm222_vm1, %v2662_v7 }
0x1903   :  { %3088 = vmatpush.msrb.mxu0 %v3054_v25 }
0x1905   :  { %3089 = vmatpush.msrb.mxu0 %v3053_v27 }
0x1907   :  { %3090 = vmatpush.msrb.mxu0 %v3052_v28 }
0x1909   :  { %v2665_v51 = vpop.f32.mrf.mxu2  ;;  %3091 = vmatpush.msrb.mxu0 %v3051_v30 }
0x190a   :  { %4895 = vmatmul.msk.f32.gmra.mxu0 %vm222_vm1, %v2665_v51 }
0x1911   :  { %v2820_v46 = vpop.f32.mrf.mxu2 }
0x1912   :  { %4904 = vmatmul.msk.f32.vlgmr.msra.gmra.mxu0 %vm222_vm1, %v2820_v46  ;;  %v5219_v46 = vld [vmem:[%s6863_s6] ss:$0 sm:$0xff] }
0x1974   :  { %v2951_v49 = vpop.f32.mrf.mxu3 }
0x1975   :  { %v2823_v44 = vpop.f32.mrf.mxu2  ;;  %4912 = vmatmul.msk.f32.vlgmr.msra.gmra.mxu2 %vm222_vm1, %v2951_v49 }
0x1976   :  { %4905 = vmatmul.msk.f32.gmra.mxu0 %vm222_vm1, %v2823_v44 }
0x197c   :  { %v2954_v59 = vpop.f32.mrf.mxu3 }
0x197d   :  { %4913 = vmatmul.msk.f32.gmra.mxu2 %vm222_vm1, %v2954_v59 }
0x197f   :  { %v2691_v63 = vpop.f32.mrf.mxu0 }
0x1980   :  { %v2721_v5 = vadd.f32 %v6378_v32, %v2691_v63 }
0x1987   :  { %v2694_v0 = vpop.f32.mrf.mxu0 }
0x1988   :  { %v2724_v10 = vadd.f32 %v6380_v15, %v2694_v0 }
0x198f   :  { %v2849_v57 = vpop.f32.mrf.mxu0 }
0x1990   :  { %v2855_v58 = vadd.f32 %v2849_v57, %v2721_v5 }
0x19f3   :  { %v2852_v2 = vpop.f32.mrf.mxu0 }
0x19f4   :  { %v2856_v6 = vadd.f32 %v2852_v2, %v2724_v10  ;;  %v3058_v2 = vld [vmem:[%s6861_s25 + $0x10] sm:$0xff]  ;;  %v3057_v10 = vld [vmem:[%s6861_s25 + $0x8] sm:$0xff] }
0x19f5   :  { %3123 = vmatpush.msra.mxu1 %v3058_v2 }
0x19f7   :  { %3124 = vmatpush.msra.mxu1 %v3057_v10 }
0x19f8   :  { %v2980_v60 = vpop.f32.mrf.mxu2 }
0x19f9   :  { %v2986_v61 = vadd.f32 %v2980_v60, %v2855_v58 }
0x19fb   :  { %v2991_v1 = vadd.f32 %v5217_v53, %v2986_v61 }
0x19fd   :  { %v2993_v3 = vadd.f32 %v2991_v1, %v6294_v39 }
0x19ff   :  { %v2995_v8 = vsel %vm186_vm0, %v2993_v3, 0.0 }
0x1a00   :  { %2996 = vadd.xlane.f32.xlu1 %v2995_v8  ;;  %v2983_v47 = vpop.f32.mrf.mxu2 }
0x1a01   :  { %v2987_v18 = vadd.f32 %v2983_v47, %v2856_v6  ;;  %v5220_v6 = vld [vmem:[%s6864_s2] ss:$0 sm:$0xff] }
0x1a03   :  { %v2992_v9 = vadd.f32 %v5217_v53, %v2987_v18 }
0x1a05   :  { %v2994_v32 = vadd.f32 %v2992_v9, %v6312_v11 }
0x1a07   :  { %v2998_v23 = vsel %vm2315_vm14, %v2994_v32, 0.0 }
0x1a08   :  { %2999 = vadd.xlane.f32.xlu2 %v2998_v23 }
0x1a73   :  { %v2997_v16 = vpop.xlane.xlu1 %2996 }
0x1a74   :  { %v3001_v15 = vmul.f32 %v2997_v16, %v5894_v56  ;;  %v5221_v16 = vld [vmem:[%s6865_s1] ss:$0 sm:$0xff] }
0x1a76   :  { %v3003_v19 = vsub.f32 %v2993_v3, %v3001_v15  ;;  %v3056_v3 = vld [vmem:[%s6861_s25] sm:$0xff] }
0x1a77   :  { %3125 = vmatpush.msra.mxu1 %v3056_v3 }
0x1a78   :  { %v3005_v39 = vmul.f32 %v3003_v19, %v3003_v19 }
0x1a7a   :  { %v3007_v22 = vsel %vm186_vm0, %v3005_v39, 0.0 }
0x1a7b   :  { %3008 = vadd.xlane.f32.xlu0 %v3007_v22  ;;  %v3000_v55 = vpop.xlane.xlu2 %2999 }
0x1a7c   :  { %v3002_v42 = vmul.f32 %v3000_v55, %v5894_v56 }
0x1a7e   :  { %v3004_v24 = vsub.f32 %v2994_v32, %v3002_v42 }
0x1a80   :  { %v3006_v11 = vmul.f32 %v3004_v24, %v3004_v24 }
0x1a82   :  { %v3010_v14 = vsel %vm2315_vm14, %v3006_v11, 0.0 }
0x1a83   :  { %3011 = vadd.xlane.f32.xlu2 %v3010_v14 }
0x1aee   :  { %v3009_v48 = vpop.xlane.xlu0 %3008 }
0x1aef   :  { %v3013_v31 = vmul.f32 %v3009_v48, %v5894_v56 }
0x1af1   :  { %v3015_v34 = vadd.f32 1e-05, %v3013_v31 }
0x1af3   :  { %5386 = vrsqrt.f32 %v3015_v34  ;;  %vm3023_vm11 = vweird.f32 %v3015_v34 }
0x1af6   :  { %v3012_v36 = vpop.xlane.xlu2 %3011 }
0x1af7   :  { %v3014_v37 = vmul.f32 %v3012_v36, %v5894_v56  ;;  %v4921_v36 = vld [vmem:[%s6846_s13 + $0x38] sm:$0xff] }
0x1af8   :  { %3230 = vmatpush.msra.mxu3 %v4921_v36 }
0x1af9   :  { %v5387_v41 = vpop.eup %5386  ;;  %v3016_v29 = vadd.f32 1e-05, %v3014_v37  ;;  %v4920_v37 = vld [vmem:[%s6846_s13 + $0x30] sm:$0xff] }
0x1afa   :  { %v3018_v50 = vmul.f32 %v5387_v41, %v3015_v34  ;;  %vm3024_vm9 = vweird.f32 %v5387_v41  ;;  %3231 = vmatpush.msra.mxu3 %v4920_v37 }
0x1afb   :  { %5388 = vrsqrt.f32 %v3016_v29  ;;  %vm3025_vm12 = vmor %vm3023_vm11, %vm3024_vm9  ;;  %vm3033_vm3 = vweird.f32 %v3016_v29 }
0x1afc   :  { %v3019_v13 = vmul.f32 %v5387_v41, %v3018_v50  ;;  %3232 = vmatpush.msra.mxu3 %v4919_v40 }
0x1afe   :  { %v3020_v4 = vmul.f32 0.5, %v3019_v13 }
0x1b00   :  { %v3021_v43 = vsub.f32 1.5, %v3020_v4 }
0x1b01   :  { %v5389_v52 = vpop.eup %5388 }
0x1b02   :  { %v3022_v17 = vmul.f32 %v5387_v41, %v3021_v43  ;;  %v3028_v54 = vmul.f32 %v5389_v52, %v3016_v29  ;;  %vm3034_vm15 = vweird.f32 %v5389_v52 }
0x1b03   :  { %vm3035_vm6 = vmor %vm3033_vm3, %vm3034_vm15 }
0x1b04   :  { %v3026_v7 = vsel %vm3025_vm12, %v5387_v41, %v3022_v17  ;;  %v3029_v51 = vmul.f32 %v5389_v52, %v3028_v54  ;;  %v4918_v41 = vld [vmem:[%s6846_s13 + $0x20] sm:$0xff]  ;;  %s6867_s13 = smov 40  }
0x1b05   :  { %v3037_v49 = vmul.f32 %v3026_v7, %v3003_v19  ;;  %3233 = vmatpush.msra.mxu3 %v4918_v41 }
0x1b06   :  { %v3030_v44 = vmul.f32 0.5, %v3029_v51 }
0x1b07   :  { %v3042_v59 = vmul.f32 %v5218_v33, %v3037_v49  ;;  %v5222_v49 = vld [vmem:[%s5739_s29] ss:$0 sm:$0xff] }
0x1b08   :  { %v3031_v63 = vsub.f32 1.5, %v3030_v44 }
0x1b09   :  { %v3047_v0 = vadd.f32 %v5219_v46, %v3042_v59 }
0x1b0a   :  { %v3032_v57 = vmul.f32 %v5389_v52, %v3031_v63  ;;  %v5223_v63 = vld [vmem:[%s5744_s17] ss:$0 sm:$0xff] }
0x1b0b   :  { %v3049_v5 = vmul.f32 %v3047_v0, %v6291_v38 }
0x1b0c   :  { %v3036_v58 = vsel %vm3035_vm6, %v5389_v52, %v3032_v57 }
0x1b0d   :  { %v3038_v53 = vmul.f32 %v3036_v58, %v3004_v24  ;;  %4914 = vmatmul.msk.f32.vlgmr.msrb.gmra.mxu0 %vm186_vm0, %v3049_v5 }
0x1b0f   :  { %v3043_v60 = vmul.f32 %v5218_v33, %v3038_v53 }
0x1b11   :  { %v3048_v61 = vadd.f32 %v5219_v46, %v3043_v60 }
0x1b13   :  { %v3050_v1 = vmul.f32 %v3048_v61, %v6306_v20 }
0x1b15   :  { %4915 = vmatmul.msk.f32.gmra.mxu0 %vm186_vm0, %v3050_v1 }
0x1b8a   :  { %v3093_v8 = vpop.f32.mrf.mxu0 }
0x1b8b   :  { %v3094_v47 = vadd.f32 %v5220_v6, %v3093_v8  ;;  %v5224_v8 = vld [vmem:[%s6848_s8 + $0x1] ss:$0 sm:$0xff] }
0x1b8d   :  { %v3099_v18 = vmax.f32 %v3094_v47, 0.0 }
0x1b8f   :  { %4916 = vmatmul.msk.f32.vlgmr.msra.gmra.mxu1 %vm869_vm10, %v3099_v18 }
0x1b92   :  { %v3096_v9 = vpop.f32.mrf.mxu0 }
0x1b93   :  { %v3097_v32 = vadd.f32 %v5220_v6, %v3096_v9 }
0x1b95   :  { %v3100_v23 = vmax.f32 %v3097_v32, 0.0 }
0x1b97   :  { %4917 = vmatmul.msk.f32.gmra.mxu1 %vm869_vm10, %v3100_v23 }
0x1c0c   :  { %v3127_v15 = vpop.f32.mrf.mxu1 }
0x1c0d   :  { %v3128_v19 = vadd.f32 %v5221_v16, %v3127_v15 }
0x1c0f   :  { %v3133_v39 = vadd.f32 %v3128_v19, %v3049_v5 }
0x1c11   :  { %v3135_v22 = vsel %vm186_vm0, %v3133_v39, 0.0 }
0x1c12   :  { %3136 = vadd.xlane.f32.xlu2 %v3135_v22 }
0x1c14   :  { %v3130_v55 = vpop.f32.mrf.mxu1 }
0x1c15   :  { %v3131_v42 = vadd.f32 %v5221_v16, %v3130_v55 }
0x1c17   :  { %v3134_v24 = vadd.f32 %v3131_v42, %v3050_v1 }
0x1c19   :  { %v3138_v11 = vsel %vm2315_vm14, %v3134_v24, 0.0 }
0x1c1a   :  { %3139 = vadd.xlane.f32.xlu2 %v3138_v11  ;;  %v6495_v11 = vld [vmem:[%s6849_s14 + $0x8] sm:$0x3f] }
0x1c85   :  { %v3137_v14 = vpop.xlane.xlu2 %3136 }
0x1c86   :  { %v3141_v25 = vmul.f32 %v3137_v14, %v5894_v56 }
0x1c88   :  { %v3143_v27 = vsub.f32 %v3133_v39, %v3141_v25  ;;  %v6490_v39 = vld [vmem:[%s6849_s14] sm:$0xff] }
0x1c8a   :  { %v3145_v28 = vmul.f32 %v3143_v27, %v3143_v27 }
0x1c8c   :  { %v3147_v30 = vsel %vm186_vm0, %v3145_v28, 0.0 }
0x1c8d   :  { %3148 = vadd.xlane.f32.xlu2 %v3147_v30  ;;  %v3140_v48 = vpop.xlane.xlu2 %3139 }
0x1c8e   :  { %v3142_v31 = vmul.f32 %v3140_v48, %v5894_v56 }
0x1c90   :  { %v3144_v34 = vsub.f32 %v3134_v24, %v3142_v31 }
0x1c92   :  { %v3146_v45 = vmul.f32 %v3144_v34, %v3144_v34 }
0x1c94   :  { %v3150_v35 = vsel %vm2315_vm14, %v3146_v45, 0.0 }
0x1c95   :  { %3151 = vadd.xlane.f32.xlu2 %v3150_v35 }
0x1d00   :  { %v3149_v29 = vpop.xlane.xlu2 %3148 }
0x1d01   :  { %v3153_v26 = vmul.f32 %v3149_v29, %v5894_v56 }
0x1d03   :  { %v3155_v50 = vadd.f32 1e-05, %v3153_v26 }
0x1d05   :  { %5390 = vrsqrt.f32 %v3155_v50  ;;  %vm3163_vm9 = vweird.f32 %v3155_v50 }
0x1d08   :  { %v3152_v62 = vpop.xlane.xlu2 %3151 }
0x1d09   :  { %v3154_v13 = vmul.f32 %v3152_v62, %v5894_v56 }
0x1d0b   :  { %v5391_v4 = vpop.eup %5390  ;;  %v3156_v43 = vadd.f32 1e-05, %v3154_v13  ;;  %v4923_v13 = vld [vmem:[%s6850_s19 + $0x20] sm:$0xff] }
0x1d0c   :  { %v3158_v52 = vmul.f32 %v5391_v4, %v3155_v50  ;;  %vm3164_vm7 = vweird.f32 %v5391_v4 }
0x1d0d   :  { %5392 = vrsqrt.f32 %v3156_v43  ;;  %vm3165_vm11 = vmor %vm3163_vm9, %vm3164_vm7  ;;  %vm3173_vm15 = vweird.f32 %v3156_v43 }
0x1d0e   :  { %v3159_v17 = vmul.f32 %v5391_v4, %v3158_v52 }
0x1d10   :  { %v3160_v54 = vmul.f32 0.5, %v3159_v17 }
0x1d12   :  { %v3161_v33 = vsub.f32 1.5, %v3160_v54 }
0x1d13   :  { %v5393_v7 = vpop.eup %5392 }
0x1d14   :  { %v3162_v51 = vmul.f32 %v5391_v4, %v3161_v33  ;;  %v3168_v46 = vmul.f32 %v5393_v7, %v3156_v43  ;;  %vm3174_vm12 = vweird.f32 %v5393_v7 }
0x1d15   :  { %vm3175_vm3 = vmor %vm3173_vm15, %vm3174_vm12 }
0x1d16   :  { %v3166_v44 = vsel %vm3165_vm11, %v5391_v4, %v3162_v51  ;;  %v3169_v59 = vmul.f32 %v5393_v7, %v3168_v46 }
0x1d17   :  { %v3177_v0 = vmul.f32 %v3166_v44, %v3143_v27 }
0x1d18   :  { %v3170_v57 = vmul.f32 0.5, %v3169_v59 }
0x1d19   :  { %v3182_v5 = vmul.f32 %v5222_v49, %v3177_v0 }
0x1d1a   :  { %v3171_v58 = vsub.f32 1.5, %v3170_v57 }
0x1d1b   :  { %v3187_v53 = vadd.f32 %v5223_v63, %v3182_v5 }
0x1d1c   :  { %v3172_v60 = vmul.f32 %v5393_v7, %v3171_v58 }
0x1d1d   :  { %v6465_v61 = vmul.f32 %v3187_v53, %v6291_v38 }
0x1d1e   :  { %v3176_v1 = vsel %vm3175_vm3, %v5393_v7, %v3172_v60 }
0x1d1f   :  { %v3178_v2 = vmul.f32 %v3176_v1, %v3144_v34  ;;  %4930 = vmatmul.msk.f32.vlgmr.msra.gmra.mxu3 %vm186_vm0, %v6465_v61 }
0x1d21   :  { %v3183_v10 = vmul.f32 %v5222_v49, %v3178_v2 }
0x1d23   :  { %v3188_v3 = vadd.f32 %v5223_v63, %v3183_v10 }
0x1d25   :  { %v6470_v6 = vmul.f32 %v3188_v3, %v6306_v20 }
0x1d27   :  { %4931 = vmatmul.msk.f32.gmra.mxu3 %vm186_vm0, %v6470_v6 }
0x1da2   :  { %v3235_v47 = vpop.f32.mrf.mxu3 }
0x1da3   :  { %v6475_v18 = vadd.f32 %v5224_v8, %v3235_v47 }
0x1da5   :  { %3243 = vrot.lane.b32.xlu0 %v6475_v18, %s5540_s0 }
0x1daa   :  { %v3238_v9 = vpop.f32.mrf.mxu3 }
0x1dab   :  { %v6479_v32 = vadd.f32 %v5224_v8, %v3238_v9 }
0x1dad   :  { %3245 = vrot.lane.b32.xlu1 %v6479_v32, %s5540_s0 }
0x1e17   :  { %v3244_v16 = vpop.permute.xlu0 %3243 }
0x1e1f   :  { %v3246_v23 = vpop.permute.xlu1 %3245 }
0x1e20   :  { %4932 = vmatpush.xpose.msk.msrb.mxu2 %vm222_vm1, %v3246_v23 }
0x1e24   :  { %4933 = vmatpush.xpose.msk.msrb.mxu2 %vm222_vm1, %v3244_v16 }
0x1e27   :  { %4934 = vmatmul.msk.f32.vlgmr.msrb.gmra.mxu2 %vm222_vm1, %v6475_v18 }
0x1e2f   :  { %4935 = vmatmul.msk.f32.gmra.mxu2 %vm222_vm1, %v6479_v32 }
0x1eaa   :  { %v3272_v15 = vpop.f32.mrf.mxu2 }
0x1eab   :  { %v3278_v19 = vmul.f32 0.35355338, %v3272_v15 }
0x1ead   :  { %v3280_v22 = vadd.f32 %v6490_v39, %v3278_v19 }
0x1eaf   :  { %v3282_v55 = vsel %vm1821_vm4, %v3280_v22, -inf }
0x1eb0   :  { %3283 = vmax.xlane.f32.xlu2 %v3282_v55 }
0x1eb2   :  { %v3275_v42 = vpop.f32.mrf.mxu2 }
0x1eb3   :  { %v3279_v24 = vmul.f32 0.35355338, %v3275_v42 }
0x1eb5   :  { %v3281_v14 = vadd.f32 %v6495_v11, %v3279_v24 }
0x1eb7   :  { %v3285_v25 = vsel %vm1825_vm5, %v3281_v14, -inf }
0x1eb8   :  { %3286 = vmax.xlane.f32.xlu2 %v3285_v25 }
0x1ed0   :  { %3306 = vrot.lane.b32.xlu2 %v6479_v32, %s5541_s5 }
0x1ed8   :  { %3304 = vrot.lane.b32.xlu2 %v6475_v18, %s5541_s5  ;;  %s6866_s5 = smov 48  }
0x1ee0   :  { %3346 = vrot.lane.b32.xlu2 %v6479_v32, %s5546_s23 }
0x1ee8   :  { %3344 = vrot.lane.b32.xlu2 %v6475_v18, %s5546_s23 }
0x1ef0   :  { %3505 = vrot.lane.b32.xlu2 %v6479_v32, %s5543_s16 }
0x1ef8   :  { %3503 = vrot.lane.b32.xlu2 %v6475_v18, %s5543_s16 }
0x1f00   :  { %3637 = vrot.lane.b32.xlu2 %v6479_v32, %s5544_s18 }
0x1f08   :  { %3631 = vrot.lane.b32.xlu2 %v6475_v18, %s5547_s26 }
0x1f23   :  { %v3284_v27 = vpop.xlane.xlu2 %3283 }
0x1f24   :  { %v3288_v28 = vsub.f32 %v3280_v22, %v3284_v27 }
0x1f26   :  { %v3290_v30 = vmul.f32 1.442695, %v3288_v28 }
0x1f28   :  { %5394 = vpow2.f32 %v3290_v30 }
0x1f2b   :  { %v3287_v48 = vpop.xlane.xlu2 %3286 }
0x1f2c   :  { %v3289_v31 = vsub.f32 %v3281_v14, %v3287_v48 }
0x1f2e   :  { %v5395_v34 = vpop.eup %5394  ;;  %v3292_v45 = vmul.f32 1.442695, %v3289_v31 }
0x1f2f   :  { %v3294_v35 = vsel %vm1821_vm4, %v5395_v34, 0.0 }
0x1f30   :  { %5396 = vpow2.f32 %v3292_v45  ;;  %3295 = vadd.xlane.f32.xlu0 %v3294_v35 }
0x1f33   :  { %v3307_v36 = vpop.permute.xlu2 %3306 }
0x1f34   :  { %4936 = vmatpush.msk.msra.mxu0 %vm1856_vm13, %v3307_v36 }
0x1f36   :  { %v5397_v37 = vpop.eup %5396 }
0x1f37   :  { %v3297_v40 = vsel %vm1825_vm5, %v5397_v37, 0.0 }
0x1f38   :  { %3298 = vadd.xlane.f32.xlu1 %v3297_v40 }
0x1f3b   :  { %v3305_v41 = vpop.permute.xlu2 %3304 }
0x1f3c   :  { %3332 = vmatpush.msra.mxu0 %v3305_v41 }
0x1f3e   :  { %3491 = vmatpush.msrb.mxu0 %v4923_v13 }
0x1f43   :  { %v3347_v29 = vpop.permute.xlu2 %3346 }
0x1f44   :  { %3340 = vrot.lane.b32.xlu0 %v6475_v18, %s5542_s15  ;;  %4939 = vmatpush.xpose.msk.msrb.mxu1 %vm222_vm1, %v3347_v29 }
0x1f4b   :  { %v3345_v26 = vpop.permute.xlu2 %3344 }
0x1f4c   :  { %3499 = vrot.lane.b32.xlu0 %v6475_v18, %s5545_s22  ;;  %4940 = vmatpush.xpose.msk.msrb.mxu1 %vm222_vm1, %v3345_v26 }
0x1f51   :  { %3342 = vrot.lane.b32.xlu1 %v6479_v32, %s5542_s15 }
0x1f53   :  { %v3506_v50 = vpop.permute.xlu2 %3505 }
0x1f54   :  { %3501 = vrot.lane.b32.xlu0 %v6479_v32, %s5545_s22  ;;  %4950 = vmatpush.xpose.msk.msra.mxu1 %vm222_vm1, %v3506_v50 }
0x1f59   :  { %3635 = vrot.lane.b32.xlu1 %v6475_v18, %s5544_s18 }
0x1f5b   :  { %v3504_v62 = vpop.permute.xlu2 %3503 }
0x1f5c   :  { %4951 = vmatpush.xpose.msk.msra.mxu1 %vm222_vm1, %v3504_v62 }
0x1f61   :  { %3633 = vrot.lane.b32.xlu1 %v6479_v32, %s5547_s26 }
0x1f63   :  { %v3638_v54 = vpop.permute.xlu2 %3637 }
0x1f6b   :  { %v3632_v60 = vpop.permute.xlu2 %3631 }
0x1fa3   :  { %v3296_v4 = vpop.xlane.xlu0 %3295 }
0x1fa4   :  { %5398 = vrcp.f32 %v3296_v4 }
0x1faa   :  { %v5399_v43 = vpop.eup %5398 }
0x1fab   :  { %v3302_v52 = vmul.f32 %v5399_v43, %v5395_v34  ;;  %v3299_v17 = vpop.xlane.xlu1 %3298 }
0x1fac   :  { %5400 = vrcp.f32 %v3299_v17 }
0x1fad   :  { %4937 = vmatmul.msk.f32.vlgmr.msra.gmra.mxu0 %vm1821_vm4, %v3302_v52 }
0x1fae   :  { %4959 = vmatpush.xpose.msk.msra.mxu0 %vm222_vm1, %v3638_v54 }
0x1fb2   :  { %v5401_v33 = vpop.eup %5400 }
0x1fb3   :  { %v3303_v7 = vmul.f32 %v5401_v33, %v5397_v37 }
0x1fb5   :  { %4938 = vmatmul.msk.f32.gmra.mxu0 %vm1821_vm4, %v3303_v7 }
0x1fb6   :  { %v3341_v51 = vpop.permute.xlu0 %3340 }
0x1fb7   :  { %4941 = vmatmul.msk.f32.vlgmr.msrb.gmra.mxu1 %vm222_vm1, %v3341_v51 }
0x1fbe   :  { %v3500_v49 = vpop.permute.xlu0 %3499 }
0x1fc3   :  { %v3343_v46 = vpop.permute.xlu1 %3342 }
0x1fc4   :  { %4942 = vmatmul.msk.f32.gmra.mxu1 %vm222_vm1, %v3343_v46 }
0x1fc6   :  { %v3502_v59 = vpop.permute.xlu0 %3501 }
0x1fcb   :  { %v3636_v44 = vpop.permute.xlu1 %3635 }
0x1fcc   :  { %4952 = vmatmul.msk.f32.vlgmr.msra.gmra.mxu1 %vm222_vm1, %v3500_v49  ;;  %4960 = vmatpush.xpose.msk.msra.mxu0 %vm222_vm1, %v3636_v44 }
0x1fd3   :  { %v3634_v2 = vpop.permute.xlu1 %3633 }
0x1fd4   :  { %4953 = vmatmul.msk.f32.gmra.mxu1 %vm222_vm1, %v3502_v59 }
0x202a   :  { %v3334_v63 = vpop.f32.mrf.mxu0 }
0x202b   :  { %4948 = vmatmul.msk.f32.vlgmr.msrb.gmra.mxu0 %vm222_vm1, %v3334_v63 }
0x2032   :  { %v3337_v0 = vpop.f32.mrf.mxu0 }
0x2033   :  { %4949 = vmatmul.msk.f32.gmra.mxu0 %vm222_vm1, %v3337_v0 }
0x2034   :  { %v3373_v57 = vpop.f32.mrf.mxu1 }
0x2035   :  { %v3379_v5 = vmul.f32 0.35355338, %v3373_v57 }
0x2037   :  { %v3381_v58 = vadd.f32 %v6490_v39, %v3379_v5 }
0x2039   :  { %v3383_v53 = vsel %vm1821_vm4, %v3381_v58, -inf }
0x203a   :  { %3384 = vmax.xlane.f32.xlu0 %v3383_v53 }
0x203b   :  { %4961 = vmatmul.msk.f32.vlgmr.msra.gmra.mxu0 %vm222_vm1, %v3632_v60 }
0x2041   :  { %v3376_v1 = vpop.f32.mrf.mxu1 }
0x2042   :  { %v3380_v10 = vmul.f32 0.35355338, %v3376_v1 }
0x2043   :  { %4962 = vmatmul.msk.f32.gmra.mxu0 %vm222_vm1, %v3634_v2 }
0x2044   :  { %v3382_v3 = vadd.f32 %v6495_v11, %v3380_v10 }
0x2046   :  { %v3386_v8 = vsel %vm1825_vm5, %v3382_v3, -inf }
0x2047   :  { %3387 = vmax.xlane.f32.xlu2 %v3386_v8 }
0x2049   :  { %v3532_v47 = vpop.f32.mrf.mxu1 }
0x204a   :  { %v3538_v9 = vmul.f32 0.35355338, %v3532_v47 }
0x204c   :  { %v3540_v23 = vadd.f32 %v6490_v39, %v3538_v9 }
0x204e   :  { %v3542_v16 = vsel %vm1821_vm4, %v3540_v23, -inf }
0x204f   :  { %3543 = vmax.xlane.f32.xlu1 %v3542_v16 }
0x2051   :  { %v3535_v15 = vpop.f32.mrf.mxu1 }
0x2052   :  { %v3539_v19 = vmul.f32 0.35355338, %v3535_v15 }
0x2054   :  { %v3541_v22 = vadd.f32 %v6495_v11, %v3539_v19 }
0x2056   :  { %v3545_v55 = vsel %vm1825_vm5, %v3541_v22, -inf }
0x2057   :  { %3546 = vmax.xlane.f32.xlu0 %v3545_v55 }
0x20a8   :  { %v6555_v42 = vpop.f32.mrf.mxu0 }
0x20ad   :  { %v3385_v24 = vpop.xlane.xlu0 %3384 }
0x20ae   :  { %v3389_v14 = vsub.f32 %v3381_v58, %v3385_v24  ;;  %v4924_v24 = vld [vmem:[%s6850_s19 + $0x28] sm:$0xff] }
0x20af   :  { %3462 = vmatpush.msra.mxu2 %v4924_v24 }
0x20b0   :  { %v3391_v25 = vmul.f32 1.442695, %v3389_v14  ;;  %v6557_v27 = vpop.f32.mrf.mxu0 }
0x20b2   :  { %5402 = vpow2.f32 %v3391_v25 }
0x20b8   :  { %v5403_v28 = vpop.eup %5402  ;;  %v3664_v30 = vpop.f32.mrf.mxu0 }
0x20b9   :  { %v3670_v48 = vmul.f32 0.35355338, %v3664_v30  ;;  %v3395_v31 = vsel %vm1821_vm4, %v5403_v28, 0.0 }
0x20ba   :  { %3396 = vadd.xlane.f32.xlu0 %v3395_v31  ;;  %v3388_v34 = vpop.xlane.xlu2 %3387 }
0x20bb   :  { %v3672_v45 = vadd.f32 %v6490_v39, %v3670_v48  ;;  %v3390_v35 = vsub.f32 %v3382_v3, %v3388_v34  ;;  %v4925_v34 = vld [vmem:[%s6850_s19 + $0x30] sm:$0xff] }
0x20bc   :  { %3621 = vmatpush.msrb.mxu2 %v4925_v34 }
0x20bd   :  { %v3393_v36 = vmul.f32 1.442695, %v3390_v35  ;;  %v3674_v37 = vsel %vm1821_vm4, %v3672_v45, -inf }
0x20be   :  { %3675 = vmax.xlane.f32.xlu2 %v3674_v37  ;;  %v4926_v37 = vld [vmem:[%s6850_s19 + $0x38] sm:$0xff] }
0x20bf   :  { %5404 = vpow2.f32 %v3393_v36 }
0x20c0   :  { %v3667_v54 = vpop.f32.mrf.mxu0 }
0x20c1   :  { %v3671_v33 = vmul.f32 0.35355338, %v3667_v54 }
0x20c2   :  { %v3544_v40 = vpop.xlane.xlu1 %3543 }
0x20c3   :  { %v3548_v41 = vsub.f32 %v3540_v23, %v3544_v40  ;;  %v3673_v7 = vadd.f32 %v6495_v11, %v3671_v33 }
0x20c5   :  { %v5405_v29 = vpop.eup %5404  ;;  %v3550_v26 = vmul.f32 1.442695, %v3548_v41  ;;  %v3677_v51 = vsel %vm1825_vm5, %v3673_v7, -inf }
0x20c6   :  { %v3398_v50 = vsel %vm1825_vm5, %v5405_v29, 0.0 }
0x20c7   :  { %5406 = vpow2.f32 %v3550_v26  ;;  %3399 = vadd.xlane.f32.xlu1 %v3398_v50 }
0x20ca   :  { %v3547_v13 = vpop.xlane.xlu0 %3546 }
0x20cb   :  { %v3549_v4 = vsub.f32 %v3541_v22, %v3547_v13 }
0x20cd   :  { %v5407_v62 = vpop.eup %5406  ;;  %v3552_v43 = vmul.f32 1.442695, %v3549_v4 }
0x20ce   :  { %3405 = vrot.lane.b32.xlu0 %v6475_v18, %s5548_s28  ;;  %v3554_v39 = vsel %vm1821_vm4, %v5407_v62, 0.0 }
0x20cf   :  { %3555 = vadd.xlane.f32.xlu1 %v3554_v39  ;;  %5408 = vpow2.f32 %v3552_v43  ;;  %v5225_v43 = vld [vmem:[%s6851_s24 + $0x1] ss:$0 sm:$0xff] }
0x20d5   :  { %v5409_v52 = vpop.eup %5408 }
0x20d6   :  { %3407 = vrot.lane.b32.xlu2 %v6479_v32, %s5548_s28  ;;  %v3557_v17 = vsel %vm1825_vm5, %v5409_v52, 0.0 }
0x20e8   :  { %3566 = vrot.lane.b32.xlu1 %v6479_v32, %s6866_s5 }
0x20ff   :  { %3558 = vadd.xlane.f32.xlu2 %v3557_v17 }
0x2112   :  { %3678 = vmax.xlane.f32.xlu1 %v3677_v51 }
0x2117   :  { %3696 = vrot.lane.b32.xlu2 %v6475_v18, %s6867_s13 }
0x212b   :  { %3564 = vrot.lane.b32.xlu1 %v6475_v18, %s6866_s5 }
0x212d   :  { %v3397_v44 = vpop.xlane.xlu0 %3396 }
0x2131   :  { %v3676_v46 = vpop.xlane.xlu2 %3675 }
0x2132   :  { %v3680_v49 = vsub.f32 %v3672_v45, %v3676_v46 }
0x2133   :  { %3698 = vrot.lane.b32.xlu1 %v6479_v32, %s6867_s13 }
0x2134   :  { %v3682_v59 = vmul.f32 1.442695, %v3680_v49 }
0x2136   :  { %5410 = vpow2.f32 %v3682_v59 }
0x2137   :  { %5412 = vrcp.f32 %v3397_v44 }
0x2139   :  { %v3408_v63 = vpop.permute.xlu2 %3407 }
0x213a   :  { %4943 = vmatpush.msk.msrb.mxu3 %vm1856_vm13, %v3408_v63  ;;  %v3400_v0 = vpop.xlane.xlu1 %3399 }
0x213b   :  { %5414 = vrcp.f32 %v3400_v0  ;;  %v4971_v0 = vld [vmem:[%s6852_s30 + $0x38] sm:$0xff] }
0x213c   :  { %v5411_v11 = vpop.eup %5410 }
0x213d   :  { %v5413_v57 = vpop.eup %5412  ;;  %v3686_v5 = vsel %vm1821_vm4, %v5411_v11, 0.0 }
0x213e   :  { %3687 = vadd.xlane.f32.xlu0 %v3686_v5  ;;  %v3403_v18 = vmul.f32 %v5413_v57, %v5403_v28  ;;  %v4968_v57 = vld [vmem:[%s6852_s30 + $0x20] sm:$0xff]  ;;  %v4969_v5 = vld [vmem:[%s6852_s30 + $0x28] sm:$0xff] }
0x2140   :  { %v3406_v58 = vpop.permute.xlu0 %3405 }
0x2141   :  { %3433 = vmatpush.msrb.mxu3 %v3406_v58  ;;  %v5415_v32 = vpop.eup %5414 }
0x2142   :  { %4944 = vmatmul.msk.f32.vlgmr.msrb.gmra.mxu3 %vm1821_vm4, %v3403_v18  ;;  %v3404_v53 = vmul.f32 %v5415_v32, %v5405_v29  ;;  %v3556_v60 = vpop.xlane.xlu1 %3555  ;;  %v5171_v18 = vpack.i.bf16 %v4968_v57, %v4969_v5 }
0x214a   :  { %4945 = vmatmul.msk.f32.gmra.mxu3 %vm1821_vm4, %v3404_v53 }
0x215a   :  { %v3567_v1 = vpop.permute.xlu1 %3566 }
0x215b   :  { %4954 = vmatpush.msk.msra.mxu3 %vm1856_vm13, %v3567_v1 }
0x2172   :  { %v3559_v9 = vpop.xlane.xlu2 %3558 }
0x217a   :  { %v3697_v14 = vpop.permute.xlu2 %3696 }
0x2185   :  { %v3679_v2 = vpop.xlane.xlu1 %3678 }
0x2186   :  { %v3681_v10 = vsub.f32 %v3673_v7, %v3679_v2 }
0x2188   :  { %v3684_v3 = vmul.f32 1.442695, %v3681_v10 }
0x218a   :  { %5416 = vpow2.f32 %v3684_v3 }
0x218b   :  { %5418 = vrcp.f32 %v3556_v60 }
0x218c   :  { %5420 = vrcp.f32 %v3559_v9 }
0x2190   :  { %v5417_v8 = vpop.eup %5416 }
0x2191   :  { %v3689_v47 = vsel %vm1825_vm5, %v5417_v8, 0.0  ;;  %v5419_v23 = vpop.eup %5418 }
0x2192   :  { %3690 = vadd.xlane.f32.xlu1 %v3689_v47  ;;  %v3562_v16 = vmul.f32 %v5419_v23, %v5407_v62  ;;  %v5421_v19 = vpop.eup %5420 }
0x2193   :  { %v3563_v55 = vmul.f32 %v5421_v19, %v5409_v52 }
0x219d   :  { %v3565_v15 = vpop.permute.xlu1 %3564 }
0x219e   :  { %3592 = vmatpush.msra.mxu3 %v3565_v15 }
0x219f   :  { %4955 = vmatmul.msk.f32.vlgmr.msra.gmra.mxu3 %vm1821_vm4, %v3562_v16  ;;  %v6618_v16 = vld [vmem:[%s6856_s27 + $0x1] ss:$0 sm:$0xff] }
0x21a0   :  { %3753 = vmatpush.msrb.mxu3 %v4926_v37 }
0x21a5   :  { %v3699_v22 = vpop.permute.xlu1 %3698 }
0x21a6   :  { %4963 = vmatpush.msk.msrb.mxu1 %vm1856_vm13, %v3699_v22 }
0x21a7   :  { %4956 = vmatmul.msk.f32.gmra.mxu3 %vm1821_vm4, %v3563_v55 }
0x21a8   :  { %3724 = vmatpush.msrb.mxu1 %v3697_v14 }
0x21ab   :  { %5172 = vrot.lane.b32.xlu1 %v5171_v18, %s5540_s0 }
0x21b1   :  { %v3688_v25 = vpop.xlane.xlu0 %3687 }
0x21b2   :  { %5422 = vrcp.f32 %v3688_v25 }
0x21b8   :  { %v5423_v28 = vpop.eup %5422 }
0x21b9   :  { %v3694_v30 = vmul.f32 %v5423_v28, %v5411_v11 }
0x21bb   :  { %4964 = vmatmul.msk.f32.vlgmr.msrb.gmra.mxu1 %vm1821_vm4, %v3694_v30 }
0x21c5   :  { %v3435_v48 = vpop.f32.mrf.mxu3 }
0x21c6   :  { %4946 = vmatmul.msk.f32.vlgmr.msra.gmra.mxu2 %vm222_vm1, %v3435_v48 }
0x21c7   :  { %3865 = vmatpush.msra.mxu2 %v4971_v0 }
0x21cd   :  { %v3438_v31 = vpop.f32.mrf.mxu3 }
0x21ce   :  { %4947 = vmatmul.msk.f32.gmra.mxu2 %vm222_vm1, %v3438_v31  ;;  %v5226_v31 = vld [vmem:[%s6854_s12 + $0x1] ss:$0 sm:$0xff] }
0x2205   :  { %v3691_v45 = vpop.xlane.xlu1 %3690 }
0x2206   :  { %5424 = vrcp.f32 %v3691_v45 }
0x220c   :  { %v5425_v35 = vpop.eup %5424 }
0x220d   :  { %v3695_v36 = vmul.f32 %v5425_v35, %v5417_v8  ;;  %v5227_v35 = vld [vmem:[%s6855_s20 + $0x1] ss:$0 sm:$0xff] }
0x220f   :  { %4965 = vmatmul.msk.f32.gmra.mxu1 %vm1821_vm4, %v3695_v36 }
0x221d   :  { %v5173_v25 = vpop.permute.xlu1 %5172 }
0x221e   :  { %v5174_v45 = vunpack.i.l.bf16 %v5173_v25  ;;  %v5175_v37 = vunpack.i.h.bf16 %v5173_v25 }
0x2222   :  { %v3594_v40 = vpop.f32.mrf.mxu3 }
0x2223   :  { %4957 = vmatmul.msk.f32.vlgmr.msrb.gmra.mxu2 %vm222_vm1, %v3594_v40 }
0x222a   :  { %v3597_v41 = vpop.f32.mrf.mxu3 }
0x222b   :  { %4958 = vmatmul.msk.f32.gmra.mxu2 %vm222_vm1, %v3597_v41 }
0x2238   :  { %v3726_v29 = vpop.f32.mrf.mxu1 }
0x2239   :  { %4966 = vmatmul.msk.f32.vlgmr.msrb.gmra.mxu3 %vm222_vm1, %v3726_v29 }
0x2249   :  { %v3464_v50 = vpop.f32.mrf.mxu2 }
0x224a   :  { %v3494_v13 = vadd.f32 %v6555_v42, %v3464_v50 }
0x2251   :  { %v3467_v62 = vpop.f32.mrf.mxu2 }
0x2252   :  { %v3497_v46 = vadd.f32 %v6557_v27, %v3467_v62 }
0x228c   :  { %v3729_v26 = vpop.f32.mrf.mxu1 }
0x228d   :  { %4967 = vmatmul.msk.f32.gmra.mxu3 %vm222_vm1, %v3729_v26 }
0x22a6   :  { %v3623_v39 = vpop.f32.mrf.mxu2 }
0x22a7   :  { %v3629_v4 = vadd.f32 %v3623_v39, %v3494_v13 }
0x22ae   :  { %v3626_v51 = vpop.f32.mrf.mxu2 }
0x22af   :  { %v3630_v49 = vadd.f32 %v3626_v51, %v3497_v46 }
0x22bc   :  { %v3755_v52 = vpop.f32.mrf.mxu3 }
0x22bd   :  { %v3761_v17 = vadd.f32 %v3755_v52, %v3629_v4 }
0x22bf   :  { %v3766_v54 = vadd.f32 %v5225_v43, %v3761_v17 }
0x22c1   :  { %v3768_v33 = vadd.f32 %v3766_v54, %v6465_v61  ;;  %v4970_v61 = vld [vmem:[%s6852_s30 + $0x30] sm:$0xff] }
0x22c2   :  { %3866 = vmatpush.msra.mxu2 %v4970_v61  ;;  %v5166_v60 = vpack.i.bf16 %v4970_v61, %v4971_v0 }
0x22c3   :  { %v3770_v7 = vsel %vm186_vm0, %v3768_v33, 0.0 }
0x22c4   :  { %3771 = vadd.xlane.f32.xlu0 %v3770_v7  ;;  %3867 = vmatpush.msra.mxu2 %v4969_v5 }
0x22c6   :  { %3868 = vmatpush.msra.mxu2 %v4968_v57 }
0x2310   :  { %v3758_v44 = vpop.f32.mrf.mxu3 }
0x2311   :  { %v3762_v42 = vadd.f32 %v3758_v44, %v3630_v49 }
0x2313   :  { %v3767_v59 = vadd.f32 %v5225_v43, %v3762_v42 }
0x2315   :  { %v3769_v63 = vadd.f32 %v3767_v59, %v6470_v6 }
0x2317   :  { %v3773_v11 = vsel %vm2315_vm14, %v3769_v63, 0.0 }
0x2318   :  { %3774 = vadd.xlane.f32.xlu0 %v3773_v11 }
0x2337   :  { %v3772_v27 = vpop.xlane.xlu0 %3771 }
0x2338   :  { %v3776_v58 = vmul.f32 %v3772_v27, %v5894_v56 }
0x233a   :  { %v3778_v32 = vsub.f32 %v3768_v33, %v3776_v58 }
0x233c   :  { %v3780_v6 = vmul.f32 %v3778_v32, %v3778_v32 }
0x233e   :  { %v3782_v53 = vsel %vm186_vm0, %v3780_v6, 0.0 }
0x233f   :  { %3783 = vadd.xlane.f32.xlu0 %v3782_v53 }
0x2353   :  { %5167 = vrot.lane.b32.xlu0 %v5166_v60, %s5540_s0 }
0x235b   :  { %3892 = vrot.lane.b32.xlu0 %v6618_v16, %s5540_s0 }
0x238b   :  { %v3775_v1 = vpop.xlane.xlu0 %3774 }
0x238c   :  { %v3777_v2 = vmul.f32 %v3775_v1, %v5894_v56 }
0x238e   :  { %v3779_v10 = vsub.f32 %v3769_v63, %v3777_v2  ;;  %v6666_v2 = vld [vmem:[%s6857_s4 + $0x8] sm:$0x3f] }
0x2390   :  { %v3781_v3 = vmul.f32 %v3779_v10, %v3779_v10 }
0x2392   :  { %v3785_v8 = vsel %vm2315_vm14, %v3781_v3, 0.0 }
0x2393   :  { %3786 = vadd.xlane.f32.xlu2 %v3785_v8 }
0x23b2   :  { %v3784_v47 = vpop.xlane.xlu0 %3783 }
0x23b3   :  { %v3788_v9 = vmul.f32 %v3784_v47, %v5894_v56 }
0x23b5   :  { %v3790_v23 = vadd.f32 1e-05, %v3788_v9 }
0x23b7   :  { %5426 = vrsqrt.f32 %v3790_v23  ;;  %vm3798_vm5 = vweird.f32 %v3790_v23 }
0x23bd   :  { %v5427_v15 = vpop.eup %5426 }
0x23be   :  { %v3793_v19 = vmul.f32 %v5427_v15, %v3790_v23  ;;  %vm3799_vm4 = vweird.f32 %v5427_v15 }
0x23bf   :  { %vm3800_vm13 = vmor %vm3798_vm5, %vm3799_vm4 }
0x23c0   :  { %v3794_v22 = vmul.f32 %v5427_v15, %v3793_v19 }
0x23c2   :  { %v3795_v55 = vmul.f32 0.5, %v3794_v22 }
0x23c4   :  { %v3796_v24 = vsub.f32 1.5, %v3795_v55 }
0x23c5   :  { %v5168_v14 = vpop.permute.xlu0 %5167 }
0x23c6   :  { %v3797_v28 = vmul.f32 %v5427_v15, %v3796_v24  ;;  %v5170_v30 = vunpack.i.h.bf16 %v5168_v14  ;;  %v5169_v48 = vunpack.i.l.bf16 %v5168_v14 }
0x23c8   :  { %v3801_v34 = vsel %vm3800_vm13, %v5427_v15, %v3797_v28  ;;  %3907 = vmatpush.msrb.mxu0 %v5169_v48 }
0x23c9   :  { %v3812_v36 = vmul.f32 %v3801_v34, %v3778_v32  ;;  %v6654_v32 = vld [vmem:[%s6857_s4] sm:$0xff] }
0x23ca   :  { %3908 = vmatpush.msrb.mxu0 %v5170_v30 }
0x23cb   :  { %v3817_v40 = vmul.f32 %v5226_v31, %v3812_v36 }
0x23cc   :  { %3909 = vmatpush.msrb.mxu0 %v5174_v45 }
0x23cd   :  { %v3822_v41 = vadd.f32 %v5227_v35, %v3817_v40  ;;  %v3893_v46 = vpop.permute.xlu0 %3892 }
0x23ce   :  { %3910 = vmatpush.msrb.mxu0 %v5175_v37 }
0x23cf   :  { %v6625_v29 = vmul.f32 %v3822_v41, %v6291_v38  ;;  %4982 = vmatmul.msk.f32.vlgmr.msrb.gmra.mxu0 %vm186_vm0, %v6309_v21 }
0x23d1   :  { %4980 = vmatmul.msk.f32.vlgmr.msra.gmra.mxu2 %vm186_vm0, %v6625_v29 }
0x23d7   :  { %4983 = vmatmul.msk.f32.gmra.mxu0 %vm186_vm0, %v6319_v12 }
0x2406   :  { %v3787_v26 = vpop.xlane.xlu2 %3786 }
0x2407   :  { %v3789_v50 = vmul.f32 %v3787_v26, %v5894_v56 }
0x2409   :  { %v3791_v62 = vadd.f32 1e-05, %v3789_v50 }
0x240b   :  { %5428 = vrsqrt.f32 %v3791_v62  ;;  %vm3808_vm7 = vweird.f32 %v3791_v62 }
0x2411   :  { %v5429_v39 = vpop.eup %5428 }
0x2412   :  { %v3803_v13 = vmul.f32 %v5429_v39, %v3791_v62  ;;  %vm3809_vm6 = vweird.f32 %v5429_v39 }
0x2413   :  { %vm3810_vm9 = vmor %vm3808_vm7, %vm3809_vm6 }
0x2414   :  { %v3804_v4 = vmul.f32 %v5429_v39, %v3803_v13 }
0x2416   :  { %v3805_v43 = vmul.f32 0.5, %v3804_v4 }
0x2418   :  { %v3806_v52 = vsub.f32 1.5, %v3805_v43 }
0x241a   :  { %v3807_v17 = vmul.f32 %v5429_v39, %v3806_v52 }
0x241c   :  { %v3811_v21 = vsel %vm3810_vm9, %v5429_v39, %v3807_v17 }
0x241d   :  { %v3813_v54 = vmul.f32 %v3811_v21, %v3779_v10 }
0x241f   :  { %v3818_v33 = vmul.f32 %v5226_v31, %v3813_v54  ;;  %v4973_v31 = vld [vmem:[%s6858_s7 + $0x20] sm:$0xff] }
0x2421   :  { %v3823_v7 = vadd.f32 %v5227_v35, %v3818_v33 }
0x2423   :  { %v6635_v12 = vmul.f32 %v3823_v7, %v6306_v20 }
0x2425   :  { %4981 = vmatmul.msk.f32.gmra.mxu2 %vm186_vm0, %v6635_v12 }
0x244c   :  { %v3912_v51 = vpop.f32.mrf.mxu0 }
0x244d   :  { %v6639_v44 = vadd.f32 %v3912_v51, %v3893_v46 }
0x2454   :  { %v3915_v49 = vpop.f32.mrf.mxu0  ;;  %v3870_v63 = vpop.f32.mrf.mxu2 }
0x2455   :  { %v3916_v42 = vadd.f32 %v3915_v49, %v3893_v46  ;;  %v3871_v11 = vadd.f32 %v6618_v16, %v3870_v63 }
0x2457   :  { %4984 = vmatpush.xpose.msk.msra.mxu1 %vm222_vm1, %v3916_v42  ;;  %v6643_v59 = vpack.i.bf16 %v6639_v44, %v3916_v42 }
0x2459   :  { %5177 = vrot.lane.b32.xlu2 %v6643_v59, %s5540_s0 }
0x245b   :  { %4985 = vmatpush.xpose.msk.msra.mxu1 %vm222_vm1, %v6639_v44 }
0x245e   :  { %4986 = vmatmul.msk.f32.vlgmr.msra.gmra.mxu1 %vm222_vm1, %v3871_v11 }
0x24a8   :  { %v3873_v0 = vpop.f32.mrf.mxu2 }
0x24a9   :  { %v3874_v61 = vadd.f32 %v6618_v16, %v3873_v0 }
0x24ab   :  { %4987 = vmatmul.msk.f32.gmra.mxu1 %vm222_vm1, %v3874_v61 }
0x24b3   :  { %v5178_v57 = vpop.permute.xlu2 %5177 }
0x24b4   :  { %v5179_v5 = vunpack.i.l.bf16 %v5178_v57  ;;  %v5180_v18 = vunpack.i.h.bf16 %v5178_v57 }
0x24b6   :  { %4005 = vmatpush.msra.mxu3 %v5179_v5 }
0x24b8   :  { %4006 = vmatpush.msra.mxu3 %v5180_v18 }
0x24ba   :  { %4164 = vmatpush.msrb.mxu3 %v4973_v31 }
0x24db   :  { %v3947_v27 = vpop.f32.mrf.mxu1 }
0x24dc   :  { %v3953_v58 = vmul.f32 0.35355338, %v3947_v27 }
0x24de   :  { %v3955_v6 = vadd.f32 %v6654_v32, %v3953_v58 }
0x24e0   :  { %v3957_v53 = vsel %vm258_vm2, %v3955_v6, -inf }
0x24e1   :  { %3958 = vmax.xlane.f32.xlu0 %v3957_v53 }
0x24f5   :  { %4020 = vrot.lane.b32.xlu0 %v3916_v42, %s5542_s15 }
0x24fd   :  { %4014 = vrot.lane.b32.xlu0 %v3871_v11, %s5542_s15 }
0x2505   :  { %4309 = vrot.lane.b32.xlu0 %v3916_v42, %s5547_s26 }
0x250d   :  { %4178 = vrot.lane.b32.xlu0 %v3916_v42, %s5545_s22 }
0x2515   :  { %4176 = vrot.lane.b32.xlu0 %v6639_v44, %s5545_s22 }
0x251d   :  { %4305 = vrot.lane.b32.xlu0 %v3874_v61, %s5547_s26 }
0x2528   :  { %v3950_v60 = vpop.f32.mrf.mxu1 }
0x2529   :  { %v3954_v1 = vmul.f32 0.35355338, %v3950_v60 }
0x252b   :  { %v3956_v10 = vadd.f32 %v6666_v2, %v3954_v1 }
0x252d   :  { %v3960_v3 = vsel %vm2513_vm8, %v3956_v10, -inf }
0x252e   :  { %3961 = vmax.xlane.f32.xlu1 %v3960_v3 }
0x2547   :  { %4018 = vrot.lane.b32.xlu1 %v6639_v44, %s5542_s15 }
0x254f   :  { %4016 = vrot.lane.b32.xlu1 %v3874_v61, %s5542_s15 }
0x2554   :  { %v3959_v8 = vpop.xlane.xlu0 %3958 }
0x2555   :  { %v3963_v47 = vsub.f32 %v3955_v6, %v3959_v8 }
0x2557   :  { %v3965_v9 = vmul.f32 1.442695, %v3963_v47  ;;  %4303 = vrot.lane.b32.xlu1 %v3871_v11, %s5547_s26 }
0x2559   :  { %5430 = vpow2.f32 %v3965_v9 }
0x255f   :  { %v5431_v23 = vpop.eup %5430  ;;  %4172 = vrot.lane.b32.xlu1 %v3871_v11, %s5545_s22 }
0x2560   :  { %v3969_v16 = vsel %vm258_vm2, %v5431_v23, 0.0 }
0x2561   :  { %3970 = vadd.xlane.f32.xlu2 %v3969_v16 }
0x2567   :  { %v4021_v15 = vpop.permute.xlu0 %4020  ;;  %4174 = vrot.lane.b32.xlu1 %v3874_v61, %s5545_s22 }
0x2568   :  { %4990 = vmatpush.xpose.msk.msrb.mxu2 %vm222_vm1, %v4021_v15 }
0x256f   :  { %v4015_v19 = vpop.permute.xlu0 %4014 }
0x2577   :  { %v4310_v14 = vpop.permute.xlu0 %4309 }
0x257f   :  { %v4179_v30 = vpop.permute.xlu0 %4178 }
0x2587   :  { %v4177_v34 = vpop.permute.xlu0 %4176 }
0x258f   :  { %v4306_v11 = vpop.permute.xlu0 %4305 }
0x25a1   :  { %v3962_v22 = vpop.xlane.xlu1 %3961 }
0x25a2   :  { %v3964_v55 = vsub.f32 %v3956_v10, %v3962_v22 }
0x25a4   :  { %v3967_v24 = vmul.f32 1.442695, %v3964_v55 }
0x25a6   :  { %5432 = vpow2.f32 %v3967_v24 }
0x25ac   :  { %v5433_v25 = vpop.eup %5432 }
0x25ad   :  { %v3972_v28 = vsel %vm2513_vm8, %v5433_v25, 0.0 }
0x25ae   :  { %3973 = vadd.xlane.f32.xlu2 %v3972_v28 }
0x25b9   :  { %v4019_v48 = vpop.permute.xlu1 %4018 }
0x25ba   :  { %4991 = vmatpush.xpose.msk.msrb.mxu2 %vm222_vm1, %v4019_v48 }
0x25bd   :  { %4992 = vmatmul.msk.f32.vlgmr.msrb.gmra.mxu2 %vm222_vm1, %v4015_v19 }
0x25be   :  { %5000 = vmatpush.xpose.msk.msra.mxu2 %vm222_vm1, %v4179_v30 }
0x25c1   :  { %v4017_v45 = vpop.permute.xlu1 %4016 }
0x25c2   :  { %5001 = vmatpush.xpose.msk.msra.mxu2 %vm222_vm1, %v4177_v34 }
0x25c5   :  { %4993 = vmatmul.msk.f32.gmra.mxu2 %vm222_vm1, %v4017_v45 }
0x25c6   :  { %4307 = vrot.lane.b32.xlu2 %v6639_v44, %s5547_s26 }
0x25c9   :  { %v4304_v35 = vpop.permute.xlu1 %4303 }
0x25d1   :  { %v4173_v36 = vpop.permute.xlu1 %4172 }
0x25d2   :  { %5002 = vmatmul.msk.f32.vlgmr.msra.gmra.mxu2 %vm222_vm1, %v4173_v36 }
0x25d4   :  { %v3971_v37 = vpop.xlane.xlu2 %3970 }
0x25d5   :  { %5434 = vrcp.f32 %v3971_v37 }
0x25d9   :  { %v4175_v40 = vpop.permute.xlu1 %4174 }
0x25da   :  { %5003 = vmatmul.msk.f32.gmra.mxu2 %vm222_vm1, %v4175_v40 }
0x25db   :  { %v5435_v41 = vpop.eup %5434 }
0x25dc   :  { %v3977_v26 = vmul.f32 %v5435_v41, %v5431_v23 }
0x25de   :  { %4988 = vmatmul.msk.f32.vlgmr.msra.gmra.mxu3 %vm258_vm2, %v3977_v26 }
0x25df   :  { %5008 = vmatpush.xpose.msk.msra.mxu3 %vm222_vm1, %v4310_v14 }
0x2621   :  { %v3974_v50 = vpop.xlane.xlu2 %3973 }
0x2622   :  { %5436 = vrcp.f32 %v3974_v50 }
0x2628   :  { %v5437_v62 = vpop.eup %5436 }
0x2629   :  { %v4308_v39 = vpop.permute.xlu2 %4307  ;;  %v3978_v13 = vmul.f32 %v5437_v62, %v5433_v25 }
0x262a   :  { %5009 = vmatpush.xpose.msk.msra.mxu3 %vm222_vm1, %v4308_v39 }
0x262b   :  { %4989 = vmatmul.msk.f32.gmra.mxu3 %vm258_vm2, %v3978_v13 }
0x2640   :  { %v4047_v4 = vpop.f32.mrf.mxu2 }
0x2641   :  { %v4053_v43 = vmul.f32 0.35355338, %v4047_v4 }
0x2643   :  { %v4055_v52 = vadd.f32 %v6654_v32, %v4053_v43 }
0x2645   :  { %v4057_v17 = vsel %vm258_vm2, %v4055_v52, -inf }
0x2646   :  { %4058 = vmax.xlane.f32.xlu0 %v4057_v17 }
0x2648   :  { %v4050_v21 = vpop.f32.mrf.mxu2 }
0x2649   :  { %v4054_v54 = vmul.f32 0.35355338, %v4050_v21 }
0x264b   :  { %v4056_v33 = vadd.f32 %v6666_v2, %v4054_v54 }
0x264d   :  { %v4060_v7 = vsel %vm2513_vm8, %v4056_v33, -inf }
0x264e   :  { %4061 = vmax.xlane.f32.xlu2 %v4060_v7 }
0x2655   :  { %v4205_v51 = vpop.f32.mrf.mxu2 }
0x2656   :  { %v4211_v46 = vmul.f32 0.35355338, %v4205_v51 }
0x2658   :  { %v4213_v49 = vadd.f32 %v6654_v32, %v4211_v46 }
0x265a   :  { %v4215_v44 = vsel %vm258_vm2, %v4213_v49, -inf }
0x265b   :  { %4216 = vmax.xlane.f32.xlu0 %v4215_v44 }
0x265d   :  { %v4208_v1 = vpop.f32.mrf.mxu2 }
0x265e   :  { %v4212_v8 = vmul.f32 0.35355338, %v4208_v1 }
0x2660   :  { %v4214_v16 = vadd.f32 %v6666_v2, %v4212_v8 }
0x2661   :  { %v4008_v42 = vpop.f32.mrf.mxu3 }
0x2662   :  { %4998 = vmatmul.msk.f32.vlgmr.msrb.gmra.mxu3 %vm222_vm1, %v4008_v42  ;;  %v4218_v14 = vsel %vm2513_vm8, %v4214_v16, -inf }
0x26ae   :  { %v4011_v63 = vpop.f32.mrf.mxu3 }
0x26af   :  { %4999 = vmatmul.msk.f32.gmra.mxu3 %vm222_vm1, %v4011_v63 }
0x26b7   :  { %5010 = vmatmul.msk.f32.vlgmr.msra.gmra.mxu3 %vm222_vm1, %v4304_v35 }
0x26b9   :  { %v4059_v0 = vpop.xlane.xlu0 %4058 }
0x26ba   :  { %v4063_v61 = vsub.f32 %v4055_v52, %v4059_v0 }
0x26bc   :  { %v4065_v57 = vmul.f32 1.442695, %v4063_v61  ;;  %v4974_v61 = vld [vmem:[%s6858_s7 + $0x28] sm:$0xff] }
0x26bd   :  { %4135 = vmatpush.msrb.mxu1 %v4974_v61  ;;  %v5026_v61 = vld [vmem:[%s6861_s25 + $0x68] sm:$0xff] }
0x26be   :  { %5438 = vpow2.f32 %v4065_v57  ;;  %v4975_v57 = vld [vmem:[%s6858_s7 + $0x30] sm:$0xff] }
0x26bf   :  { %5011 = vmatmul.msk.f32.gmra.mxu3 %vm222_vm1, %v4306_v11  ;;  %4293 = vmatpush.msra.mxu1 %v4975_v57 }
0x26c1   :  { %v4062_v53 = vpop.xlane.xlu2 %4061 }
0x26c2   :  { %v4064_v3 = vsub.f32 %v4056_v33, %v4062_v53 }
0x26c4   :  { %v5439_v5 = vpop.eup %5438  ;;  %v4067_v9 = vmul.f32 1.442695, %v4064_v3 }
0x26c5   :  { %v4069_v18 = vsel %vm258_vm2, %v5439_v5, 0.0 }
0x26c6   :  { %4070 = vadd.xlane.f32.xlu0 %v4069_v18  ;;  %5440 = vpow2.f32 %v4067_v9 }
0x26cc   :  { %v5441_v25 = vpop.eup %5440 }
0x26cd   :  { %v4072_v28 = vsel %vm2513_vm8, %v5441_v25, 0.0 }
0x26ce   :  { %v4217_v15 = vpop.xlane.xlu0 %4216 }
0x26cf   :  { %v4221_v55 = vsub.f32 %v4213_v49, %v4217_v15 }
0x26e5   :  { %v6704_v27 = vpop.f32.mrf.mxu3 }
0x2732   :  { %v6706_v58 = vpop.f32.mrf.mxu3 }
0x2739   :  { %v4071_v45 = vpop.xlane.xlu0 %4070 }
0x273a   :  { %v4336_v6 = vpop.f32.mrf.mxu3 }
0x273b   :  { %v4342_v60 = vmul.f32 0.35355338, %v4336_v6 }
0x273d   :  { %v4344_v10 = vadd.f32 %v6654_v32, %v4342_v60  ;;  %v4223_v32 = vmul.f32 1.442695, %v4221_v55 }
0x273f   :  { %v4346_v47 = vsel %vm258_vm2, %v4344_v10, -inf  ;;  %5442 = vpow2.f32 %v4223_v32 }
0x2740   :  { %4347 = vmax.xlane.f32.xlu1 %v4346_v47 }
0x2742   :  { %v4339_v23 = vpop.f32.mrf.mxu3 }
0x2743   :  { %v4343_v19 = vmul.f32 0.35355338, %v4339_v23 }
0x2745   :  { %v4345_v22 = vadd.f32 %v6666_v2, %v4343_v19  ;;  %v5443_v30 = vpop.eup %5442  ;;  %v4976_v19 = vld [vmem:[%s6858_s7 + $0x38] sm:$0xff] }
0x2746   :  { %v4227_v48 = vsel %vm258_vm2, %v5443_v30, 0.0 }
0x2747   :  { %v4349_v24 = vsel %vm2513_vm8, %v4345_v22, -inf }
0x2748   :  { %4350 = vmax.xlane.f32.xlu2 %v4349_v24  ;;  %4219 = vmax.xlane.f32.xlu1 %v4218_v14 }
0x2750   :  { %4073 = vadd.xlane.f32.xlu1 %v4072_v28 }
0x2758   :  { %4228 = vadd.xlane.f32.xlu1 %v4227_v48  ;;  %v5229_v48 = vld [vmem:[%s6859_s10 + $0x1] ss:$0 sm:$0xff] }
0x2760   :  { %5182 = vrot.lane.b32.xlu2 %v6643_v59, %s5546_s23 }
0x2768   :  { %5192 = vrot.lane.b32.xlu2 %v6643_v59, %s5543_s16  ;;  %s5492_s16 = scalar_lea.hbm %s5754_s21, 16 }
0x27b3   :  { %v4348_v2 = vpop.xlane.xlu1 %4347 }
0x27b4   :  { %v4352_v31 = vsub.f32 %v4344_v10, %v4348_v2 }
0x27b6   :  { %v4354_v34 = vmul.f32 1.442695, %v4352_v31 }
0x27b8   :  { %5444 = vpow2.f32 %v4354_v34 }
0x27b9   :  { %5446 = vrcp.f32 %v4071_v45 }
0x27bb   :  { %v4351_v35 = vpop.xlane.xlu2 %4350  ;;  %v4220_v36 = vpop.xlane.xlu1 %4219 }
0x27bc   :  { %v4353_v37 = vsub.f32 %v4345_v22, %v4351_v35  ;;  %v4222_v40 = vsub.f32 %v4214_v16, %v4220_v36 }
0x27be   :  { %v5445_v41 = vpop.eup %5444  ;;  %v4356_v26 = vmul.f32 1.442695, %v4353_v37  ;;  %v4225_v62 = vmul.f32 1.442695, %v4222_v40 }
0x27bf   :  { %v4358_v50 = vsel %vm258_vm2, %v5445_v41, 0.0  ;;  %v5447_v4 = vpop.eup %5446 }
0x27c0   :  { %5448 = vpow2.f32 %v4356_v26  ;;  %4359 = vadd.xlane.f32.xlu0 %v4358_v50  ;;  %v4077_v21 = vmul.f32 %v5447_v4, %v5439_v5 }
0x27c1   :  { %5450 = vpow2.f32 %v4225_v62 }
0x27c3   :  { %v5183_v39 = vpop.permute.xlu2 %5182  ;;  %v4074_v13 = vpop.xlane.xlu1 %4073 }
0x27c4   :  { %v5184_v43 = vunpack.i.l.bf16 %v5183_v39  ;;  %v5185_v17 = vunpack.i.h.bf16 %v5183_v39  ;;  %5452 = vrcp.f32 %v4074_v13 }
0x27c6   :  { %v5449_v52 = vpop.eup %5448  ;;  %4105 = vmatpush.msra.mxu0 %v5184_v43 }
0x27c7   :  { %v4361_v54 = vsel %vm2513_vm8, %v5449_v52, 0.0  ;;  %v5451_v33 = vpop.eup %5450 }
0x27c8   :  { %4106 = vmatpush.msra.mxu0 %v5185_v17  ;;  %4362 = vadd.xlane.f32.xlu1 %v4361_v54  ;;  %v4230_v42 = vsel %vm2513_vm8, %v5451_v33, 0.0  ;;  %v5019_v54 = vld [vmem:[%s6860_s11 + $0x38] sm:$0xff] }
0x27c9   :  { %4994 = vmatmul.msk.f32.vlgmr.msra.gmra.mxu0 %vm258_vm2, %v4077_v21 }
0x27ca   :  { %v5453_v46 = vpop.eup %5452 }
0x27cb   :  { %v5193_v7 = vpop.permute.xlu2 %5192  ;;  %v4229_v51 = vpop.xlane.xlu1 %4228  ;;  %v4078_v63 = vmul.f32 %v5453_v46, %v5441_v25 }
0x27cc   :  { %v5194_v49 = vunpack.i.l.bf16 %v5193_v7  ;;  %v5195_v44 = vunpack.i.h.bf16 %v5193_v7  ;;  %5454 = vrcp.f32 %v4229_v51  ;;  %v5017_v7 = vld [vmem:[%s6860_s11 + $0x28] sm:$0xff]  ;;  %v5016_v51 = vld [vmem:[%s6860_s11 + $0x20] sm:$0xff] }
0x27ce   :  { %4263 = vmatpush.msrb.mxu0 %v5194_v49 }
0x27d0   :  { %4264 = vmatpush.msrb.mxu0 %v5195_v44  ;;  %4231 = vadd.xlane.f32.xlu1 %v4230_v42  ;;  %v5028_v42 = vld [vmem:[%s6861_s25 + $0x78] sm:$0xff] }
0x27d1   :  { %4995 = vmatmul.msk.f32.gmra.mxu0 %vm258_vm2, %v4078_v63  ;;  %v5027_v63 = vld [vmem:[%s6861_s25 + $0x70] sm:$0xff]  ;;  %4570 = vmatpush.msrb.mxu3 %v5028_v42  ;;  %v4646_v42 = vld [vmem:[%s5749_s9 + $0x18] sm:$0xff] }
0x27d2   :  { %v5455_v11 = vpop.eup %5454  ;;  %4424 = vmatpush.msra.mxu0 %v4976_v19 }
0x27d3   :  { %v4235_v0 = vmul.f32 %v5455_v11, %v5443_v30  ;;  %4571 = vmatpush.msrb.mxu3 %v5027_v63  ;;  %v4645_v63 = vld [vmem:[%s5749_s9 + $0x10] sm:$0xff] }
0x27d4   :  { %5187 = vrot.lane.b32.xlu0 %v6643_v59, %s5544_s18 }
0x27d5   :  { %4572 = vmatpush.msrb.mxu3 %v5026_v61 }
0x27d9   :  { %5004 = vmatmul.msk.f32.vlgmr.msrb.gmra.mxu0 %vm258_vm2, %v4235_v0 }
0x2833   :  { %v4360_v18 = vpop.xlane.xlu0 %4359 }
0x2834   :  { %5456 = vrcp.f32 %v4360_v18  ;;  %v5025_v18 = vld [vmem:[%s6861_s25 + $0x60] sm:$0xff] }
0x2835   :  { %4573 = vmatpush.msrb.mxu3 %v5025_v18 }
0x283a   :  { %v5457_v1 = vpop.eup %5456 }
0x283b   :  { %v4363_v5 = vpop.xlane.xlu1 %4362  ;;  %v4366_v8 = vmul.f32 %v5457_v1, %v5445_v41 }
0x2843   :  { %v4232_v6 = vpop.xlane.xlu1 %4231 }
0x2844   :  { %5458 = vrcp.f32 %v4232_v6 }
0x2845   :  { %5460 = vrcp.f32 %v4363_v5 }
0x2846   :  { %v4108_v53 = vpop.f32.mrf.mxu0  ;;  %v5188_v60 = vpop.permute.xlu0 %5187 }
0x2847   :  { %v5189_v10 = vunpack.i.l.bf16 %v5188_v60  ;;  %4996 = vmatmul.msk.f32.vlgmr.msrb.gmra.mxu1 %vm222_vm1, %v4108_v53  ;;  %v5190_v59 = vunpack.i.h.bf16 %v5188_v60  ;;  %v5024_v53 = vld [vmem:[%s6861_s25 + $0x58] sm:$0xff] }
0x2848   :  { %4540 = vmatpush.msrb.mxu1 %v5019_v54  ;;  %4574 = vmatpush.msrb.mxu3 %v5024_v53 }
0x2849   :  { %4394 = vmatpush.msrb.mxu2 %v5189_v10 }
0x284a   :  { %v5459_v3 = vpop.eup %5458 }
0x284b   :  { %4395 = vmatpush.msrb.mxu2 %v5190_v59  ;;  %v4236_v47 = vmul.f32 %v5459_v3, %v5451_v33  ;;  %v5461_v23 = vpop.eup %5460  ;;  %v5018_v33 = vld [vmem:[%s6860_s11 + $0x30] sm:$0xff] }
0x284c   :  { %5012 = vmatmul.msk.f32.vlgmr.msrb.gmra.mxu2 %vm258_vm2, %v4366_v8  ;;  %v4367_v16 = vmul.f32 %v5461_v23, %v5449_v52  ;;  %4541 = vmatpush.msrb.mxu1 %v5018_v33 }
0x284d   :  { %5005 = vmatmul.msk.f32.gmra.mxu0 %vm258_vm2, %v4236_v47  ;;  %v5230_v47 = vld [vmem:[%s6862_s3 + $0x1] ss:$0 sm:$0xff]  ;;  %4665 = vmatpush.msra.mxu2 %v4646_v42 }
0x284e   :  { %v4111_v9 = vpop.f32.mrf.mxu0  ;;  %4542 = vmatpush.msrb.mxu1 %v5017_v7 }
0x284f   :  { %4997 = vmatmul.msk.f32.gmra.mxu1 %vm222_vm1, %v4111_v9  ;;  %4666 = vmatpush.msra.mxu2 %v4645_v63 }
0x2850   :  { %4543 = vmatpush.msrb.mxu1 %v5016_v51 }
0x2854   :  { %5013 = vmatmul.msk.f32.gmra.mxu2 %vm258_vm2, %v4367_v16  ;;  %v5231_v16 = vld [vmem:[%s6863_s6 + $0x1] ss:$0 sm:$0xff] }
0x2856   :  { %v4266_v15 = vpop.f32.mrf.mxu0 }
0x2857   :  { %5006 = vmatmul.msk.f32.vlgmr.msra.gmra.mxu1 %vm222_vm1, %v4266_v15 }
0x28c4   :  { %v4137_v14 = vpop.f32.mrf.mxu1 }
0x28c5   :  { %v4167_v28 = vadd.f32 %v6704_v27, %v4137_v14 }
0x28ca   :  { %v4269_v22 = vpop.f32.mrf.mxu0 }
0x28cb   :  { %5007 = vmatmul.msk.f32.gmra.mxu1 %vm222_vm1, %v4269_v22 }
0x28cc   :  { %v4140_v32 = vpop.f32.mrf.mxu1 }
0x28cd   :  { %v4170_v35 = vadd.f32 %v6706_v58, %v4140_v32 }
0x28cf   :  { %v4397_v55 = vpop.f32.mrf.mxu2 }
0x28d0   :  { %5014 = vmatmul.msk.f32.vlgmr.msra.gmra.mxu0 %vm222_vm1, %v4397_v55 }
0x28d4   :  { %v4295_v25 = vpop.f32.mrf.mxu1 }
0x28d5   :  { %v4301_v30 = vadd.f32 %v4295_v25, %v4167_v28 }
0x28d7   :  { %v4400_v24 = vpop.f32.mrf.mxu2 }
0x28d8   :  { %5015 = vmatmul.msk.f32.gmra.mxu0 %vm222_vm1, %v4400_v24 }
0x2948   :  { %v4298_v45 = vpop.f32.mrf.mxu1 }
0x2949   :  { %v4302_v37 = vadd.f32 %v4298_v45, %v4170_v35  ;;  %v5021_v45 = vld [vmem:[%s6861_s25 + $0x40] sm:$0xff] }
0x294a   :  { %v5232_v35 = vld [vmem:[%s6864_s2 + $0x1] ss:$0 sm:$0xff] }
0x294d   :  { %v4426_v2 = vpop.f32.mrf.mxu0 }
0x294e   :  { %v4432_v31 = vadd.f32 %v4426_v2, %v4301_v30 }
0x2950   :  { %v4437_v34 = vadd.f32 %v5229_v48, %v4432_v31  ;;  %v5023_v31 = vld [vmem:[%s6861_s25 + $0x50] sm:$0xff] }
0x2951   :  { %4575 = vmatpush.msrb.mxu3 %v5023_v31 }
0x2952   :  { %v4439_v36 = vadd.f32 %v4437_v34, %v6625_v29  ;;  %v5022_v34 = vld [vmem:[%s6861_s25 + $0x48] sm:$0xff] }
0x2953   :  { %4576 = vmatpush.msrb.mxu3 %v5022_v34 }
0x2954   :  { %v4441_v40 = vsel %vm186_vm0, %v4439_v36, 0.0 }
0x2955   :  { %4442 = vadd.xlane.f32.xlu2 %v4441_v40  ;;  %v4429_v41 = vpop.f32.mrf.mxu0  ;;  %4577 = vmatpush.msrb.mxu3 %v5021_v45 }
0x2956   :  { %v4433_v26 = vadd.f32 %v4429_v41, %v4302_v37 }
0x2958   :  { %v4438_v50 = vadd.f32 %v5229_v48, %v4433_v26 }
0x295a   :  { %v4440_v27 = vadd.f32 %v4438_v50, %v6635_v12 }
0x295c   :  { %v4444_v62 = vsel %vm2315_vm14, %v4440_v27, 0.0 }
0x295d   :  { %4445 = vadd.xlane.f32.xlu0 %v4444_v62 }
0x29c8   :  { %v4443_v39 = vpop.xlane.xlu2 %4442 }
0x29c9   :  { %v4447_v58 = vmul.f32 %v4443_v39, %v5894_v56 }
0x29cb   :  { %v4449_v13 = vsub.f32 %v4439_v36, %v4447_v58 }
0x29cd   :  { %v4451_v29 = vmul.f32 %v4449_v13, %v4449_v13 }
0x29cf   :  { %v4453_v4 = vsel %vm186_vm0, %v4451_v29, 0.0 }
0x29d0   :  { %4454 = vadd.xlane.f32.xlu1 %v4453_v4  ;;  %v4446_v43 = vpop.xlane.xlu0 %4445 }
0x29d1   :  { %v4448_v52 = vmul.f32 %v4446_v43, %v5894_v56 }
0x29d3   :  { %v4450_v17 = vsub.f32 %v4440_v27, %v4448_v52  ;;  %v5233_v27 = vld [vmem:[%s6865_s1 + $0x1] ss:$0 sm:$0xff] }
0x29d5   :  { %v4452_v12 = vmul.f32 %v4450_v17, %v4450_v17 }
0x29d7   :  { %v4456_v21 = vsel %vm2315_vm14, %v4452_v12, 0.0 }
0x29d8   :  { %4457 = vadd.xlane.f32.xlu1 %v4456_v21 }
0x2a43   :  { %v4455_v46 = vpop.xlane.xlu1 %4454 }
0x2a44   :  { %v4459_v49 = vmul.f32 %v4455_v46, %v5894_v56 }
0x2a46   :  { %v4461_v44 = vadd.f32 1e-05, %v4459_v49 }
0x2a48   :  { %5462 = vrsqrt.f32 %v4461_v44  ;;  %vm4469_vm11 = vweird.f32 %v4461_v44 }
0x2a4b   :  { %v4458_v11 = vpop.xlane.xlu1 %4457 }
0x2a4c   :  { %v4460_v0 = vmul.f32 %v4458_v11, %v5894_v56  ;;  %v4644_v11 = vld [vmem:[%s5749_s9 + $0x8] sm:$0xff] }
0x2a4d   :  { %4667 = vmatpush.msra.mxu2 %v4644_v11 }
0x2a4e   :  { %v5463_v57 = vpop.eup %5462  ;;  %v4462_v5 = vadd.f32 1e-05, %v4460_v0  ;;  %v4643_v0 = vld [vmem:[%s5749_s9] sm:$0xff]  ;;  %s5553_s9 = smov [#allocation2]  }
0x2a4f   :  { %v4464_v6 = vmul.f32 %v5463_v57, %v4461_v44  ;;  %vm4470_vm1 = vweird.f32 %v5463_v57  ;;  %4668 = vmatpush.msra.mxu2 %v4643_v0 }
0x2a50   :  { %5464 = vrsqrt.f32 %v4462_v5  ;;  %vm4471_vm12 = vmor %vm4469_vm11, %vm4470_vm1  ;;  %vm4479_vm3 = vweird.f32 %v4462_v5 }
0x2a51   :  { %v4465_v60 = vmul.f32 %v5463_v57, %v4464_v6 }
0x2a53   :  { %v4466_v1 = vmul.f32 0.5, %v4465_v60 }
0x2a55   :  { %v4467_v10 = vsub.f32 1.5, %v4466_v1 }
0x2a56   :  { %v5465_v59 = vpop.eup %5464 }
0x2a57   :  { %v4468_v3 = vmul.f32 %v5463_v57, %v4467_v10  ;;  %v4474_v8 = vmul.f32 %v5465_v59, %v4462_v5  ;;  %vm4480_vm15 = vweird.f32 %v5465_v59 }
0x2a58   :  { %vm4481_vm4 = vmor %vm4479_vm3, %vm4480_vm15 }
0x2a59   :  { %v4472_v9 = vsel %vm4471_vm12, %v5463_v57, %v4468_v3  ;;  %v4475_v23 = vmul.f32 %v5465_v59, %v4474_v8 }
0x2a5a   :  { %v4483_v15 = vmul.f32 %v4472_v9, %v4449_v13 }
0x2a5b   :  { %v4476_v19 = vmul.f32 0.5, %v4475_v23  ;;  %v5234_v23 = vld [vmem:[%s5739_s29 + $0x1] ss:$0 sm:$0xff]  ;;  %s4686_s29 = sshll.u32 %s5754_s21, 4  ;;  %s4687_s29 = int_to_ptr.hbm [resolvable:$true] %s4686_s29 }
0x2a5c   :  { %v4488_v22 = vmul.f32 %v5230_v47, %v4483_v15  ;;  %s5488_s0 = sshra.s32 %s4687_s29, 4  ;;  %s5489_s0 = int_to_ptr.hbm [resolvable:$true] %s5488_s0 }
0x2a5d   :  { %v4477_v55 = vsub.f32 1.5, %v4476_v19  ;;  %v5235_v19 = vld [vmem:[%s5744_s17 + $0x1] ss:$0 sm:$0xff]  ;;  %s4684_s17 = sshll.u32 %s5553_s9, 4  ;;  %s5490_s15 = scalar_lea.hbm %s5489_s0, 16  ;;  %s4685_s17 = int_to_ptr.vmem [resolvable:$true] %s4684_s17 }
0x2a5e   :  { %v4493_v24 = vadd.f32 %v5231_v16, %v4488_v22  ;;  %p5491_p0 = scmp.ne.s32.totalorder %s5489_s0, %s5490_s15  ;;  %p5493_p1 = scmp.lt.s32.totalorder %s5489_s0, %s5754_s21 }
0x2a5f   :  { %v4478_v14 = vmul.f32 %v5465_v59, %v4477_v55  ;;  %p5494_p2 = scmp.lt.s32.totalorder %s5492_s16, %s5490_s15 }
0x2a60   :  { %v4495_v32 = vmul.f32 %v4493_v24, %v6291_v38 }
0x2a61   :  { %v4482_v25 = vsel %vm4481_vm4, %v5465_v59, %v4478_v14  ;;  %p5495_p3 = por %p5494_p2, %p5493_p1 }
0x2a62   :  { %v4484_v28 = vmul.f32 %v4482_v25, %v4450_v17  ;;  %5032 = vmatmul.msk.f32.vlgmr.msrb.gmra.mxu1 %vm186_vm0, %v4495_v32 }
0x2a63   :  { %p5496_p4 = pnand %p5495_p3, %p5491_p0 }
0x2a64   :  { %v4489_v30 = vmul.f32 %v5230_v47, %v4484_v28 }
0x2a66   :  { %v4494_v48 = vadd.f32 %v5231_v16, %v4489_v30 }
0x2a68   :  { %v4496_v2 = vmul.f32 %v4494_v48, %v6306_v20 }
0x2a6a   :  { %5033 = vmatmul.msk.f32.gmra.mxu1 %vm186_vm0, %v4496_v2 }
0x2adf   :  { %v4545_v36 = vpop.f32.mrf.mxu1 }
0x2ae0   :  { %v4546_v37 = vadd.f32 %v5232_v35, %v4545_v36 }
0x2ae2   :  { %v4551_v40 = vmax.f32 %v4546_v37, 0.0 }
0x2ae4   :  { %5034 = vmatmul.msk.f32.vlgmr.msrb.gmra.mxu3 %vm869_vm10, %v4551_v40 }
0x2ae7   :  { %v4548_v41 = vpop.f32.mrf.mxu1 }
0x2ae8   :  { %v4549_v26 = vadd.f32 %v5232_v35, %v4548_v41 }
0x2aea   :  { %v4552_v50 = vmax.f32 %v4549_v26, 0.0 }
0x2aec   :  { %5035 = vmatmul.msk.f32.gmra.mxu3 %vm869_vm10, %v4552_v50 }
0x2b67   :  { %v4579_v62 = vpop.f32.mrf.mxu3 }
0x2b68   :  { %v4580_v39 = vadd.f32 %v5233_v27, %v4579_v62 }
0x2b6a   :  { %v4585_v58 = vadd.f32 %v4580_v39, %v4495_v32 }
0x2b6c   :  { %v4587_v13 = vsel %vm186_vm0, %v4585_v58, 0.0 }
0x2b6d   :  { %4588 = vadd.xlane.f32.xlu1 %v4587_v13 }
0x2b6f   :  { %v4582_v29 = vpop.f32.mrf.mxu3 }
0x2b70   :  { %v4583_v4 = vadd.f32 %v5233_v27, %v4582_v29 }
0x2b72   :  { %v4586_v43 = vadd.f32 %v4583_v4, %v4496_v2 }
0x2b74   :  { %v4590_v52 = vsel %vm2315_vm14, %v4586_v43, 0.0 }
0x2b75   :  { %4591 = vadd.xlane.f32.xlu1 %v4590_v52 }
0x2be0   :  { %v4589_v17 = vpop.xlane.xlu1 %4588 }
0x2be1   :  { %v4593_v12 = vmul.f32 %v4589_v17, %v5894_v56 }
0x2be3   :  { %v4595_v21 = vsub.f32 %v4585_v58, %v4593_v12 }
0x2be5   :  { %v4597_v54 = vmul.f32 %v4595_v21, %v4595_v21 }
0x2be7   :  { %v4599_v33 = vsel %vm186_vm0, %v4597_v54, 0.0 }
0x2be8   :  { %4600 = vadd.xlane.f32.xlu1 %v4599_v33  ;;  %v4592_v7 = vpop.xlane.xlu1 %4591 }
0x2be9   :  { %v4594_v51 = vmul.f32 %v4592_v7, %v5894_v56 }
0x2beb   :  { %v4596_v46 = vsub.f32 %v4586_v43, %v4594_v51 }
0x2bed   :  { %v4598_v49 = vmul.f32 %v4596_v46, %v4596_v46 }
0x2bef   :  { %v4602_v44 = vsel %vm2315_vm14, %v4598_v49, 0.0 }
0x2bf0   :  { %4603 = vadd.xlane.f32.xlu2 %v4602_v44 }
0x2c5b   :  { %v4601_v61 = vpop.xlane.xlu1 %4600 }
0x2c5c   :  { %v4605_v57 = vmul.f32 %v4601_v61, %v5894_v56 }
0x2c5e   :  { %v4607_v5 = vadd.f32 1e-05, %v4605_v57 }
0x2c60   :  { %5466 = vrsqrt.f32 %v4607_v5  ;;  %vm4615_vm14 = vweird.f32 %v4607_v5 }
0x2c63   :  { %v4604_v18 = vpop.xlane.xlu2 %4603 }
0x2c64   :  { %v4606_v6 = vmul.f32 %v4604_v18, %v5894_v56 }
0x2c66   :  { %v5467_v53 = vpop.eup %5466  ;;  %v4608_v60 = vadd.f32 1e-05, %v4606_v6 }
0x2c67   :  { %v4610_v1 = vmul.f32 %v5467_v53, %v4607_v5  ;;  %vm4616_vm10 = vweird.f32 %v5467_v53 }
0x2c68   :  { %5468 = vrsqrt.f32 %v4608_v60  ;;  %vm4617_vm5 = vmor %vm4615_vm14, %vm4616_vm10  ;;  %vm4625_vm6 = vweird.f32 %v4608_v60 }
0x2c69   :  { %v4611_v10 = vmul.f32 %v5467_v53, %v4610_v1 }
0x2c6b   :  { %v4612_v59 = vmul.f32 0.5, %v4611_v10 }
0x2c6d   :  { %v4613_v3 = vsub.f32 1.5, %v4612_v59 }
0x2c6e   :  { %v5469_v8 = vpop.eup %5468 }
0x2c6f   :  { %v4614_v47 = vmul.f32 %v5467_v53, %v4613_v3  ;;  %v4620_v9 = vmul.f32 %v5469_v8, %v4608_v60  ;;  %vm4626_vm13 = vweird.f32 %v5469_v8 }
0x2c70   :  { %vm4627_vm7 = vmor %vm4625_vm6, %vm4626_vm13 }
0x2c71   :  { %v4618_v16 = vsel %vm4617_vm5, %v5467_v53, %v4614_v47  ;;  %v4621_v15 = vmul.f32 %v5469_v8, %v4620_v9 }
0x2c72   :  { %v4629_v22 = vmul.f32 %v4618_v16, %v4595_v21 }
0x2c73   :  { %v4622_v56 = vmul.f32 0.5, %v4621_v15 }
0x2c74   :  { %v4634_v55 = vmul.f32 %v5234_v23, %v4629_v22 }
0x2c75   :  { %v4623_v24 = vsub.f32 1.5, %v4622_v56 }
0x2c76   :  { %v4639_v14 = vadd.f32 %v5235_v19, %v4634_v55 }
0x2c77   :  { %v4624_v32 = vmul.f32 %v5469_v8, %v4623_v24 }
0x2c78   :  { %v4641_v25 = vmul.f32 %v4639_v14, %v6291_v38 }
0x2c79   :  { %v4628_v28 = vsel %vm4627_vm7, %v5469_v8, %v4624_v32 }
0x2c7a   :  { %v4630_v30 = vmul.f32 %v4628_v28, %v4596_v46  ;;  %5036 = vmatmul.msk.f32.vlgmr.msra.gmra.mxu2 %vm186_vm0, %v4641_v25 }
0x2c7c   :  { %v4635_v48 = vmul.f32 %v5234_v23, %v4630_v30 }
0x2c7e   :  { %v4640_v2 = vadd.f32 %v5235_v19, %v4635_v48 }
0x2c80   :  { %v4642_v31 = vmul.f32 %v4640_v2, %v6306_v20 }
0x2c82   :  { %5037 = vmatmul.msk.f32.gmra.mxu2 %vm186_vm0, %v4642_v31 }
0x2cfd   :  { %v4670_v34 = vpop.f32.mrf.mxu2 }
0x2cfe   :  { %v4676_v45 = vmul.f32 0.17677669, %v4670_v34 }
0x2d00   :  { %4678 = vst.msk [vmem:[#allocation2] sm:$0xff] %vm258_vm2, %v4676_v45 }
0x2d05   :  { %v4673_v38 = vpop.f32.mrf.mxu2 }
0x2d06   :  { %v4677_v35 = vmul.f32 0.17677669, %v4673_v38 }
0x2d08   :  { %4679 = vst.msk [vmem:[#allocation2 + $0x8] sm:$0x3f] %vm2513_vm8, %v4677_v35 }
0x2d09   :  { %5499 = shalt.err (!%p5496_p4)
}
0x2d0a   :  { %s5554_s18 = smov 128   ;;  %s5555_s22 = smov 8  }
0x2d0b   :  { %4692 = dma.vmem_to_hbm [thread:$0]  %s4685_s17, 256, %s4687_s29, [#allocation3], %s5554_s18, %s5554_s18, %s5555_s22  }
0x2d0c   :  { %5500 = dma.done.wait [#allocation3], 256  }
0x2d0d   :  { %5501 = vsyncadd [#allocation3], 4294967040 }
0x2d0e   :  { %4697 = vsyncpa [#allocation3], 1 }

</bundles_post_ra>
